<compile_context>
chip_gen: v5e
topology: v5e:2x2
jax: 0.10.0
libtpu: 0.0.40
codegen_flags: <defaults>
</compile_context>

<pallas_src>
import functools

import jax
import jax.numpy as jnp
from jax.experimental import pallas as pl
from jax.experimental.pallas import tpu as pltpu

# ----------------------------- config ---------------------------------------
HIDDEN = 32          # bert hidden_size (small synthetic config)
N_LAYERS = 2
N_HEADS = 4
HEAD_DIM = HIDDEN // N_HEADS
INTERMEDIATE = 64
VOCAB = 100
MAX_POS = 32
TYPE_VOCAB = 2

DS_DIM = 361
DS_IN = 3 * DS_DIM           # args.dialog_state=True, args.use_context=True -> 1083
DS_IN_PAD = 1152             # pad K to a multiple of 128: lane-dense ds, sublane-clean w_ds
DS_OUT = 256
FEAT = HIDDEN + DS_OUT       # 288
N_EMO = 7                    # args.label_type == 'emotion'
N_OUT = N_EMO + 3 + 3 + 2    # 15 fused head outputs
HEAD_PAD = 128               # lane-dense output slab
LN_EPS = 1e-12


# ----------------------------- in-kernel helpers -----------------------------
def _layernorm(x, g, b):
    mu = jnp.mean(x, axis=-1, keepdims=True)
    var = jnp.mean(jnp.square(x - mu), axis=-1, keepdims=True)
    return (x - mu) * jax.lax.rsqrt(var + LN_EPS) * g + b


def _gelu(x):
    # TODO(synk): HF BertModel default is exact erf GELU; tanh approximation used here.
    return 0.5 * x * (1.0 + jnp.tanh(0.7978845608028654 * (x + 0.044715 * x * x * x)))


def _mm(x, w_bf16):
    # bf16 MXU matmul, f32 accumulation; elementwise math stays f32 (v5e-safe).
    return jnp.dot(x.astype(jnp.bfloat16), w_bf16, preferred_element_type=jnp.float32)


# ----------------------------- fused forward kernel --------------------------
def _fused_forward_kernel(
        x_ref,          # (B*S, H)  f32  embeddings (word+pos+type), pre-LN
        mask_ref,       # (B, S)    f32  additive attention mask
        ds_ref,         # (B, DS_IN_PAD) f32
        sel_ref,        # (B, B*S)  f32  one-hot [CLS]-row selector
        emb_g_ref, emb_b_ref,                       # (1, H)
        wqkv_ref, bqkv_ref,                         # (L, H, 3H) bf16 / (L, 1, 3H) f32
        wo_ref, bo_ref,                             # (L, H, H)  bf16 / (L, 1, H)  f32
        ln1_g_ref, ln1_b_ref,                       # (L, 1, H)
        wi_ref, bi_ref,                             # (L, H, I)  bf16 / (L, 1, I)
        wo2_ref, bo2_ref,                           # (L, I, H)  bf16 / (L, 1, H)
        ln2_g_ref, ln2_b_ref,                       # (L, 1, H)
        w_pool_ref, b_pool_ref,                     # (H, H) bf16 / (1, H)
        w_ds_ref, b_ds_ref,                         # (DS_IN_PAD, DS_OUT) bf16 / (1, DS_OUT)
        w_head_cls_ref, w_head_ds_ref, b_head_ref,  # (H,128) bf16 / (256,128) bf16 / (1,128)
        o_ref,                                      # (B, 128) f32
        *, batch, seq):
    # --- BERT embedding layernorm ---
    x2 = _layernorm(x_ref[...], emb_g_ref[...], emb_b_ref[...])      # (B*S, H) f32
    mask = mask_ref[...]                                             # (B, S)

    # --- encoder layers (statically unrolled) ---
    for l in range(N_LAYERS):
        # fused QKV projection; the 1/sqrt(head_dim) scale is folded into Q weights.
        qkv = _mm(x2, wqkv_ref[l]) + bqkv_ref[l]                     # (B*S, 3H)
        ctx_rows = []
        for b in range(batch):
            rows = qkv[b * seq:(b + 1) * seq, :]                     # (S, 3H)
            m_b = mask[b:b + 1, :]                                   # (1, S)
            heads = []
            for h in range(N_HEADS):
                qh = rows[:, h * HEAD_DIM:(h + 1) * HEAD_DIM]
                kh = rows[:, HIDDEN + h * HEAD_DIM:HIDDEN + (h + 1) * HEAD_DIM]
                vh = rows[:, 2 * HIDDEN + h * HEAD_DIM:2 * HIDDEN + (h + 1) * HEAD_DIM]
                # scores = q @ k^T (contraction on the head dim, no materialized transpose)
                s = jax.lax.dot_general(qh, kh, (((1,), (1,)), ((), ())),
                                        preferred_element_type=jnp.float32)
                s = s + m_b
                s = s - jnp.max(s, axis=-1, keepdims=True)
                p = jnp.exp(s)
                p = p * pl.reciprocal(jnp.sum(p, axis=-1, keepdims=True), approx=True)
                heads.append(jnp.dot(p, vh, preferred_element_type=jnp.float32))
            ctx_rows.append(jnp.concatenate(heads, axis=-1))         # (S, H)
        ctx = jnp.concatenate(ctx_rows, axis=0)                      # (B*S, H)

        attn_out = _mm(ctx, wo_ref[l]) + bo_ref[l]
        x2 = _layernorm(attn_out + x2, ln1_g_ref[l], ln1_b_ref[l])
        h1 = _gelu(_mm(x2, wi_ref[l]) + bi_ref[l])
        ffn = _mm(h1, wo2_ref[l]) + bo2_ref[l]
        x2 = _layernorm(ffn + x2, ln2_g_ref[l], ln2_b_ref[l])

    # --- pooler on [CLS] rows (one-hot selection done on the MXU) ---
    cls = jnp.dot(sel_ref[...], x2, preferred_element_type=jnp.float32)   # (B, H)
    pooled = jnp.tanh(_mm(cls, w_pool_ref[...]) + b_pool_ref[...])
    # dropout(pooled) is identity at inference time.

    # --- dialog-state branch: tanh(Linear(3*DS_DIM -> 256)) ---
    ds_feat = jnp.tanh(_mm(ds_ref[...], w_ds_ref[...]) + b_ds_ref[...])   # (B, 256)

    # --- fused 4-head classifier on implicit concat([pooled | ds_feat]) ---
    logits = (_mm(pooled, w_head_cls_ref[...])
              + _mm(ds_feat, w_head_ds_ref[...])
              + b_head_ref[...])                                          # (B, 128) lane-dense
    o_ref[...] = logits.astype(o_ref.dtype)


def fused_forward(x_emb, add_mask, ds_pad, cls_sel, p):
    batch, seq = add_mask.shape
    args = (x_emb, add_mask, ds_pad, cls_sel,
            p["emb_ln_g"], p["emb_ln_b"],
            p["wqkv"], p["bqkv"], p["wo"], p["bo"], p["ln1_g"], p["ln1_b"],
            p["wi"], p["bi"], p["wo2"], p["bo2"], p["ln2_g"], p["ln2_b"],
            p["w_pool"], p["b_pool"], p["w_ds"], p["b_ds"],
            p["w_head_cls"], p["w_head_ds"], p["b_head"])
    return pl.pallas_call(
        functools.partial(_fused_forward_kernel, batch=batch, seq=seq),
        out_shape=jax.ShapeDtypeStruct((batch, HEAD_PAD), jnp.float32),
        in_specs=[pl.BlockSpec(memory_space=pltpu.MemorySpace.VMEM) for _ in args],
        out_specs=pl.BlockSpec(memory_space=pltpu.MemorySpace.VMEM),
        compiler_params=pltpu.CompilerParams(vmem_limit_bytes=32 * 1024 * 1024),
    )(*args)


# ----------------------------- params (pre-fused, pre-padded) ---------------
def init_params(key):
    keys = iter(jax.random.split(key, 64))

    def nrm(shape):
        return 0.02 * jax.random.normal(next(keys), shape, jnp.float32)

    def zeros(n):
        return jnp.zeros((1, n), jnp.float32)

    def ones(n):
        return jnp.ones((1, n), jnp.float32)

    scale = 1.0 / float(HEAD_DIM) ** 0.5

    wqkv, bqkv, wo, bo = [], [], [], []
    ln1_g, ln1_b, ln2_g, ln2_b = [], [], [], []
    wi, bi, wo2, bo2 = [], [], [], []
    for _ in range(N_LAYERS):
        wq, wk, wv = nrm((HIDDEN, HIDDEN)), nrm((HIDDEN, HIDDEN)), nrm((HIDDEN, HIDDEN))
        bq, bk, bv = zeros(HIDDEN), zeros(HIDDEN), zeros(HIDDEN)
        # fold the attention 1/sqrt(head_dim) scale into the Q projection
        wqkv.append(jnp.concatenate([wq * scale, wk, wv], axis=1))      # (H, 3H)
        bqkv.append(jnp.concatenate([bq * scale, bk, bv], axis=1))      # (1, 3H)
        wo.append(nrm((HIDDEN, HIDDEN)));            bo.append(zeros(HIDDEN))
        ln1_g.append(ones(HIDDEN));                  ln1_b.append(zeros(HIDDEN))
        wi.append(nrm((HIDDEN, INTERMEDIATE)));      bi.append(zeros(INTERMEDIATE))
        wo2.append(nrm((INTERMEDIATE, HIDDEN)));     bo2.append(zeros(HIDDEN))
        ln2_g.append(ones(HIDDEN));                  ln2_b.append(zeros(HIDDEN))

    def stack_bf16(xs):
        return jnp.stack(xs).astype(jnp.bfloat16)

    def stack_f32(xs):
        return jnp.stack(xs)

    # ds projection weight, K padded 1083 -> 1152 with zero rows (identical result)
    w_ds = nrm((DS_IN, DS_OUT))
    w_ds_pad = jnp.zeros((DS_IN_PAD, DS_OUT), jnp.float32).at[:DS_IN].set(w_ds)

    # fused classification heads: [emotion(7) | valence(3) | elicitor(3) | conduct(2) | 0-pad]
    w_heads = jnp.concatenate(
        [nrm((FEAT, N_EMO)), nrm((FEAT, 3)), nrm((FEAT, 3)), nrm((FEAT, 2))], axis=1)
    w_heads = jnp.pad(w_heads, ((0, 0), (0, HEAD_PAD - N_OUT)))          # (FEAT, 128)
    b_head = jnp.zeros((1, HEAD_PAD), jnp.float32)

    return {
        # embeddings stay f32 (gather happens in JAX glue)
        "word_emb": nrm((VOCAB, HIDDEN)),
        "pos_emb": nrm((MAX_POS, HIDDEN)),
        "type_emb": nrm((TYPE_VOCAB, HIDDEN)),
        "emb_ln_g": ones(HIDDEN), "emb_ln_b": zeros(HIDDEN),
        # encoder weights: matmul weights bf16, biases / LN params f32
        "wqkv": stack_bf16(wqkv), "bqkv": stack_f32(bqkv),
        "wo": stack_bf16(wo), "bo": stack_f32(bo),
        "ln1_g": stack_f32(ln1_g), "ln1_b": stack_f32(ln1_b),
        "wi": stack_bf16(wi), "bi": stack_f32(bi),
        "wo2": stack_bf16(wo2), "bo2": stack_f32(bo2),
        "ln2_g": stack_f32(ln2_g), "ln2_b": stack_f32(ln2_b),
        # pooler + ds branch + fused heads
        "w_pool": nrm((HIDDEN, HIDDEN)).astype(jnp.bfloat16), "b_pool": zeros(HIDDEN),
        "w_ds": w_ds_pad.astype(jnp.bfloat16), "b_ds": zeros(DS_OUT),
        "w_head_cls": w_heads[:HIDDEN].astype(jnp.bfloat16),      # (H, 128)
        "w_head_ds": w_heads[HIDDEN:].astype(jnp.bfloat16),       # (DS_OUT, 128)
        "b_head": b_head,
    }


# ----------------------------- forward glue ----------------------------------
def emotion_classifier_forward(params, input_ids, attention_mask, ds):
    B, S = input_ids.shape
    assert S <= MAX_POS, "sequence length exceeds position embedding table"

    # BERT embeddings: gather + add stays in JAX; everything else runs in the kernel.
    x = (params["word_emb"][input_ids]
         + params["pos_emb"][:S][None, :, :]
         + params["type_emb"][0][None, None, :]
         ).reshape(B * S, HIDDEN).astype(jnp.float32)

    add_mask = (1.0 - attention_mask.astype(jnp.float32)) * -10000.0      # (B, S)
    ds_pad = jnp.pad(ds.astype(jnp.float32), ((0, 0), (0, DS_IN_PAD - ds.shape[1])))
    # one-hot selector that picks the [CLS] row of each sequence (MXU gather)
    cls_sel = jnp.zeros((B, B * S), jnp.float32).at[
        jnp.arange(B), jnp.arange(B) * S].set(1.0)

    logits = fused_forward(x, add_mask, ds_pad, cls_sel, params)          # (B, 128)

    emotion = logits[:, :N_EMO]
    valence = logits[:, N_EMO:N_EMO + 3]
    elicitor = logits[:, N_EMO + 3:N_EMO + 6]
    conduct = logits[:, N_EMO + 6:N_OUT]
    return emotion, valence, elicitor, conduct


# ----------------------------- main ------------------------------------------
if __name__ == "__main__":
    key = jax.random.PRNGKey(0)
    pkey, ikey, dkey = jax.random.split(key, 3)

    params = init_params(pkey)

    B, S = 2, 8
    input_ids = jax.random.randint(ikey, (B, S), 0, VOCAB)
    attention_mask = jnp.ones((B, S), jnp.int32)
    ds = jax.random.uniform(dkey, (B, DS_IN), jnp.float32)

    fwd = jax.jit(emotion_classifier_forward)
    emotion, valence, elicitor, conduct = fwd(params, input_ids, attention_mask, ds)
    jax.block_until_ready((emotion, valence, elicitor, conduct))

    assert emotion.shape == (B, N_EMO)
    assert valence.shape == (B, 3)
    assert elicitor.shape == (B, 3)
    assert conduct.shape == (B, 2)
    assert bool(jnp.all(jnp.isfinite(emotion)))
    assert bool(jnp.all(jnp.isfinite(valence)))
    assert bool(jnp.all(jnp.isfinite(elicitor)))
    assert bool(jnp.all(jnp.isfinite(conduct)))
    print("KERNEL_OK")
</pallas_src>

<mosaic_0001>
module attributes {stable_mosaic.version = 11 : i64} {
  func.func @_fused_forward_kernel(%arg0: memref<16x32xf32, #tpu.memory_space<vmem>>, %arg1: memref<2x8xf32, #tpu.memory_space<vmem>>, %arg2: memref<2x1152xf32, #tpu.memory_space<vmem>>, %arg3: memref<2x16xf32, #tpu.memory_space<vmem>>, %arg4: memref<1x32xf32, #tpu.memory_space<vmem>>, %arg5: memref<1x32xf32, #tpu.memory_space<vmem>>, %arg6: memref<2x32x96xbf16, #tpu.memory_space<vmem>>, %arg7: memref<2x1x96xf32, #tpu.memory_space<vmem>>, %arg8: memref<2x32x32xbf16, #tpu.memory_space<vmem>>, %arg9: memref<2x1x32xf32, #tpu.memory_space<vmem>>, %arg10: memref<2x1x32xf32, #tpu.memory_space<vmem>>, %arg11: memref<2x1x32xf32, #tpu.memory_space<vmem>>, %arg12: memref<2x32x64xbf16, #tpu.memory_space<vmem>>, %arg13: memref<2x1x64xf32, #tpu.memory_space<vmem>>, %arg14: memref<2x64x32xbf16, #tpu.memory_space<vmem>>, %arg15: memref<2x1x32xf32, #tpu.memory_space<vmem>>, %arg16: memref<2x1x32xf32, #tpu.memory_space<vmem>>, %arg17: memref<2x1x32xf32, #tpu.memory_space<vmem>>, %arg18: memref<32x32xbf16, #tpu.memory_space<vmem>>, %arg19: memref<1x32xf32, #tpu.memory_space<vmem>>, %arg20: memref<1152x256xbf16, #tpu.memory_space<vmem>>, %arg21: memref<1x256xf32, #tpu.memory_space<vmem>>, %arg22: memref<32x128xbf16, #tpu.memory_space<vmem>>, %arg23: memref<256x128xbf16, #tpu.memory_space<vmem>>, %arg24: memref<1x128xf32, #tpu.memory_space<vmem>>, %arg25: memref<2x128xf32, #tpu.memory_space<vmem>>) attributes {dimension_semantics = [], scalar_prefetch = 0 : i64, scratch_operands = 0 : i64, tpu.core_type = #tpu.core_type<tc>} {
    %c0 = arith.constant 0 : index
    %c0_0 = arith.constant 0 : index
    %0 = vector.load %arg0[%c0, %c0_0] : memref<16x32xf32, #tpu.memory_space<vmem>>, vector<16x32xf32>
    %c0_1 = arith.constant 0 : index
    %c0_2 = arith.constant 0 : index
    %1 = vector.load %arg4[%c0_1, %c0_2] : memref<1x32xf32, #tpu.memory_space<vmem>>, vector<1x32xf32>
    %c0_3 = arith.constant 0 : index
    %c0_4 = arith.constant 0 : index
    %2 = vector.load %arg5[%c0_3, %c0_4] : memref<1x32xf32, #tpu.memory_space<vmem>>, vector<1x32xf32>
    %cst = arith.constant dense<0.000000e+00> : vector<16xf32>
    %3 = vector.multi_reduction <add>, %0, %cst [1] : vector<16x32xf32> to vector<16xf32>
    %4 = vector.shape_cast %3 : vector<16xf32> to vector<16x1xf32>
    %cst_5 = arith.constant 3.200000e+01 : f32
    %5 = vector.broadcast %cst_5 : f32 to vector<16x1xf32>
    %6 = arith.divf %4, %5 : vector<16x1xf32>
    %7 = vector.broadcast %6 : vector<16x1xf32> to vector<16x32xf32>
    %8 = arith.subf %0, %7 : vector<16x32xf32>
    %9 = arith.mulf %8, %8 : vector<16x32xf32>
    %cst_6 = arith.constant dense<0.000000e+00> : vector<16xf32>
    %10 = vector.multi_reduction <add>, %9, %cst_6 [1] : vector<16x32xf32> to vector<16xf32>
    %11 = vector.shape_cast %10 : vector<16xf32> to vector<16x1xf32>
    %cst_7 = arith.constant 3.200000e+01 : f32
    %12 = vector.broadcast %cst_7 : f32 to vector<16x1xf32>
    %13 = arith.divf %11, %12 : vector<16x1xf32>
    %14 = vector.broadcast %6 : vector<16x1xf32> to vector<16x32xf32>
    %15 = arith.subf %0, %14 : vector<16x32xf32>
    %cst_8 = arith.constant 9.99999996E-13 : f32
    %16 = vector.broadcast %cst_8 : f32 to vector<16x1xf32>
    %17 = arith.addf %13, %16 : vector<16x1xf32>
    %18 = math.rsqrt %17 : vector<16x1xf32>
    %19 = vector.broadcast %18 : vector<16x1xf32> to vector<16x32xf32>
    %20 = arith.mulf %15, %19 : vector<16x32xf32>
    %21 = vector.broadcast %1 : vector<1x32xf32> to vector<16x32xf32>
    %22 = arith.mulf %20, %21 : vector<16x32xf32>
    %23 = vector.broadcast %2 : vector<1x32xf32> to vector<16x32xf32>
    %24 = arith.addf %22, %23 : vector<16x32xf32>
    %c0_9 = arith.constant 0 : index
    %c0_10 = arith.constant 0 : index
    %25 = vector.load %arg1[%c0_9, %c0_10] : memref<2x8xf32, #tpu.memory_space<vmem>>, vector<2x8xf32>
    %c0_11 = arith.constant 0 : index
    %c0_12 = arith.constant 0 : index
    %c0_13 = arith.constant 0 : index
    %26 = vector.load %arg6[%c0_11, %c0_12, %c0_13] : memref<2x32x96xbf16, #tpu.memory_space<vmem>>, vector<1x32x96xbf16>
    %27 = vector.shape_cast %26 : vector<1x32x96xbf16> to vector<32x96xbf16>
    %28 = arith.truncf %24 : vector<16x32xf32> to vector<16x32xbf16>
    %cst_14 = arith.constant dense<0.000000e+00> : vector<16x96xf32>
    %29 = tpu.matmul %28, %27, %cst_14 {dimension_numbers = #tpu.dot_dimension_numbers<[1], [0], [0], [1], [0, 0, 1, 1], [], []>} : vector<16x32xbf16>, vector<32x96xbf16>, vector<16x96xf32> -> vector<16x96xf32>
    %c0_15 = arith.constant 0 : index
    %c0_16 = arith.constant 0 : index
    %c0_17 = arith.constant 0 : index
    %30 = vector.load %arg7[%c0_15, %c0_16, %c0_17] : memref<2x1x96xf32, #tpu.memory_space<vmem>>, vector<1x1x96xf32>
    %31 = vector.shape_cast %30 : vector<1x1x96xf32> to vector<1x96xf32>
    %32 = vector.broadcast %31 : vector<1x96xf32> to vector<16x96xf32>
    %33 = arith.addf %29, %32 : vector<16x96xf32>
    %34 = vector.extract_strided_slice %33 {offsets = [0, 0], sizes = [8, 96], strides = [1, 1]} : vector<16x96xf32> to vector<8x96xf32>
    %35 = vector.extract_strided_slice %25 {offsets = [0, 0], sizes = [1, 8], strides = [1, 1]} : vector<2x8xf32> to vector<1x8xf32>
    %36 = vector.extract_strided_slice %34 {offsets = [0, 0], sizes = [8, 8], strides = [1, 1]} : vector<8x96xf32> to vector<8x8xf32>
    %37 = vector.extract_strided_slice %34 {offsets = [0, 32], sizes = [8, 8], strides = [1, 1]} : vector<8x96xf32> to vector<8x8xf32>
    %38 = vector.extract_strided_slice %34 {offsets = [0, 64], sizes = [8, 8], strides = [1, 1]} : vector<8x96xf32> to vector<8x8xf32>
    %cst_18 = arith.constant dense<0.000000e+00> : vector<8x8xf32>
    %39 = tpu.matmul %36, %37, %cst_18 {dimension_numbers = #tpu.dot_dimension_numbers<[1], [1], [0], [0], [0, 0, 1, 0], [], []>} : vector<8x8xf32>, vector<8x8xf32>, vector<8x8xf32> -> vector<8x8xf32>
    %40 = vector.broadcast %35 : vector<1x8xf32> to vector<8x8xf32>
    %41 = arith.addf %39, %40 : vector<8x8xf32>
    %cst_19 = arith.constant dense<0xFF800000> : vector<8xf32>
    %42 = vector.multi_reduction <maximumf>, %41, %cst_19 [1] : vector<8x8xf32> to vector<8xf32>
    %43 = vector.shape_cast %42 : vector<8xf32> to vector<8x1xf32>
    %44 = vector.broadcast %43 : vector<8x1xf32> to vector<8x8xf32>
    %45 = arith.subf %41, %44 : vector<8x8xf32>
    %46 = math.exp %45 : vector<8x8xf32>
    %cst_20 = arith.constant dense<0.000000e+00> : vector<8xf32>
    %47 = vector.multi_reduction <add>, %46, %cst_20 [1] : vector<8x8xf32> to vector<8xf32>
    %48 = vector.shape_cast %47 : vector<8xf32> to vector<8x1xf32>
    %49 = tpu.reciprocal %48 {approx = true} : vector<8x1xf32> -> vector<8x1xf32>
    %50 = vector.broadcast %49 : vector<8x1xf32> to vector<8x8xf32>
    %51 = arith.mulf %46, %50 : vector<8x8xf32>
    %cst_21 = arith.constant dense<0.000000e+00> : vector<8x8xf32>
    %52 = tpu.matmul %51, %38, %cst_21 {dimension_numbers = #tpu.dot_dimension_numbers<[1], [0], [0], [1], [0, 0, 1, 1], [], []>} : vector<8x8xf32>, vector<8x8xf32>, vector<8x8xf32> -> vector<8x8xf32>
    %53 = vector.extract_strided_slice %34 {offsets = [0, 8], sizes = [8, 8], strides = [1, 1]} : vector<8x96xf32> to vector<8x8xf32>
    %54 = vector.extract_strided_slice %34 {offsets = [0, 40], sizes = [8, 8], strides = [1, 1]} : vector<8x96xf32> to vector<8x8xf32>
    %55 = vector.extract_strided_slice %34 {offsets = [0, 72], sizes = [8, 8], strides = [1, 1]} : vector<8x96xf32> to vector<8x8xf32>
    %cst_22 = arith.constant dense<0.000000e+00> : vector<8x8xf32>
    %56 = tpu.matmul %53, %54, %cst_22 {dimension_numbers = #tpu.dot_dimension_numbers<[1], [1], [0], [0], [0, 0, 1, 0], [], []>} : vector<8x8xf32>, vector<8x8xf32>, vector<8x8xf32> -> vector<8x8xf32>
    %57 = vector.broadcast %35 : vector<1x8xf32> to vector<8x8xf32>
    %58 = arith.addf %56, %57 : vector<8x8xf32>
    %cst_23 = arith.constant dense<0xFF800000> : vector<8xf32>
    %59 = vector.multi_reduction <maximumf>, %58, %cst_23 [1] : vector<8x8xf32> to vector<8xf32>
    %60 = vector.shape_cast %59 : vector<8xf32> to vector<8x1xf32>
    %61 = vector.broadcast %60 : vector<8x1xf32> to vector<8x8xf32>
    %62 = arith.subf %58, %61 : vector<8x8xf32>
    %63 = math.exp %62 : vector<8x8xf32>
    %cst_24 = arith.constant dense<0.000000e+00> : vector<8xf32>
    %64 = vector.multi_reduction <add>, %63, %cst_24 [1] : vector<8x8xf32> to vector<8xf32>
    %65 = vector.shape_cast %64 : vector<8xf32> to vector<8x1xf32>
    %66 = tpu.reciprocal %65 {approx = true} : vector<8x1xf32> -> vector<8x1xf32>
    %67 = vector.broadcast %66 : vector<8x1xf32> to vector<8x8xf32>
    %68 = arith.mulf %63, %67 : vector<8x8xf32>
    %cst_25 = arith.constant dense<0.000000e+00> : vector<8x8xf32>
    %69 = tpu.matmul %68, %55, %cst_25 {dimension_numbers = #tpu.dot_dimension_numbers<[1], [0], [0], [1], [0, 0, 1, 1], [], []>} : vector<8x8xf32>, vector<8x8xf32>, vector<8x8xf32> -> vector<8x8xf32>
    %70 = vector.extract_strided_slice %34 {offsets = [0, 16], sizes = [8, 8], strides = [1, 1]} : vector<8x96xf32> to vector<8x8xf32>
    %71 = vector.extract_strided_slice %34 {offsets = [0, 48], sizes = [8, 8], strides = [1, 1]} : vector<8x96xf32> to vector<8x8xf32>
    %72 = vector.extract_strided_slice %34 {offsets = [0, 80], sizes = [8, 8], strides = [1, 1]} : vector<8x96xf32> to vector<8x8xf32>
    %cst_26 = arith.constant dense<0.000000e+00> : vector<8x8xf32>
    %73 = tpu.matmul %70, %71, %cst_26 {dimension_numbers = #tpu.dot_dimension_numbers<[1], [1], [0], [0], [0, 0, 1, 0], [], []>} : vector<8x8xf32>, vector<8x8xf32>, vector<8x8xf32> -> vector<8x8xf32>
    %74 = vector.broadcast %35 : vector<1x8xf32> to vector<8x8xf32>
    %75 = arith.addf %73, %74 : vector<8x8xf32>
    %cst_27 = arith.constant dense<0xFF800000> : vector<8xf32>
    %76 = vector.multi_reduction <maximumf>, %75, %cst_27 [1] : vector<8x8xf32> to vector<8xf32>
    %77 = vector.shape_cast %76 : vector<8xf32> to vector<8x1xf32>
    %78 = vector.broadcast %77 : vector<8x1xf32> to vector<8x8xf32>
    %79 = arith.subf %75, %78 : vector<8x8xf32>
    %80 = math.exp %79 : vector<8x8xf32>
    %cst_28 = arith.constant dense<0.000000e+00> : vector<8xf32>
    %81 = vector.multi_reduction <add>, %80, %cst_28 [1] : vector<8x8xf32> to vector<8xf32>
    %82 = vector.shape_cast %81 : vector<8xf32> to vector<8x1xf32>
    %83 = tpu.reciprocal %82 {approx = true} : vector<8x1xf32> -> vector<8x1xf32>
    %84 = vector.broadcast %83 : vector<8x1xf32> to vector<8x8xf32>
    %85 = arith.mulf %80, %84 : vector<8x8xf32>
    %cst_29 = arith.constant dense<0.000000e+00> : vector<8x8xf32>
    %86 = tpu.matmul %85, %72, %cst_29 {dimension_numbers = #tpu.dot_dimension_numbers<[1], [0], [0], [1], [0, 0, 1, 1], [], []>} : vector<8x8xf32>, vector<8x8xf32>, vector<8x8xf32> -> vector<8x8xf32>
    %87 = vector.extract_strided_slice %34 {offsets = [0, 24], sizes = [8, 8], strides = [1, 1]} : vector<8x96xf32> to vector<8x8xf32>
    %88 = vector.extract_strided_slice %34 {offsets = [0, 56], sizes = [8, 8], strides = [1, 1]} : vector<8x96xf32> to vector<8x8xf32>
    %89 = vector.extract_strided_slice %34 {offsets = [0, 88], sizes = [8, 8], strides = [1, 1]} : vector<8x96xf32> to vector<8x8xf32>
    %cst_30 = arith.constant dense<0.000000e+00> : vector<8x8xf32>
    %90 = tpu.matmul %87, %88, %cst_30 {dimension_numbers = #tpu.dot_dimension_numbers<[1], [1], [0], [0], [0, 0, 1, 0], [], []>} : vector<8x8xf32>, vector<8x8xf32>, vector<8x8xf32> -> vector<8x8xf32>
    %91 = vector.broadcast %35 : vector<1x8xf32> to vector<8x8xf32>
    %92 = arith.addf %90, %91 : vector<8x8xf32>
    %cst_31 = arith.constant dense<0xFF800000> : vector<8xf32>
    %93 = vector.multi_reduction <maximumf>, %92, %cst_31 [1] : vector<8x8xf32> to vector<8xf32>
    %94 = vector.shape_cast %93 : vector<8xf32> to vector<8x1xf32>
    %95 = vector.broadcast %94 : vector<8x1xf32> to vector<8x8xf32>
    %96 = arith.subf %92, %95 : vector<8x8xf32>
    %97 = math.exp %96 : vector<8x8xf32>
    %cst_32 = arith.constant dense<0.000000e+00> : vector<8xf32>
    %98 = vector.multi_reduction <add>, %97, %cst_32 [1] : vector<8x8xf32> to vector<8xf32>
    %99 = vector.shape_cast %98 : vector<8xf32> to vector<8x1xf32>
    %100 = tpu.reciprocal %99 {approx = true} : vector<8x1xf32> -> vector<8x1xf32>
    %101 = vector.broadcast %100 : vector<8x1xf32> to vector<8x8xf32>
    %102 = arith.mulf %97, %101 : vector<8x8xf32>
    %cst_33 = arith.constant dense<0.000000e+00> : vector<8x8xf32>
    %103 = tpu.matmul %102, %89, %cst_33 {dimension_numbers = #tpu.dot_dimension_numbers<[1], [0], [0], [1], [0, 0, 1, 1], [], []>} : vector<8x8xf32>, vector<8x8xf32>, vector<8x8xf32> -> vector<8x8xf32>
    %104 = tpu.concatenate %52, %69, %86, %103 in 1 : vector<8x8xf32>, vector<8x8xf32>, vector<8x8xf32>, vector<8x8xf32> -> vector<8x32xf32>
    %105 = vector.extract_strided_slice %33 {offsets = [8, 0], sizes = [8, 96], strides = [1, 1]} : vector<16x96xf32> to vector<8x96xf32>
    %106 = vector.extract_strided_slice %25 {offsets = [1, 0], sizes = [1, 8], strides = [1, 1]} : vector<2x8xf32> to vector<1x8xf32>
    %107 = vector.extract_strided_slice %105 {offsets = [0, 0], sizes = [8, 8], strides = [1, 1]} : vector<8x96xf32> to vector<8x8xf32>
    %108 = vector.extract_strided_slice %105 {offsets = [0, 32], sizes = [8, 8], strides = [1, 1]} : vector<8x96xf32> to vector<8x8xf32>
    %109 = vector.extract_strided_slice %105 {offsets = [0, 64], sizes = [8, 8], strides = [1, 1]} : vector<8x96xf32> to vector<8x8xf32>
    %cst_34 = arith.constant dense<0.000000e+00> : vector<8x8xf32>
    %110 = tpu.matmul %107, %108, %cst_34 {dimension_numbers = #tpu.dot_dimension_numbers<[1], [1], [0], [0], [0, 0, 1, 0], [], []>} : vector<8x8xf32>, vector<8x8xf32>, vector<8x8xf32> -> vector<8x8xf32>
    %111 = vector.broadcast %106 : vector<1x8xf32> to vector<8x8xf32>
    %112 = arith.addf %110, %111 : vector<8x8xf32>
    %cst_35 = arith.constant dense<0xFF800000> : vector<8xf32>
    %113 = vector.multi_reduction <maximumf>, %112, %cst_35 [1] : vector<8x8xf32> to vector<8xf32>
    %114 = vector.shape_cast %113 : vector<8xf32> to vector<8x1xf32>
    %115 = vector.broadcast %114 : vector<8x1xf32> to vector<8x8xf32>
    %116 = arith.subf %112, %115 : vector<8x8xf32>
    %117 = math.exp %116 : vector<8x8xf32>
    %cst_36 = arith.constant dense<0.000000e+00> : vector<8xf32>
    %118 = vector.multi_reduction <add>, %117, %cst_36 [1] : vector<8x8xf32> to vector<8xf32>
    %119 = vector.shape_cast %118 : vector<8xf32> to vector<8x1xf32>
    %120 = tpu.reciprocal %119 {approx = true} : vector<8x1xf32> -> vector<8x1xf32>
    %121 = vector.broadcast %120 : vector<8x1xf32> to vector<8x8xf32>
    %122 = arith.mulf %117, %121 : vector<8x8xf32>
    %cst_37 = arith.constant dense<0.000000e+00> : vector<8x8xf32>
    %123 = tpu.matmul %122, %109, %cst_37 {dimension_numbers = #tpu.dot_dimension_numbers<[1], [0], [0], [1], [0, 0, 1, 1], [], []>} : vector<8x8xf32>, vector<8x8xf32>, vector<8x8xf32> -> vector<8x8xf32>
    %124 = vector.extract_strided_slice %105 {offsets = [0, 8], sizes = [8, 8], strides = [1, 1]} : vector<8x96xf32> to vector<8x8xf32>
    %125 = vector.extract_strided_slice %105 {offsets = [0, 40], sizes = [8, 8], strides = [1, 1]} : vector<8x96xf32> to vector<8x8xf32>
    %126 = vector.extract_strided_slice %105 {offsets = [0, 72], sizes = [8, 8], strides = [1, 1]} : vector<8x96xf32> to vector<8x8xf32>
    %cst_38 = arith.constant dense<0.000000e+00> : vector<8x8xf32>
    %127 = tpu.matmul %124, %125, %cst_38 {dimension_numbers = #tpu.dot_dimension_numbers<[1], [1], [0], [0], [0, 0, 1, 0], [], []>} : vector<8x8xf32>, vector<8x8xf32>, vector<8x8xf32> -> vector<8x8xf32>
    %128 = vector.broadcast %106 : vector<1x8xf32> to vector<8x8xf32>
    %129 = arith.addf %127, %128 : vector<8x8xf32>
    %cst_39 = arith.constant dense<0xFF800000> : vector<8xf32>
    %130 = vector.multi_reduction <maximumf>, %129, %cst_39 [1] : vector<8x8xf32> to vector<8xf32>
    %131 = vector.shape_cast %130 : vector<8xf32> to vector<8x1xf32>
    %132 = vector.broadcast %131 : vector<8x1xf32> to vector<8x8xf32>
    %133 = arith.subf %129, %132 : vector<8x8xf32>
    %134 = math.exp %133 : vector<8x8xf32>
    %cst_40 = arith.constant dense<0.000000e+00> : vector<8xf32>
    %135 = vector.multi_reduction <add>, %134, %cst_40 [1] : vector<8x8xf32> to vector<8xf32>
    %136 = vector.shape_cast %135 : vector<8xf32> to vector<8x1xf32>
    %137 = tpu.reciprocal %136 {approx = true} : vector<8x1xf32> -> vector<8x1xf32>
    %138 = vector.broadcast %137 : vector<8x1xf32> to vector<8x8xf32>
    %139 = arith.mulf %134, %138 : vector<8x8xf32>
    %cst_41 = arith.constant dense<0.000000e+00> : vector<8x8xf32>
    %140 = tpu.matmul %139, %126, %cst_41 {dimension_numbers = #tpu.dot_dimension_numbers<[1], [0], [0], [1], [0, 0, 1, 1], [], []>} : vector<8x8xf32>, vector<8x8xf32>, vector<8x8xf32> -> vector<8x8xf32>
    %141 = vector.extract_strided_slice %105 {offsets = [0, 16], sizes = [8, 8], strides = [1, 1]} : vector<8x96xf32> to vector<8x8xf32>
    %142 = vector.extract_strided_slice %105 {offsets = [0, 48], sizes = [8, 8], strides = [1, 1]} : vector<8x96xf32> to vector<8x8xf32>
    %143 = vector.extract_strided_slice %105 {offsets = [0, 80], sizes = [8, 8], strides = [1, 1]} : vector<8x96xf32> to vector<8x8xf32>
    %cst_42 = arith.constant dense<0.000000e+00> : vector<8x8xf32>
    %144 = tpu.matmul %141, %142, %cst_42 {dimension_numbers = #tpu.dot_dimension_numbers<[1], [1], [0], [0], [0, 0, 1, 0], [], []>} : vector<8x8xf32>, vector<8x8xf32>, vector<8x8xf32> -> vector<8x8xf32>
    %145 = vector.broadcast %106 : vector<1x8xf32> to vector<8x8xf32>
    %146 = arith.addf %144, %145 : vector<8x8xf32>
    %cst_43 = arith.constant dense<0xFF800000> : vector<8xf32>
    %147 = vector.multi_reduction <maximumf>, %146, %cst_43 [1] : vector<8x8xf32> to vector<8xf32>
    %148 = vector.shape_cast %147 : vector<8xf32> to vector<8x1xf32>
    %149 = vector.broadcast %148 : vector<8x1xf32> to vector<8x8xf32>
    %150 = arith.subf %146, %149 : vector<8x8xf32>
    %151 = math.exp %150 : vector<8x8xf32>
    %cst_44 = arith.constant dense<0.000000e+00> : vector<8xf32>
    %152 = vector.multi_reduction <add>, %151, %cst_44 [1] : vector<8x8xf32> to vector<8xf32>
    %153 = vector.shape_cast %152 : vector<8xf32> to vector<8x1xf32>
    %154 = tpu.reciprocal %153 {approx = true} : vector<8x1xf32> -> vector<8x1xf32>
    %155 = vector.broadcast %154 : vector<8x1xf32> to vector<8x8xf32>
    %156 = arith.mulf %151, %155 : vector<8x8xf32>
    %cst_45 = arith.constant dense<0.000000e+00> : vector<8x8xf32>
    %157 = tpu.matmul %156, %143, %cst_45 {dimension_numbers = #tpu.dot_dimension_numbers<[1], [0], [0], [1], [0, 0, 1, 1], [], []>} : vector<8x8xf32>, vector<8x8xf32>, vector<8x8xf32> -> vector<8x8xf32>
    %158 = vector.extract_strided_slice %105 {offsets = [0, 24], sizes = [8, 8], strides = [1, 1]} : vector<8x96xf32> to vector<8x8xf32>
    %159 = vector.extract_strided_slice %105 {offsets = [0, 56], sizes = [8, 8], strides = [1, 1]} : vector<8x96xf32> to vector<8x8xf32>
    %160 = vector.extract_strided_slice %105 {offsets = [0, 88], sizes = [8, 8], strides = [1, 1]} : vector<8x96xf32> to vector<8x8xf32>
    %cst_46 = arith.constant dense<0.000000e+00> : vector<8x8xf32>
    %161 = tpu.matmul %158, %159, %cst_46 {dimension_numbers = #tpu.dot_dimension_numbers<[1], [1], [0], [0], [0, 0, 1, 0], [], []>} : vector<8x8xf32>, vector<8x8xf32>, vector<8x8xf32> -> vector<8x8xf32>
    %162 = vector.broadcast %106 : vector<1x8xf32> to vector<8x8xf32>
    %163 = arith.addf %161, %162 : vector<8x8xf32>
    %cst_47 = arith.constant dense<0xFF800000> : vector<8xf32>
    %164 = vector.multi_reduction <maximumf>, %163, %cst_47 [1] : vector<8x8xf32> to vector<8xf32>
    %165 = vector.shape_cast %164 : vector<8xf32> to vector<8x1xf32>
    %166 = vector.broadcast %165 : vector<8x1xf32> to vector<8x8xf32>
    %167 = arith.subf %163, %166 : vector<8x8xf32>
    %168 = math.exp %167 : vector<8x8xf32>
    %cst_48 = arith.constant dense<0.000000e+00> : vector<8xf32>
    %169 = vector.multi_reduction <add>, %168, %cst_48 [1] : vector<8x8xf32> to vector<8xf32>
    %170 = vector.shape_cast %169 : vector<8xf32> to vector<8x1xf32>
    %171 = tpu.reciprocal %170 {approx = true} : vector<8x1xf32> -> vector<8x1xf32>
    %172 = vector.broadcast %171 : vector<8x1xf32> to vector<8x8xf32>
    %173 = arith.mulf %168, %172 : vector<8x8xf32>
    %cst_49 = arith.constant dense<0.000000e+00> : vector<8x8xf32>
    %174 = tpu.matmul %173, %160, %cst_49 {dimension_numbers = #tpu.dot_dimension_numbers<[1], [0], [0], [1], [0, 0, 1, 1], [], []>} : vector<8x8xf32>, vector<8x8xf32>, vector<8x8xf32> -> vector<8x8xf32>
    %175 = tpu.concatenate %123, %140, %157, %174 in 1 : vector<8x8xf32>, vector<8x8xf32>, vector<8x8xf32>, vector<8x8xf32> -> vector<8x32xf32>
    %176 = tpu.concatenate %104, %175 in 0 : vector<8x32xf32>, vector<8x32xf32> -> vector<16x32xf32>
    %c0_50 = arith.constant 0 : index
    %c0_51 = arith.constant 0 : index
    %c0_52 = arith.constant 0 : index
    %177 = vector.load %arg8[%c0_50, %c0_51, %c0_52] : memref<2x32x32xbf16, #tpu.memory_space<vmem>>, vector<1x32x32xbf16>
    %178 = vector.shape_cast %177 : vector<1x32x32xbf16> to vector<32x32xbf16>
    %179 = arith.truncf %176 : vector<16x32xf32> to vector<16x32xbf16>
    %cst_53 = arith.constant dense<0.000000e+00> : vector<16x32xf32>
    %180 = tpu.matmul %179, %178, %cst_53 {dimension_numbers = #tpu.dot_dimension_numbers<[1], [0], [0], [1], [0, 0, 1, 1], [], []>} : vector<16x32xbf16>, vector<32x32xbf16>, vector<16x32xf32> -> vector<16x32xf32>
    %c0_54 = arith.constant 0 : index
    %c0_55 = arith.constant 0 : index
    %c0_56 = arith.constant 0 : index
    %181 = vector.load %arg9[%c0_54, %c0_55, %c0_56] : memref<2x1x32xf32, #tpu.memory_space<vmem>>, vector<1x1x32xf32>
    %182 = vector.shape_cast %181 : vector<1x1x32xf32> to vector<1x32xf32>
    %183 = vector.broadcast %182 : vector<1x32xf32> to vector<16x32xf32>
    %184 = arith.addf %180, %183 : vector<16x32xf32>
    %185 = arith.addf %184, %24 : vector<16x32xf32>
    %c0_57 = arith.constant 0 : index
    %c0_58 = arith.constant 0 : index
    %c0_59 = arith.constant 0 : index
    %186 = vector.load %arg10[%c0_57, %c0_58, %c0_59] : memref<2x1x32xf32, #tpu.memory_space<vmem>>, vector<1x1x32xf32>
    %187 = vector.shape_cast %186 : vector<1x1x32xf32> to vector<1x32xf32>
    %c0_60 = arith.constant 0 : index
    %c0_61 = arith.constant 0 : index
    %c0_62 = arith.constant 0 : index
    %188 = vector.load %arg11[%c0_60, %c0_61, %c0_62] : memref<2x1x32xf32, #tpu.memory_space<vmem>>, vector<1x1x32xf32>
    %189 = vector.shape_cast %188 : vector<1x1x32xf32> to vector<1x32xf32>
    %cst_63 = arith.constant dense<0.000000e+00> : vector<16xf32>
    %190 = vector.multi_reduction <add>, %185, %cst_63 [1] : vector<16x32xf32> to vector<16xf32>
    %191 = vector.shape_cast %190 : vector<16xf32> to vector<16x1xf32>
    %cst_64 = arith.constant 3.200000e+01 : f32
    %192 = vector.broadcast %cst_64 : f32 to vector<16x1xf32>
    %193 = arith.divf %191, %192 : vector<16x1xf32>
    %194 = vector.broadcast %193 : vector<16x1xf32> to vector<16x32xf32>
    %195 = arith.subf %185, %194 : vector<16x32xf32>
    %196 = arith.mulf %195, %195 : vector<16x32xf32>
    %cst_65 = arith.constant dense<0.000000e+00> : vector<16xf32>
    %197 = vector.multi_reduction <add>, %196, %cst_65 [1] : vector<16x32xf32> to vector<16xf32>
    %198 = vector.shape_cast %197 : vector<16xf32> to vector<16x1xf32>
    %cst_66 = arith.constant 3.200000e+01 : f32
    %199 = vector.broadcast %cst_66 : f32 to vector<16x1xf32>
    %200 = arith.divf %198, %199 : vector<16x1xf32>
    %201 = vector.broadcast %193 : vector<16x1xf32> to vector<16x32xf32>
    %202 = arith.subf %185, %201 : vector<16x32xf32>
    %cst_67 = arith.constant 9.99999996E-13 : f32
    %203 = vector.broadcast %cst_67 : f32 to vector<16x1xf32>
    %204 = arith.addf %200, %203 : vector<16x1xf32>
    %205 = math.rsqrt %204 : vector<16x1xf32>
    %206 = vector.broadcast %205 : vector<16x1xf32> to vector<16x32xf32>
    %207 = arith.mulf %202, %206 : vector<16x32xf32>
    %208 = vector.broadcast %187 : vector<1x32xf32> to vector<16x32xf32>
    %209 = arith.mulf %207, %208 : vector<16x32xf32>
    %210 = vector.broadcast %189 : vector<1x32xf32> to vector<16x32xf32>
    %211 = arith.addf %209, %210 : vector<16x32xf32>
    %c0_68 = arith.constant 0 : index
    %c0_69 = arith.constant 0 : index
    %c0_70 = arith.constant 0 : index
    %212 = vector.load %arg12[%c0_68, %c0_69, %c0_70] : memref<2x32x64xbf16, #tpu.memory_space<vmem>>, vector<1x32x64xbf16>
    %213 = vector.shape_cast %212 : vector<1x32x64xbf16> to vector<32x64xbf16>
    %214 = arith.truncf %211 : vector<16x32xf32> to vector<16x32xbf16>
    %cst_71 = arith.constant dense<0.000000e+00> : vector<16x64xf32>
    %215 = tpu.matmul %214, %213, %cst_71 {dimension_numbers = #tpu.dot_dimension_numbers<[1], [0], [0], [1], [0, 0, 1, 1], [], []>} : vector<16x32xbf16>, vector<32x64xbf16>, vector<16x64xf32> -> vector<16x64xf32>
    %c0_72 = arith.constant 0 : index
    %c0_73 = arith.constant 0 : index
    %c0_74 = arith.constant 0 : index
    %216 = vector.load %arg13[%c0_72, %c0_73, %c0_74] : memref<2x1x64xf32, #tpu.memory_space<vmem>>, vector<1x1x64xf32>
    %217 = vector.shape_cast %216 : vector<1x1x64xf32> to vector<1x64xf32>
    %218 = vector.broadcast %217 : vector<1x64xf32> to vector<16x64xf32>
    %219 = arith.addf %215, %218 : vector<16x64xf32>
    %cst_75 = arith.constant 5.000000e-01 : f32
    %220 = vector.broadcast %cst_75 : f32 to vector<16x64xf32>
    %221 = arith.mulf %220, %219 : vector<16x64xf32>
    %cst_76 = arith.constant 4.471500e-02 : f32
    %222 = vector.broadcast %cst_76 : f32 to vector<16x64xf32>
    %223 = arith.mulf %222, %219 : vector<16x64xf32>
    %224 = arith.mulf %223, %219 : vector<16x64xf32>
    %225 = arith.mulf %224, %219 : vector<16x64xf32>
    %226 = arith.addf %219, %225 : vector<16x64xf32>
    %cst_77 = arith.constant 0.797884583 : f32
    %227 = vector.broadcast %cst_77 : f32 to vector<16x64xf32>
    %228 = arith.mulf %227, %226 : vector<16x64xf32>
    %229 = math.tanh %228 : vector<16x64xf32>
    %cst_78 = arith.constant 1.000000e+00 : f32
    %230 = vector.broadcast %cst_78 : f32 to vector<16x64xf32>
    %231 = arith.addf %230, %229 : vector<16x64xf32>
    %232 = arith.mulf %221, %231 : vector<16x64xf32>
    %c0_79 = arith.constant 0 : index
    %c0_80 = arith.constant 0 : index
    %c0_81 = arith.constant 0 : index
    %233 = vector.load %arg14[%c0_79, %c0_80, %c0_81] : memref<2x64x32xbf16, #tpu.memory_space<vmem>>, vector<1x64x32xbf16>
    %234 = vector.shape_cast %233 : vector<1x64x32xbf16> to vector<64x32xbf16>
    %235 = arith.truncf %232 : vector<16x64xf32> to vector<16x64xbf16>
    %cst_82 = arith.constant dense<0.000000e+00> : vector<16x32xf32>
    %236 = tpu.matmul %235, %234, %cst_82 {dimension_numbers = #tpu.dot_dimension_numbers<[1], [0], [0], [1], [0, 0, 1, 1], [], []>} : vector<16x64xbf16>, vector<64x32xbf16>, vector<16x32xf32> -> vector<16x32xf32>
    %c0_83 = arith.constant 0 : index
    %c0_84 = arith.constant 0 : index
    %c0_85 = arith.constant 0 : index
    %237 = vector.load %arg15[%c0_83, %c0_84, %c0_85] : memref<2x1x32xf32, #tpu.memory_space<vmem>>, vector<1x1x32xf32>
    %238 = vector.shape_cast %237 : vector<1x1x32xf32> to vector<1x32xf32>
    %239 = vector.broadcast %238 : vector<1x32xf32> to vector<16x32xf32>
    %240 = arith.addf %236, %239 : vector<16x32xf32>
    %241 = arith.addf %240, %211 : vector<16x32xf32>
    %c0_86 = arith.constant 0 : index
    %c0_87 = arith.constant 0 : index
    %c0_88 = arith.constant 0 : index
    %242 = vector.load %arg16[%c0_86, %c0_87, %c0_88] : memref<2x1x32xf32, #tpu.memory_space<vmem>>, vector<1x1x32xf32>
    %243 = vector.shape_cast %242 : vector<1x1x32xf32> to vector<1x32xf32>
    %c0_89 = arith.constant 0 : index
    %c0_90 = arith.constant 0 : index
    %c0_91 = arith.constant 0 : index
    %244 = vector.load %arg17[%c0_89, %c0_90, %c0_91] : memref<2x1x32xf32, #tpu.memory_space<vmem>>, vector<1x1x32xf32>
    %245 = vector.shape_cast %244 : vector<1x1x32xf32> to vector<1x32xf32>
    %cst_92 = arith.constant dense<0.000000e+00> : vector<16xf32>
    %246 = vector.multi_reduction <add>, %241, %cst_92 [1] : vector<16x32xf32> to vector<16xf32>
    %247 = vector.shape_cast %246 : vector<16xf32> to vector<16x1xf32>
    %cst_93 = arith.constant 3.200000e+01 : f32
    %248 = vector.broadcast %cst_93 : f32 to vector<16x1xf32>
    %249 = arith.divf %247, %248 : vector<16x1xf32>
    %250 = vector.broadcast %249 : vector<16x1xf32> to vector<16x32xf32>
    %251 = arith.subf %241, %250 : vector<16x32xf32>
    %252 = arith.mulf %251, %251 : vector<16x32xf32>
    %cst_94 = arith.constant dense<0.000000e+00> : vector<16xf32>
    %253 = vector.multi_reduction <add>, %252, %cst_94 [1] : vector<16x32xf32> to vector<16xf32>
    %254 = vector.shape_cast %253 : vector<16xf32> to vector<16x1xf32>
    %cst_95 = arith.constant 3.200000e+01 : f32
    %255 = vector.broadcast %cst_95 : f32 to vector<16x1xf32>
    %256 = arith.divf %254, %255 : vector<16x1xf32>
    %257 = vector.broadcast %249 : vector<16x1xf32> to vector<16x32xf32>
    %258 = arith.subf %241, %257 : vector<16x32xf32>
    %cst_96 = arith.constant 9.99999996E-13 : f32
    %259 = vector.broadcast %cst_96 : f32 to vector<16x1xf32>
    %260 = arith.addf %256, %259 : vector<16x1xf32>
    %261 = math.rsqrt %260 : vector<16x1xf32>
    %262 = vector.broadcast %261 : vector<16x1xf32> to vector<16x32xf32>
    %263 = arith.mulf %258, %262 : vector<16x32xf32>
    %264 = vector.broadcast %243 : vector<1x32xf32> to vector<16x32xf32>
    %265 = arith.mulf %263, %264 : vector<16x32xf32>
    %266 = vector.broadcast %245 : vector<1x32xf32> to vector<16x32xf32>
    %267 = arith.addf %265, %266 : vector<16x32xf32>
    %c1 = arith.constant 1 : index
    %c0_97 = arith.constant 0 : index
    %c0_98 = arith.constant 0 : index
    %268 = vector.load %arg6[%c1, %c0_97, %c0_98] : memref<2x32x96xbf16, #tpu.memory_space<vmem>>, vector<1x32x96xbf16>
    %269 = vector.shape_cast %268 : vector<1x32x96xbf16> to vector<32x96xbf16>
    %270 = arith.truncf %267 : vector<16x32xf32> to vector<16x32xbf16>
    %cst_99 = arith.constant dense<0.000000e+00> : vector<16x96xf32>
    %271 = tpu.matmul %270, %269, %cst_99 {dimension_numbers = #tpu.dot_dimension_numbers<[1], [0], [0], [1], [0, 0, 1, 1], [], []>} : vector<16x32xbf16>, vector<32x96xbf16>, vector<16x96xf32> -> vector<16x96xf32>
    %c1_100 = arith.constant 1 : index
    %c0_101 = arith.constant 0 : index
    %c0_102 = arith.constant 0 : index
    %272 = vector.load %arg7[%c1_100, %c0_101, %c0_102] : memref<2x1x96xf32, #tpu.memory_space<vmem>>, vector<1x1x96xf32>
    %273 = vector.shape_cast %272 : vector<1x1x96xf32> to vector<1x96xf32>
    %274 = vector.broadcast %273 : vector<1x96xf32> to vector<16x96xf32>
    %275 = arith.addf %271, %274 : vector<16x96xf32>
    %276 = vector.extract_strided_slice %275 {offsets = [0, 0], sizes = [8, 96], strides = [1, 1]} : vector<16x96xf32> to vector<8x96xf32>
    %277 = vector.extract_strided_slice %25 {offsets = [0, 0], sizes = [1, 8], strides = [1, 1]} : vector<2x8xf32> to vector<1x8xf32>
    %278 = vector.extract_strided_slice %276 {offsets = [0, 0], sizes = [8, 8], strides = [1, 1]} : vector<8x96xf32> to vector<8x8xf32>
    %279 = vector.extract_strided_slice %276 {offsets = [0, 32], sizes = [8, 8], strides = [1, 1]} : vector<8x96xf32> to vector<8x8xf32>
    %280 = vector.extract_strided_slice %276 {offsets = [0, 64], sizes = [8, 8], strides = [1, 1]} : vector<8x96xf32> to vector<8x8xf32>
    %cst_103 = arith.constant dense<0.000000e+00> : vector<8x8xf32>
    %281 = tpu.matmul %278, %279, %cst_103 {dimension_numbers = #tpu.dot_dimension_numbers<[1], [1], [0], [0], [0, 0, 1, 0], [], []>} : vector<8x8xf32>, vector<8x8xf32>, vector<8x8xf32> -> vector<8x8xf32>
    %282 = vector.broadcast %277 : vector<1x8xf32> to vector<8x8xf32>
    %283 = arith.addf %281, %282 : vector<8x8xf32>
    %cst_104 = arith.constant dense<0xFF800000> : vector<8xf32>
    %284 = vector.multi_reduction <maximumf>, %283, %cst_104 [1] : vector<8x8xf32> to vector<8xf32>
    %285 = vector.shape_cast %284 : vector<8xf32> to vector<8x1xf32>
    %286 = vector.broadcast %285 : vector<8x1xf32> to vector<8x8xf32>
    %287 = arith.subf %283, %286 : vector<8x8xf32>
    %288 = math.exp %287 : vector<8x8xf32>
    %cst_105 = arith.constant dense<0.000000e+00> : vector<8xf32>
    %289 = vector.multi_reduction <add>, %288, %cst_105 [1] : vector<8x8xf32> to vector<8xf32>
    %290 = vector.shape_cast %289 : vector<8xf32> to vector<8x1xf32>
    %291 = tpu.reciprocal %290 {approx = true} : vector<8x1xf32> -> vector<8x1xf32>
    %292 = vector.broadcast %291 : vector<8x1xf32> to vector<8x8xf32>
    %293 = arith.mulf %288, %292 : vector<8x8xf32>
    %cst_106 = arith.constant dense<0.000000e+00> : vector<8x8xf32>
    %294 = tpu.matmul %293, %280, %cst_106 {dimension_numbers = #tpu.dot_dimension_numbers<[1], [0], [0], [1], [0, 0, 1, 1], [], []>} : vector<8x8xf32>, vector<8x8xf32>, vector<8x8xf32> -> vector<8x8xf32>
    %295 = vector.extract_strided_slice %276 {offsets = [0, 8], sizes = [8, 8], strides = [1, 1]} : vector<8x96xf32> to vector<8x8xf32>
    %296 = vector.extract_strided_slice %276 {offsets = [0, 40], sizes = [8, 8], strides = [1, 1]} : vector<8x96xf32> to vector<8x8xf32>
    %297 = vector.extract_strided_slice %276 {offsets = [0, 72], sizes = [8, 8], strides = [1, 1]} : vector<8x96xf32> to vector<8x8xf32>
    %cst_107 = arith.constant dense<0.000000e+00> : vector<8x8xf32>
    %298 = tpu.matmul %295, %296, %cst_107 {dimension_numbers = #tpu.dot_dimension_numbers<[1], [1], [0], [0], [0, 0, 1, 0], [], []>} : vector<8x8xf32>, vector<8x8xf32>, vector<8x8xf32> -> vector<8x8xf32>
    %299 = vector.broadcast %277 : vector<1x8xf32> to vector<8x8xf32>
    %300 = arith.addf %298, %299 : vector<8x8xf32>
    %cst_108 = arith.constant dense<0xFF800000> : vector<8xf32>
    %301 = vector.multi_reduction <maximumf>, %300, %cst_108 [1] : vector<8x8xf32> to vector<8xf32>
    %302 = vector.shape_cast %301 : vector<8xf32> to vector<8x1xf32>
    %303 = vector.broadcast %302 : vector<8x1xf32> to vector<8x8xf32>
    %304 = arith.subf %300, %303 : vector<8x8xf32>
    %305 = math.exp %304 : vector<8x8xf32>
    %cst_109 = arith.constant dense<0.000000e+00> : vector<8xf32>
    %306 = vector.multi_reduction <add>, %305, %cst_109 [1] : vector<8x8xf32> to vector<8xf32>
    %307 = vector.shape_cast %306 : vector<8xf32> to vector<8x1xf32>
    %308 = tpu.reciprocal %307 {approx = true} : vector<8x1xf32> -> vector<8x1xf32>
    %309 = vector.broadcast %308 : vector<8x1xf32> to vector<8x8xf32>
    %310 = arith.mulf %305, %309 : vector<8x8xf32>
    %cst_110 = arith.constant dense<0.000000e+00> : vector<8x8xf32>
    %311 = tpu.matmul %310, %297, %cst_110 {dimension_numbers = #tpu.dot_dimension_numbers<[1], [0], [0], [1], [0, 0, 1, 1], [], []>} : vector<8x8xf32>, vector<8x8xf32>, vector<8x8xf32> -> vector<8x8xf32>
    %312 = vector.extract_strided_slice %276 {offsets = [0, 16], sizes = [8, 8], strides = [1, 1]} : vector<8x96xf32> to vector<8x8xf32>
    %313 = vector.extract_strided_slice %276 {offsets = [0, 48], sizes = [8, 8], strides = [1, 1]} : vector<8x96xf32> to vector<8x8xf32>
    %314 = vector.extract_strided_slice %276 {offsets = [0, 80], sizes = [8, 8], strides = [1, 1]} : vector<8x96xf32> to vector<8x8xf32>
    %cst_111 = arith.constant dense<0.000000e+00> : vector<8x8xf32>
    %315 = tpu.matmul %312, %313, %cst_111 {dimension_numbers = #tpu.dot_dimension_numbers<[1], [1], [0], [0], [0, 0, 1, 0], [], []>} : vector<8x8xf32>, vector<8x8xf32>, vector<8x8xf32> -> vector<8x8xf32>
    %316 = vector.broadcast %277 : vector<1x8xf32> to vector<8x8xf32>
    %317 = arith.addf %315, %316 : vector<8x8xf32>
    %cst_112 = arith.constant dense<0xFF800000> : vector<8xf32>
    %318 = vector.multi_reduction <maximumf>, %317, %cst_112 [1] : vector<8x8xf32> to vector<8xf32>
    %319 = vector.shape_cast %318 : vector<8xf32> to vector<8x1xf32>
    %320 = vector.broadcast %319 : vector<8x1xf32> to vector<8x8xf32>
    %321 = arith.subf %317, %320 : vector<8x8xf32>
    %322 = math.exp %321 : vector<8x8xf32>
    %cst_113 = arith.constant dense<0.000000e+00> : vector<8xf32>
    %323 = vector.multi_reduction <add>, %322, %cst_113 [1] : vector<8x8xf32> to vector<8xf32>
    %324 = vector.shape_cast %323 : vector<8xf32> to vector<8x1xf32>
    %325 = tpu.reciprocal %324 {approx = true} : vector<8x1xf32> -> vector<8x1xf32>
    %326 = vector.broadcast %325 : vector<8x1xf32> to vector<8x8xf32>
    %327 = arith.mulf %322, %326 : vector<8x8xf32>
    %cst_114 = arith.constant dense<0.000000e+00> : vector<8x8xf32>
    %328 = tpu.matmul %327, %314, %cst_114 {dimension_numbers = #tpu.dot_dimension_numbers<[1], [0], [0], [1], [0, 0, 1, 1], [], []>} : vector<8x8xf32>, vector<8x8xf32>, vector<8x8xf32> -> vector<8x8xf32>
    %329 = vector.extract_strided_slice %276 {offsets = [0, 24], sizes = [8, 8], strides = [1, 1]} : vector<8x96xf32> to vector<8x8xf32>
    %330 = vector.extract_strided_slice %276 {offsets = [0, 56], sizes = [8, 8], strides = [1, 1]} : vector<8x96xf32> to vector<8x8xf32>
    %331 = vector.extract_strided_slice %276 {offsets = [0, 88], sizes = [8, 8], strides = [1, 1]} : vector<8x96xf32> to vector<8x8xf32>
    %cst_115 = arith.constant dense<0.000000e+00> : vector<8x8xf32>
    %332 = tpu.matmul %329, %330, %cst_115 {dimension_numbers = #tpu.dot_dimension_numbers<[1], [1], [0], [0], [0, 0, 1, 0], [], []>} : vector<8x8xf32>, vector<8x8xf32>, vector<8x8xf32> -> vector<8x8xf32>
    %333 = vector.broadcast %277 : vector<1x8xf32> to vector<8x8xf32>
    %334 = arith.addf %332, %333 : vector<8x8xf32>
    %cst_116 = arith.constant dense<0xFF800000> : vector<8xf32>
    %335 = vector.multi_reduction <maximumf>, %334, %cst_116 [1] : vector<8x8xf32> to vector<8xf32>
    %336 = vector.shape_cast %335 : vector<8xf32> to vector<8x1xf32>
    %337 = vector.broadcast %336 : vector<8x1xf32> to vector<8x8xf32>
    %338 = arith.subf %334, %337 : vector<8x8xf32>
    %339 = math.exp %338 : vector<8x8xf32>
    %cst_117 = arith.constant dense<0.000000e+00> : vector<8xf32>
    %340 = vector.multi_reduction <add>, %339, %cst_117 [1] : vector<8x8xf32> to vector<8xf32>
    %341 = vector.shape_cast %340 : vector<8xf32> to vector<8x1xf32>
    %342 = tpu.reciprocal %341 {approx = true} : vector<8x1xf32> -> vector<8x1xf32>
    %343 = vector.broadcast %342 : vector<8x1xf32> to vector<8x8xf32>
    %344 = arith.mulf %339, %343 : vector<8x8xf32>
    %cst_118 = arith.constant dense<0.000000e+00> : vector<8x8xf32>
    %345 = tpu.matmul %344, %331, %cst_118 {dimension_numbers = #tpu.dot_dimension_numbers<[1], [0], [0], [1], [0, 0, 1, 1], [], []>} : vector<8x8xf32>, vector<8x8xf32>, vector<8x8xf32> -> vector<8x8xf32>
    %346 = tpu.concatenate %294, %311, %328, %345 in 1 : vector<8x8xf32>, vector<8x8xf32>, vector<8x8xf32>, vector<8x8xf32> -> vector<8x32xf32>
    %347 = vector.extract_strided_slice %275 {offsets = [8, 0], sizes = [8, 96], strides = [1, 1]} : vector<16x96xf32> to vector<8x96xf32>
    %348 = vector.extract_strided_slice %25 {offsets = [1, 0], sizes = [1, 8], strides = [1, 1]} : vector<2x8xf32> to vector<1x8xf32>
    %349 = vector.extract_strided_slice %347 {offsets = [0, 0], sizes = [8, 8], strides = [1, 1]} : vector<8x96xf32> to vector<8x8xf32>
    %350 = vector.extract_strided_slice %347 {offsets = [0, 32], sizes = [8, 8], strides = [1, 1]} : vector<8x96xf32> to vector<8x8xf32>
    %351 = vector.extract_strided_slice %347 {offsets = [0, 64], sizes = [8, 8], strides = [1, 1]} : vector<8x96xf32> to vector<8x8xf32>
    %cst_119 = arith.constant dense<0.000000e+00> : vector<8x8xf32>
    %352 = tpu.matmul %349, %350, %cst_119 {dimension_numbers = #tpu.dot_dimension_numbers<[1], [1], [0], [0], [0, 0, 1, 0], [], []>} : vector<8x8xf32>, vector<8x8xf32>, vector<8x8xf32> -> vector<8x8xf32>
    %353 = vector.broadcast %348 : vector<1x8xf32> to vector<8x8xf32>
    %354 = arith.addf %352, %353 : vector<8x8xf32>
    %cst_120 = arith.constant dense<0xFF800000> : vector<8xf32>
    %355 = vector.multi_reduction <maximumf>, %354, %cst_120 [1] : vector<8x8xf32> to vector<8xf32>
    %356 = vector.shape_cast %355 : vector<8xf32> to vector<8x1xf32>
    %357 = vector.broadcast %356 : vector<8x1xf32> to vector<8x8xf32>
    %358 = arith.subf %354, %357 : vector<8x8xf32>
    %359 = math.exp %358 : vector<8x8xf32>
    %cst_121 = arith.constant dense<0.000000e+00> : vector<8xf32>
    %360 = vector.multi_reduction <add>, %359, %cst_121 [1] : vector<8x8xf32> to vector<8xf32>
    %361 = vector.shape_cast %360 : vector<8xf32> to vector<8x1xf32>
    %362 = tpu.reciprocal %361 {approx = true} : vector<8x1xf32> -> vector<8x1xf32>
    %363 = vector.broadcast %362 : vector<8x1xf32> to vector<8x8xf32>
    %364 = arith.mulf %359, %363 : vector<8x8xf32>
    %cst_122 = arith.constant dense<0.000000e+00> : vector<8x8xf32>
    %365 = tpu.matmul %364, %351, %cst_122 {dimension_numbers = #tpu.dot_dimension_numbers<[1], [0], [0], [1], [0, 0, 1, 1], [], []>} : vector<8x8xf32>, vector<8x8xf32>, vector<8x8xf32> -> vector<8x8xf32>
    %366 = vector.extract_strided_slice %347 {offsets = [0, 8], sizes = [8, 8], strides = [1, 1]} : vector<8x96xf32> to vector<8x8xf32>
    %367 = vector.extract_strided_slice %347 {offsets = [0, 40], sizes = [8, 8], strides = [1, 1]} : vector<8x96xf32> to vector<8x8xf32>
    %368 = vector.extract_strided_slice %347 {offsets = [0, 72], sizes = [8, 8], strides = [1, 1]} : vector<8x96xf32> to vector<8x8xf32>
    %cst_123 = arith.constant dense<0.000000e+00> : vector<8x8xf32>
    %369 = tpu.matmul %366, %367, %cst_123 {dimension_numbers = #tpu.dot_dimension_numbers<[1], [1], [0], [0], [0, 0, 1, 0], [], []>} : vector<8x8xf32>, vector<8x8xf32>, vector<8x8xf32> -> vector<8x8xf32>
    %370 = vector.broadcast %348 : vector<1x8xf32> to vector<8x8xf32>
    %371 = arith.addf %369, %370 : vector<8x8xf32>
    %cst_124 = arith.constant dense<0xFF800000> : vector<8xf32>
    %372 = vector.multi_reduction <maximumf>, %371, %cst_124 [1] : vector<8x8xf32> to vector<8xf32>
    %373 = vector.shape_cast %372 : vector<8xf32> to vector<8x1xf32>
    %374 = vector.broadcast %373 : vector<8x1xf32> to vector<8x8xf32>
    %375 = arith.subf %371, %374 : vector<8x8xf32>
    %376 = math.exp %375 : vector<8x8xf32>
    %cst_125 = arith.constant dense<0.000000e+00> : vector<8xf32>
    %377 = vector.multi_reduction <add>, %376, %cst_125 [1] : vector<8x8xf32> to vector<8xf32>
    %378 = vector.shape_cast %377 : vector<8xf32> to vector<8x1xf32>
    %379 = tpu.reciprocal %378 {approx = true} : vector<8x1xf32> -> vector<8x1xf32>
    %380 = vector.broadcast %379 : vector<8x1xf32> to vector<8x8xf32>
    %381 = arith.mulf %376, %380 : vector<8x8xf32>
    %cst_126 = arith.constant dense<0.000000e+00> : vector<8x8xf32>
    %382 = tpu.matmul %381, %368, %cst_126 {dimension_numbers = #tpu.dot_dimension_numbers<[1], [0], [0], [1], [0, 0, 1, 1], [], []>} : vector<8x8xf32>, vector<8x8xf32>, vector<8x8xf32> -> vector<8x8xf32>
    %383 = vector.extract_strided_slice %347 {offsets = [0, 16], sizes = [8, 8], strides = [1, 1]} : vector<8x96xf32> to vector<8x8xf32>
    %384 = vector.extract_strided_slice %347 {offsets = [0, 48], sizes = [8, 8], strides = [1, 1]} : vector<8x96xf32> to vector<8x8xf32>
    %385 = vector.extract_strided_slice %347 {offsets = [0, 80], sizes = [8, 8], strides = [1, 1]} : vector<8x96xf32> to vector<8x8xf32>
    %cst_127 = arith.constant dense<0.000000e+00> : vector<8x8xf32>
    %386 = tpu.matmul %383, %384, %cst_127 {dimension_numbers = #tpu.dot_dimension_numbers<[1], [1], [0], [0], [0, 0, 1, 0], [], []>} : vector<8x8xf32>, vector<8x8xf32>, vector<8x8xf32> -> vector<8x8xf32>
    %387 = vector.broadcast %348 : vector<1x8xf32> to vector<8x8xf32>
    %388 = arith.addf %386, %387 : vector<8x8xf32>
    %cst_128 = arith.constant dense<0xFF800000> : vector<8xf32>
    %389 = vector.multi_reduction <maximumf>, %388, %cst_128 [1] : vector<8x8xf32> to vector<8xf32>
    %390 = vector.shape_cast %389 : vector<8xf32> to vector<8x1xf32>
    %391 = vector.broadcast %390 : vector<8x1xf32> to vector<8x8xf32>
    %392 = arith.subf %388, %391 : vector<8x8xf32>
    %393 = math.exp %392 : vector<8x8xf32>
    %cst_129 = arith.constant dense<0.000000e+00> : vector<8xf32>
    %394 = vector.multi_reduction <add>, %393, %cst_129 [1] : vector<8x8xf32> to vector<8xf32>
    %395 = vector.shape_cast %394 : vector<8xf32> to vector<8x1xf32>
    %396 = tpu.reciprocal %395 {approx = true} : vector<8x1xf32> -> vector<8x1xf32>
    %397 = vector.broadcast %396 : vector<8x1xf32> to vector<8x8xf32>
    %398 = arith.mulf %393, %397 : vector<8x8xf32>
    %cst_130 = arith.constant dense<0.000000e+00> : vector<8x8xf32>
    %399 = tpu.matmul %398, %385, %cst_130 {dimension_numbers = #tpu.dot_dimension_numbers<[1], [0], [0], [1], [0, 0, 1, 1], [], []>} : vector<8x8xf32>, vector<8x8xf32>, vector<8x8xf32> -> vector<8x8xf32>
    %400 = vector.extract_strided_slice %347 {offsets = [0, 24], sizes = [8, 8], strides = [1, 1]} : vector<8x96xf32> to vector<8x8xf32>
    %401 = vector.extract_strided_slice %347 {offsets = [0, 56], sizes = [8, 8], strides = [1, 1]} : vector<8x96xf32> to vector<8x8xf32>
    %402 = vector.extract_strided_slice %347 {offsets = [0, 88], sizes = [8, 8], strides = [1, 1]} : vector<8x96xf32> to vector<8x8xf32>
    %cst_131 = arith.constant dense<0.000000e+00> : vector<8x8xf32>
    %403 = tpu.matmul %400, %401, %cst_131 {dimension_numbers = #tpu.dot_dimension_numbers<[1], [1], [0], [0], [0, 0, 1, 0], [], []>} : vector<8x8xf32>, vector<8x8xf32>, vector<8x8xf32> -> vector<8x8xf32>
    %404 = vector.broadcast %348 : vector<1x8xf32> to vector<8x8xf32>
    %405 = arith.addf %403, %404 : vector<8x8xf32>
    %cst_132 = arith.constant dense<0xFF800000> : vector<8xf32>
    %406 = vector.multi_reduction <maximumf>, %405, %cst_132 [1] : vector<8x8xf32> to vector<8xf32>
    %407 = vector.shape_cast %406 : vector<8xf32> to vector<8x1xf32>
    %408 = vector.broadcast %407 : vector<8x1xf32> to vector<8x8xf32>
    %409 = arith.subf %405, %408 : vector<8x8xf32>
    %410 = math.exp %409 : vector<8x8xf32>
    %cst_133 = arith.constant dense<0.000000e+00> : vector<8xf32>
    %411 = vector.multi_reduction <add>, %410, %cst_133 [1] : vector<8x8xf32> to vector<8xf32>
    %412 = vector.shape_cast %411 : vector<8xf32> to vector<8x1xf32>
    %413 = tpu.reciprocal %412 {approx = true} : vector<8x1xf32> -> vector<8x1xf32>
    %414 = vector.broadcast %413 : vector<8x1xf32> to vector<8x8xf32>
    %415 = arith.mulf %410, %414 : vector<8x8xf32>
    %cst_134 = arith.constant dense<0.000000e+00> : vector<8x8xf32>
    %416 = tpu.matmul %415, %402, %cst_134 {dimension_numbers = #tpu.dot_dimension_numbers<[1], [0], [0], [1], [0, 0, 1, 1], [], []>} : vector<8x8xf32>, vector<8x8xf32>, vector<8x8xf32> -> vector<8x8xf32>
    %417 = tpu.concatenate %365, %382, %399, %416 in 1 : vector<8x8xf32>, vector<8x8xf32>, vector<8x8xf32>, vector<8x8xf32> -> vector<8x32xf32>
    %418 = tpu.concatenate %346, %417 in 0 : vector<8x32xf32>, vector<8x32xf32> -> vector<16x32xf32>
    %c1_135 = arith.constant 1 : index
    %c0_136 = arith.constant 0 : index
    %c0_137 = arith.constant 0 : index
    %419 = vector.load %arg8[%c1_135, %c0_136, %c0_137] : memref<2x32x32xbf16, #tpu.memory_space<vmem>>, vector<1x32x32xbf16>
    %420 = vector.shape_cast %419 : vector<1x32x32xbf16> to vector<32x32xbf16>
    %421 = arith.truncf %418 : vector<16x32xf32> to vector<16x32xbf16>
    %cst_138 = arith.constant dense<0.000000e+00> : vector<16x32xf32>
    %422 = tpu.matmul %421, %420, %cst_138 {dimension_numbers = #tpu.dot_dimension_numbers<[1], [0], [0], [1], [0, 0, 1, 1], [], []>} : vector<16x32xbf16>, vector<32x32xbf16>, vector<16x32xf32> -> vector<16x32xf32>
    %c1_139 = arith.constant 1 : index
    %c0_140 = arith.constant 0 : index
    %c0_141 = arith.constant 0 : index
    %423 = vector.load %arg9[%c1_139, %c0_140, %c0_141] : memref<2x1x32xf32, #tpu.memory_space<vmem>>, vector<1x1x32xf32>
    %424 = vector.shape_cast %423 : vector<1x1x32xf32> to vector<1x32xf32>
    %425 = vector.broadcast %424 : vector<1x32xf32> to vector<16x32xf32>
    %426 = arith.addf %422, %425 : vector<16x32xf32>
    %427 = arith.addf %426, %267 : vector<16x32xf32>
    %c1_142 = arith.constant 1 : index
    %c0_143 = arith.constant 0 : index
    %c0_144 = arith.constant 0 : index
    %428 = vector.load %arg10[%c1_142, %c0_143, %c0_144] : memref<2x1x32xf32, #tpu.memory_space<vmem>>, vector<1x1x32xf32>
    %429 = vector.shape_cast %428 : vector<1x1x32xf32> to vector<1x32xf32>
    %c1_145 = arith.constant 1 : index
    %c0_146 = arith.constant 0 : index
    %c0_147 = arith.constant 0 : index
    %430 = vector.load %arg11[%c1_145, %c0_146, %c0_147] : memref<2x1x32xf32, #tpu.memory_space<vmem>>, vector<1x1x32xf32>
    %431 = vector.shape_cast %430 : vector<1x1x32xf32> to vector<1x32xf32>
    %cst_148 = arith.constant dense<0.000000e+00> : vector<16xf32>
    %432 = vector.multi_reduction <add>, %427, %cst_148 [1] : vector<16x32xf32> to vector<16xf32>
    %433 = vector.shape_cast %432 : vector<16xf32> to vector<16x1xf32>
    %cst_149 = arith.constant 3.200000e+01 : f32
    %434 = vector.broadcast %cst_149 : f32 to vector<16x1xf32>
    %435 = arith.divf %433, %434 : vector<16x1xf32>
    %436 = vector.broadcast %435 : vector<16x1xf32> to vector<16x32xf32>
    %437 = arith.subf %427, %436 : vector<16x32xf32>
    %438 = arith.mulf %437, %437 : vector<16x32xf32>
    %cst_150 = arith.constant dense<0.000000e+00> : vector<16xf32>
    %439 = vector.multi_reduction <add>, %438, %cst_150 [1] : vector<16x32xf32> to vector<16xf32>
    %440 = vector.shape_cast %439 : vector<16xf32> to vector<16x1xf32>
    %cst_151 = arith.constant 3.200000e+01 : f32
    %441 = vector.broadcast %cst_151 : f32 to vector<16x1xf32>
    %442 = arith.divf %440, %441 : vector<16x1xf32>
    %443 = vector.broadcast %435 : vector<16x1xf32> to vector<16x32xf32>
    %444 = arith.subf %427, %443 : vector<16x32xf32>
    %cst_152 = arith.constant 9.99999996E-13 : f32
    %445 = vector.broadcast %cst_152 : f32 to vector<16x1xf32>
    %446 = arith.addf %442, %445 : vector<16x1xf32>
    %447 = math.rsqrt %446 : vector<16x1xf32>
    %448 = vector.broadcast %447 : vector<16x1xf32> to vector<16x32xf32>
    %449 = arith.mulf %444, %448 : vector<16x32xf32>
    %450 = vector.broadcast %429 : vector<1x32xf32> to vector<16x32xf32>
    %451 = arith.mulf %449, %450 : vector<16x32xf32>
    %452 = vector.broadcast %431 : vector<1x32xf32> to vector<16x32xf32>
    %453 = arith.addf %451, %452 : vector<16x32xf32>
    %c1_153 = arith.constant 1 : index
    %c0_154 = arith.constant 0 : index
    %c0_155 = arith.constant 0 : index
    %454 = vector.load %arg12[%c1_153, %c0_154, %c0_155] : memref<2x32x64xbf16, #tpu.memory_space<vmem>>, vector<1x32x64xbf16>
    %455 = vector.shape_cast %454 : vector<1x32x64xbf16> to vector<32x64xbf16>
    %456 = arith.truncf %453 : vector<16x32xf32> to vector<16x32xbf16>
    %cst_156 = arith.constant dense<0.000000e+00> : vector<16x64xf32>
    %457 = tpu.matmul %456, %455, %cst_156 {dimension_numbers = #tpu.dot_dimension_numbers<[1], [0], [0], [1], [0, 0, 1, 1], [], []>} : vector<16x32xbf16>, vector<32x64xbf16>, vector<16x64xf32> -> vector<16x64xf32>
    %c1_157 = arith.constant 1 : index
    %c0_158 = arith.constant 0 : index
    %c0_159 = arith.constant 0 : index
    %458 = vector.load %arg13[%c1_157, %c0_158, %c0_159] : memref<2x1x64xf32, #tpu.memory_space<vmem>>, vector<1x1x64xf32>
    %459 = vector.shape_cast %458 : vector<1x1x64xf32> to vector<1x64xf32>
    %460 = vector.broadcast %459 : vector<1x64xf32> to vector<16x64xf32>
    %461 = arith.addf %457, %460 : vector<16x64xf32>
    %cst_160 = arith.constant 5.000000e-01 : f32
    %462 = vector.broadcast %cst_160 : f32 to vector<16x64xf32>
    %463 = arith.mulf %462, %461 : vector<16x64xf32>
    %cst_161 = arith.constant 4.471500e-02 : f32
    %464 = vector.broadcast %cst_161 : f32 to vector<16x64xf32>
    %465 = arith.mulf %464, %461 : vector<16x64xf32>
    %466 = arith.mulf %465, %461 : vector<16x64xf32>
    %467 = arith.mulf %466, %461 : vector<16x64xf32>
    %468 = arith.addf %461, %467 : vector<16x64xf32>
    %cst_162 = arith.constant 0.797884583 : f32
    %469 = vector.broadcast %cst_162 : f32 to vector<16x64xf32>
    %470 = arith.mulf %469, %468 : vector<16x64xf32>
    %471 = math.tanh %470 : vector<16x64xf32>
    %cst_163 = arith.constant 1.000000e+00 : f32
    %472 = vector.broadcast %cst_163 : f32 to vector<16x64xf32>
    %473 = arith.addf %472, %471 : vector<16x64xf32>
    %474 = arith.mulf %463, %473 : vector<16x64xf32>
    %c1_164 = arith.constant 1 : index
    %c0_165 = arith.constant 0 : index
    %c0_166 = arith.constant 0 : index
    %475 = vector.load %arg14[%c1_164, %c0_165, %c0_166] : memref<2x64x32xbf16, #tpu.memory_space<vmem>>, vector<1x64x32xbf16>
    %476 = vector.shape_cast %475 : vector<1x64x32xbf16> to vector<64x32xbf16>
    %477 = arith.truncf %474 : vector<16x64xf32> to vector<16x64xbf16>
    %cst_167 = arith.constant dense<0.000000e+00> : vector<16x32xf32>
    %478 = tpu.matmul %477, %476, %cst_167 {dimension_numbers = #tpu.dot_dimension_numbers<[1], [0], [0], [1], [0, 0, 1, 1], [], []>} : vector<16x64xbf16>, vector<64x32xbf16>, vector<16x32xf32> -> vector<16x32xf32>
    %c1_168 = arith.constant 1 : index
    %c0_169 = arith.constant 0 : index
    %c0_170 = arith.constant 0 : index
    %479 = vector.load %arg15[%c1_168, %c0_169, %c0_170] : memref<2x1x32xf32, #tpu.memory_space<vmem>>, vector<1x1x32xf32>
    %480 = vector.shape_cast %479 : vector<1x1x32xf32> to vector<1x32xf32>
    %481 = vector.broadcast %480 : vector<1x32xf32> to vector<16x32xf32>
    %482 = arith.addf %478, %481 : vector<16x32xf32>
    %483 = arith.addf %482, %453 : vector<16x32xf32>
    %c1_171 = arith.constant 1 : index
    %c0_172 = arith.constant 0 : index
    %c0_173 = arith.constant 0 : index
    %484 = vector.load %arg16[%c1_171, %c0_172, %c0_173] : memref<2x1x32xf32, #tpu.memory_space<vmem>>, vector<1x1x32xf32>
    %485 = vector.shape_cast %484 : vector<1x1x32xf32> to vector<1x32xf32>
    %c1_174 = arith.constant 1 : index
    %c0_175 = arith.constant 0 : index
    %c0_176 = arith.constant 0 : index
    %486 = vector.load %arg17[%c1_174, %c0_175, %c0_176] : memref<2x1x32xf32, #tpu.memory_space<vmem>>, vector<1x1x32xf32>
    %487 = vector.shape_cast %486 : vector<1x1x32xf32> to vector<1x32xf32>
    %cst_177 = arith.constant dense<0.000000e+00> : vector<16xf32>
    %488 = vector.multi_reduction <add>, %483, %cst_177 [1] : vector<16x32xf32> to vector<16xf32>
    %489 = vector.shape_cast %488 : vector<16xf32> to vector<16x1xf32>
    %cst_178 = arith.constant 3.200000e+01 : f32
    %490 = vector.broadcast %cst_178 : f32 to vector<16x1xf32>
    %491 = arith.divf %489, %490 : vector<16x1xf32>
    %492 = vector.broadcast %491 : vector<16x1xf32> to vector<16x32xf32>
    %493 = arith.subf %483, %492 : vector<16x32xf32>
    %494 = arith.mulf %493, %493 : vector<16x32xf32>
    %cst_179 = arith.constant dense<0.000000e+00> : vector<16xf32>
    %495 = vector.multi_reduction <add>, %494, %cst_179 [1] : vector<16x32xf32> to vector<16xf32>
    %496 = vector.shape_cast %495 : vector<16xf32> to vector<16x1xf32>
    %cst_180 = arith.constant 3.200000e+01 : f32
    %497 = vector.broadcast %cst_180 : f32 to vector<16x1xf32>
    %498 = arith.divf %496, %497 : vector<16x1xf32>
    %499 = vector.broadcast %491 : vector<16x1xf32> to vector<16x32xf32>
    %500 = arith.subf %483, %499 : vector<16x32xf32>
    %cst_181 = arith.constant 9.99999996E-13 : f32
    %501 = vector.broadcast %cst_181 : f32 to vector<16x1xf32>
    %502 = arith.addf %498, %501 : vector<16x1xf32>
    %503 = math.rsqrt %502 : vector<16x1xf32>
    %504 = vector.broadcast %503 : vector<16x1xf32> to vector<16x32xf32>
    %505 = arith.mulf %500, %504 : vector<16x32xf32>
    %506 = vector.broadcast %485 : vector<1x32xf32> to vector<16x32xf32>
    %507 = arith.mulf %505, %506 : vector<16x32xf32>
    %508 = vector.broadcast %487 : vector<1x32xf32> to vector<16x32xf32>
    %509 = arith.addf %507, %508 : vector<16x32xf32>
    %c0_182 = arith.constant 0 : index
    %c0_183 = arith.constant 0 : index
    %510 = vector.load %arg3[%c0_182, %c0_183] : memref<2x16xf32, #tpu.memory_space<vmem>>, vector<2x16xf32>
    %cst_184 = arith.constant dense<0.000000e+00> : vector<2x32xf32>
    %511 = tpu.matmul %510, %509, %cst_184 {dimension_numbers = #tpu.dot_dimension_numbers<[1], [0], [0], [1], [0, 0, 1, 1], [], []>} : vector<2x16xf32>, vector<16x32xf32>, vector<2x32xf32> -> vector<2x32xf32>
    %c0_185 = arith.constant 0 : index
    %c0_186 = arith.constant 0 : index
    %512 = vector.load %arg18[%c0_185, %c0_186] : memref<32x32xbf16, #tpu.memory_space<vmem>>, vector<32x32xbf16>
    %513 = arith.truncf %511 : vector<2x32xf32> to vector<2x32xbf16>
    %cst_187 = arith.constant dense<0.000000e+00> : vector<2x32xf32>
    %514 = tpu.matmul %513, %512, %cst_187 {dimension_numbers = #tpu.dot_dimension_numbers<[1], [0], [0], [1], [0, 0, 1, 1], [], []>} : vector<2x32xbf16>, vector<32x32xbf16>, vector<2x32xf32> -> vector<2x32xf32>
    %c0_188 = arith.constant 0 : index
    %c0_189 = arith.constant 0 : index
    %515 = vector.load %arg19[%c0_188, %c0_189] : memref<1x32xf32, #tpu.memory_space<vmem>>, vector<1x32xf32>
    %516 = vector.broadcast %515 : vector<1x32xf32> to vector<2x32xf32>
    %517 = arith.addf %514, %516 : vector<2x32xf32>
    %518 = math.tanh %517 : vector<2x32xf32>
    %c0_190 = arith.constant 0 : index
    %c0_191 = arith.constant 0 : index
    %519 = vector.load %arg2[%c0_190, %c0_191] : memref<2x1152xf32, #tpu.memory_space<vmem>>, vector<2x1152xf32>
    %c0_192 = arith.constant 0 : index
    %c0_193 = arith.constant 0 : index
    %520 = vector.load %arg20[%c0_192, %c0_193] : memref<1152x256xbf16, #tpu.memory_space<vmem>>, vector<1152x256xbf16>
    %521 = arith.truncf %519 : vector<2x1152xf32> to vector<2x1152xbf16>
    %cst_194 = arith.constant dense<0.000000e+00> : vector<2x256xf32>
    %522 = tpu.matmul %521, %520, %cst_194 {dimension_numbers = #tpu.dot_dimension_numbers<[1], [0], [0], [1], [0, 0, 1, 1], [], []>} : vector<2x1152xbf16>, vector<1152x256xbf16>, vector<2x256xf32> -> vector<2x256xf32>
    %c0_195 = arith.constant 0 : index
    %c0_196 = arith.constant 0 : index
    %523 = vector.load %arg21[%c0_195, %c0_196] : memref<1x256xf32, #tpu.memory_space<vmem>>, vector<1x256xf32>
    %524 = vector.broadcast %523 : vector<1x256xf32> to vector<2x256xf32>
    %525 = arith.addf %522, %524 : vector<2x256xf32>
    %526 = math.tanh %525 : vector<2x256xf32>
    %c0_197 = arith.constant 0 : index
    %c0_198 = arith.constant 0 : index
    %527 = vector.load %arg22[%c0_197, %c0_198] : memref<32x128xbf16, #tpu.memory_space<vmem>>, vector<32x128xbf16>
    %528 = arith.truncf %518 : vector<2x32xf32> to vector<2x32xbf16>
    %cst_199 = arith.constant dense<0.000000e+00> : vector<2x128xf32>
    %529 = tpu.matmul %528, %527, %cst_199 {dimension_numbers = #tpu.dot_dimension_numbers<[1], [0], [0], [1], [0, 0, 1, 1], [], []>} : vector<2x32xbf16>, vector<32x128xbf16>, vector<2x128xf32> -> vector<2x128xf32>
    %c0_200 = arith.constant 0 : index
    %c0_201 = arith.constant 0 : index
    %530 = vector.load %arg23[%c0_200, %c0_201] : memref<256x128xbf16, #tpu.memory_space<vmem>>, vector<256x128xbf16>
    %531 = arith.truncf %526 : vector<2x256xf32> to vector<2x256xbf16>
    %cst_202 = arith.constant dense<0.000000e+00> : vector<2x128xf32>
    %532 = tpu.matmul %531, %530, %cst_202 {dimension_numbers = #tpu.dot_dimension_numbers<[1], [0], [0], [1], [0, 0, 1, 1], [], []>} : vector<2x256xbf16>, vector<256x128xbf16>, vector<2x128xf32> -> vector<2x128xf32>
    %533 = arith.addf %529, %532 : vector<2x128xf32>
    %c0_203 = arith.constant 0 : index
    %c0_204 = arith.constant 0 : index
    %534 = vector.load %arg24[%c0_203, %c0_204] : memref<1x128xf32, #tpu.memory_space<vmem>>, vector<1x128xf32>
    %535 = vector.broadcast %534 : vector<1x128xf32> to vector<2x128xf32>
    %536 = arith.addf %533, %535 : vector<2x128xf32>
    %c0_205 = arith.constant 0 : index
    %c0_206 = arith.constant 0 : index
    %537 = vector.load %arg25[%c0_205, %c0_206] : memref<2x128xf32, #tpu.memory_space<vmem>>, vector<2x128xf32>
    tpu.vector_store %arg25[%c0_205, %c0_206], %536 {strides = array<i32>} : memref<2x128xf32, #tpu.memory_space<vmem>>, vector<2x128xf32>,
    return
  }
}

</mosaic_0001>

<bundles_post_ra>
// kernel: emotion_classifier_forward.1
= control target key start
LH: loop header
LB: loop body
LE: loop exit
PB: predicated region body
PF: predicated region fallthrough
CT: control target
= control target key end

     0   :  { %vm85_vm0 = vcmask 261120   ;;  %v4442_v4 = vmov 32.0   ;;  %s6085_s26 = smov 80   ;;  %s6094_s27 = smov 120   ;;  %vm190_vm8 = vcmask 64512   ;;  %vm460_vm9 = vcmask 130048   ;;  %s6044_s0 = inlined_call_operand.vmem [shape: f32[16,32], index: 0, kind: input, shape index: {}]   ;;  %s6045_s4 = inlined_call_operand.vmem [shape: f32[1,32], index: 4, kind: input, shape index: {}]   ;;  %s6046_s5 = inlined_call_operand.vmem [shape: f32[1,32], index: 5, kind: input, shape index: {}]   ;;  %s6047_s7 = inlined_call_operand.vmem [shape: f32[2,1,96], index: 7, kind: input, shape index: {}]   ;;  %s6048_s6 = inlined_call_operand.vmem [shape: bf16[2,32,96], index: 6, kind: input, shape index: {}]   ;;  %s6049_s1 = inlined_call_operand.vmem [shape: f32[2,8], index: 1, kind: input, shape index: {}]   ;;  %s6050_s9 = inlined_call_operand.vmem [shape: f32[2,1,32], index: 9, kind: input, shape index: {}]   ;;  %s6051_s8 = inlined_call_operand.vmem [shape: bf16[2,32,32], index: 8, kind: input, shape index: {}]   ;;  %s6052_s10 = inlined_call_operand.vmem [shape: f32[2,1,32], index: 10, kind: input, shape index: {}]   ;;  %s6053_s11 = inlined_call_operand.vmem [shape: f32[2,1,32], index: 11, kind: input, shape index: {}]   ;;  %s6054_s13 = inlined_call_operand.vmem [shape: f32[2,1,64], index: 13, kind: input, shape index: {}]   ;;  %s6055_s12 = inlined_call_operand.vmem [shape: bf16[2,32,64], index: 12, kind: input, shape index: {}]   ;;  %s6056_s15 = inlined_call_operand.vmem [shape: f32[2,1,32], index: 15, kind: input, shape index: {}]   ;;  %s6057_s14 = inlined_call_operand.vmem [shape: bf16[2,64,32], index: 14, kind: input, shape index: {}]   ;;  %s6058_s16 = inlined_call_operand.vmem [shape: f32[2,1,32], index: 16, kind: input, shape index: {}]   ;;  %s6059_s17 = inlined_call_operand.vmem [shape: f32[2,1,32], index: 17, kind: input, shape index: {}]   ;;  %s6060_s20 = inlined_call_operand.vmem [shape: bf16[1152,256], index: 20, kind: input, shape index: {}]   ;;  %s6061_s3 = inlined_call_operand.vmem [shape: f32[2,16], index: 3, kind: input, shape index: {}]   ;;  %s6062_s18 = inlined_call_operand.vmem [shape: bf16[32,32], index: 18, kind: input, shape index: {}]   ;;  %s6063_s2 = inlined_call_operand.vmem [shape: f32[2,1152], index: 2, kind: input, shape index: {}]   ;;  %s6064_s19 = inlined_call_operand.vmem [shape: f32[1,32], index: 19, kind: input, shape index: {}]   ;;  %s6065_s22 = inlined_call_operand.vmem [shape: bf16[32,128], index: 22, kind: input, shape index: {}]   ;;  %s6066_s23 = inlined_call_operand.vmem [shape: bf16[256,128], index: 23, kind: input, shape index: {}]   ;;  %s6067_s21 = inlined_call_operand.vmem [shape: f32[1,256], index: 21, kind: input, shape index: {}]   ;;  %s6068_s24 = inlined_call_operand.vmem [shape: f32[1,128], index: 24, kind: input, shape index: {}]   ;;  %s6069_s25 = inlined_call_operand.vmem [shape: f32[2,128], index: 25, kind: output, shape index: {}]  }
   0x1   :  { %6102 = sst [smem:[#allocation2_spill]] %s6044_s0  ;;  %4342 = vrcp.f32 %v4442_v4  ;;  %s6077_s0 = smov 48   ;;  %vm462_vm10 = vcmask 195584  }
   0x2   :  { %6103 = sst [smem:[#allocation3_spill]] %s6045_s4  ;;  %s6091_s28 = smov 8  }
   0x3   :  { %6104 = sst [smem:[#allocation4_spill]] %s6046_s5  ;;  %s6083_s5 = smov 104  }
   0x4   :  { %6105 = sst [smem:[#allocation5_spill]] %s6047_s7  ;;  %s6098_s7 = smov 96  }
   0x5   :  { %6106 = sst [smem:[#allocation6_spill]] %s6048_s6  ;;  %s6079_s6 = smov 40  }
   0x6   :  { %6107 = sst [smem:[#allocation7_spill]] %s6049_s1  ;;  %s6100_s1 = smov 64  }
   0x7   :  { %6108 = sst [smem:[#allocation8_spill]] %s6050_s9  ;;  %v4343_v5 = vpop.eup %4342 }
   0x8   :  { %6109 = sst [smem:[#allocation9_spill]] %s6051_s8  ;;  %v93_v6 = vmul.f32 32.0, %v4343_v5  ;;  %vm97_vm1 = vweird.f32 %v4343_v5  ;;  %s6096_s8 = smov 112  }
   0x9   :  { %6110 = sst [smem:[#allocation10_spill]] %s6052_s10  ;;  %s6092_s10 = smov 88  }
   0xa   :  { %6111 = sst [smem:[#allocation11_spill]] %s6053_s11  ;;  %v94_v7 = vsub.f32 1.0, %v93_v6 }
   0xb   :  { %6112 = sst [smem:[#allocation12_spill]] %s6069_s25  ;;  %s6134_s25 = smov 8  }
   0xc   :  { %s6113_s9 = sld [smem:[#allocation2_spill]]  ;;  %v95_v8 = vmul.f32 %v4343_v5, %v94_v7 }
   0xd   :  { %s6114_s4 = sld [smem:[#allocation6_spill]] }
   0xe   :  { %v96_v9 = vadd.f32 %v4343_v5, %v95_v8  ;;  %s6115_s11 = sld [smem:[#allocation3_spill]] }
   0xf   :  { %s6116_s29 = sld [smem:[#allocation4_spill]] }
  0x10   :  { %v4595_v10 = vsel %vm97_vm1, %v4343_v5, %v96_v9  ;;  %s6117_s30 = sld [smem:[#allocation5_spill]] }
  0x12   :  { %v81_v0 = vld [vmem:[%s6113_s9] sm:$0xff]  ;;  %v82_v2 = vld [vmem:[%s6113_s9 + $0x8] sm:$0xff]  ;;  %s6087_s9 = smov 72  }
  0x13   :  { %v86_v1 = vsel %vm85_vm0, %v81_v0, 0.0  ;;  %v89_v3 = vsel %vm85_vm0, %v82_v2, 0.0  ;;  %v4094_v21 = vld [vmem:[%s6114_s4 + $0x8] sm:$0xff]  ;;  %v4093_v23 = vld [vmem:[%s6114_s4] sm:$0xff] }
  0x14   :  { %87 = vadd.xlane.f32.xlu0 %v86_v1  ;;  %178 = vmatpush.bf16.msra.mxu0 %v4094_v21  ;;  %v4322_v42 = vld [vmem:[%s6115_s11] ss:$0 sm:$0xff]  ;;  %s6118_s11 = sld [smem:[#allocation7_spill]] }
  0x15   :  { %v4323_v47 = vld [vmem:[%s6116_s29] ss:$0 sm:$0xff]  ;;  %s6081_s29 = smov 56  }
  0x16   :  { %v4324_v52 = vld [vmem:[%s6117_s30] ss:$0 sm:$0xff] }
  0x18   :  { %179 = vmatpush.bf16.msra.mxu0 %v4093_v23 }
  0x1a   :  { %v4651_v62 = vld [vmem:[%s6118_s11] sm:$0x3]  ;;  %s6090_s11 = smov 16  }
  0x1b   :  { %v4654_v63 = vperm.slane %v4651_v62, 0 }
  0x1c   :  { %90 = vadd.xlane.f32.xlu0 %v89_v3 }
  0x87   :  { %v88_v11 = vpop.xlane.xlu0 %87 }
  0x88   :  { %v99_v12 = vmul.f32 %v4595_v10, %v88_v11 }
  0x8a   :  { %v101_v13 = vsub.f32 %v81_v0, %v99_v12 }
  0x8c   :  { %v103_v14 = vmul.f32 %v101_v13, %v101_v13 }
  0x8e   :  { %v105_v15 = vsel %vm85_vm0, %v103_v14, 0.0 }
  0x8f   :  { %106 = vadd.xlane.f32.xlu1 %v105_v15  ;;  %v91_v16 = vpop.xlane.xlu0 %90 }
  0x90   :  { %v100_v17 = vmul.f32 %v4595_v10, %v91_v16 }
  0x92   :  { %v102_v18 = vsub.f32 %v82_v2, %v100_v17 }
  0x94   :  { %v104_v19 = vmul.f32 %v102_v18, %v102_v18 }
  0x96   :  { %v108_v20 = vsel %vm85_vm0, %v104_v19, 0.0 }
  0x97   :  { %109 = vadd.xlane.f32.xlu1 %v108_v20 }
 0x102   :  { %v107_v22 = vpop.xlane.xlu1 %106 }
 0x103   :  { %v111_v24 = vmul.f32 %v107_v22, %v4595_v10 }
 0x105   :  { %v113_v25 = vadd.f32 1e-12, %v111_v24 }
 0x107   :  { %4344 = vrsqrt.f32 %v113_v25  ;;  %vm121_vm3 = vweird.f32 %v113_v25 }
 0x10a   :  { %v110_v26 = vpop.xlane.xlu1 %109 }
 0x10b   :  { %v112_v27 = vmul.f32 %v110_v26, %v4595_v10 }
 0x10d   :  { %v4345_v28 = vpop.eup %4344  ;;  %v114_v29 = vadd.f32 1e-12, %v112_v27 }
 0x10e   :  { %v116_v30 = vmul.f32 %v4345_v28, %v113_v25  ;;  %vm122_vm2 = vweird.f32 %v4345_v28 }
 0x10f   :  { %4346 = vrsqrt.f32 %v114_v29  ;;  %vm123_vm4 = vmor %vm121_vm3, %vm122_vm2  ;;  %vm131_vm6 = vweird.f32 %v114_v29  ;;  %vm928_vm2 = vcmask 523264  }
 0x110   :  { %v117_v31 = vmul.f32 %v4345_v28, %v116_v30 }
 0x112   :  { %v118_v32 = vmul.f32 0.5, %v117_v31 }
 0x114   :  { %v119_v33 = vsub.f32 1.5, %v118_v32 }
 0x115   :  { %v4347_v34 = vpop.eup %4346 }
 0x116   :  { %v120_v35 = vmul.f32 %v4345_v28, %v119_v33  ;;  %v126_v36 = vmul.f32 %v4347_v34, %v114_v29  ;;  %vm132_vm5 = vweird.f32 %v4347_v34 }
 0x117   :  { %vm133_vm7 = vmor %vm131_vm6, %vm132_vm5 }
 0x118   :  { %v127_v37 = vmul.f32 %v4347_v34, %v126_v36  ;;  %v124_v38 = vsel %vm123_vm4, %v4345_v28, %v120_v35 }
 0x119   :  { %v135_v41 = vmul.f32 %v124_v38, %v101_v13 }
 0x11a   :  { %v128_v39 = vmul.f32 0.5, %v127_v37 }
 0x11b   :  { %v140_v46 = vmul.f32 %v4322_v42, %v135_v41 }
 0x11c   :  { %v129_v40 = vsub.f32 1.5, %v128_v39  ;;  %v4690_v39 = vperm.slane %v4651_v62, 1 }
 0x11d   :  { %v4615_v49 = vadd.f32 %v4323_v47, %v140_v46 }
 0x11e   :  { %v130_v43 = vmul.f32 %v4347_v34, %v129_v40 }
 0x120   :  { %v134_v44 = vsel %vm133_vm7, %v4347_v34, %v130_v43 }
 0x121   :  { %v136_v45 = vmul.f32 %v134_v44, %v102_v18 }
 0x123   :  { %v141_v48 = vmul.f32 %v4322_v42, %v136_v45 }
 0x125   :  { %v4617_v50 = vadd.f32 %v4323_v47, %v141_v48 }
 0x127   :  { %v152_v51 = vpack.c.bf16 %v4617_v50, %v4615_v49 }
 0x129   :  { %3278 = vmatmul.msk.bf16.vlgmr.msra.gmra.mxu0 %vm85_vm0, %v152_v51 }
 0x1a6   :  { %v181_v53 = vpop.f32.mrf.mxu0 }
 0x1a7   :  { %v4625_v54 = vadd.f32 %v4324_v52, %v181_v53 }
 0x1a9   :  { %317 = vrot.lane.b32.xlu0 %v4625_v54, %s6096_s8  ;;  %188 = vrot.lane.b32.xlu2 %v4625_v54, %s6098_s7 }
 0x1ae   :  { %v183_v55 = vpop.f32.mrf.mxu0 }
 0x1af   :  { %v4637_v56 = vadd.f32 %v4324_v52, %v183_v55 }
 0x1b1   :  { %319 = vrot.lane.b32.xlu2 %v4625_v54, %s6085_s26 }
 0x1b9   :  { %254 = vrot.lane.b32.xlu2 %v4625_v54, %s6092_s10 }
 0x1c1   :  { %252 = vrot.lane.b32.xlu2 %v4625_v54, %s6094_s27 }
 0x1c9   :  { %466 = vrot.lane.b32.xlu2 %v4637_v56, %s6098_s7  ;;  %s6124_s7 = smov 96  }
 0x203   :  { %v189_v57 = vpop.permute.xlu2 %188 }
 0x204   :  { %3279 = vmatpush.xpose.msk.msra.mxu1 %vm190_vm8, %v189_v57 }
 0x207   :  { %3280 = vmatmul.msk.f32.vlgmr.msra.gmra.mxu1 %vm190_vm8, %v4625_v54 }
 0x20b   :  { %v320_v58 = vpop.permute.xlu2 %319 }
 0x20c   :  { %3285 = vmatpush.xpose.msk.msrb.mxu1 %vm190_vm8, %v320_v58 }
 0x213   :  { %v255_v59 = vpop.permute.xlu2 %254 }
 0x214   :  { %3282 = vmatpush.xpose.msk.msra.mxu3 %vm190_vm8, %v255_v59 }
 0x21b   :  { %v318_v60 = vpop.permute.xlu0 %317  ;;  %v253_v61 = vpop.permute.xlu2 %252 }
 0x21c   :  { %3283 = vmatmul.msk.f32.vlgmr.msra.gmra.mxu3 %vm190_vm8, %v253_v61  ;;  %3286 = vmatmul.msk.f32.vlgmr.msrb.gmra.mxu1 %vm190_vm8, %v318_v60 }
 0x223   :  { %v467_v15 = vpop.permute.xlu2 %466 }
 0x284   :  { %v212_v0 = vpop.f32.mrf.mxu1 }
 0x285   :  { %v213_v1 = vadd.f32 %v212_v0, %v4654_v63 }
 0x287   :  { %v215_v2 = vsel %vm190_vm8, %v213_v1, -inf }
 0x288   :  { %216 = vmax.xlane.f32.xlu0 %v215_v2 }
 0x299   :  { %v342_v3 = vpop.f32.mrf.mxu1 }
 0x29a   :  { %v343_v4 = vadd.f32 %v342_v3, %v4654_v63 }
 0x29c   :  { %v345_v5 = vsel %vm190_vm8, %v343_v4, -inf }
 0x29d   :  { %346 = vmax.xlane.f32.xlu1 %v345_v5 }
 0x29f   :  { %v277_v6 = vpop.f32.mrf.mxu3 }
 0x2a0   :  { %v278_v7 = vadd.f32 %v277_v6, %v4654_v63 }
 0x2a2   :  { %v280_v8 = vsel %vm190_vm8, %v278_v7, -inf }
 0x2a3   :  { %281 = vmax.xlane.f32.xlu2 %v280_v8 }
 0x2fb   :  { %v217_v9 = vpop.xlane.xlu0 %216 }
 0x2fc   :  { %v218_v11 = vsub.f32 %v213_v1, %v217_v9 }
 0x2fe   :  { %v219_v12 = vmul.f32 1.442695, %v218_v11 }
 0x300   :  { %4348 = vpow2.f32 %v219_v12 }
 0x306   :  { %v4349_v13 = vpop.eup %4348 }
 0x307   :  { %v221_v14 = vsel %vm190_vm8, %v4349_v13, 0.0 }
 0x308   :  { %222 = vadd.xlane.f32.xlu0 %v221_v14 }
 0x310   :  { %v347_v16 = vpop.xlane.xlu1 %346 }
 0x311   :  { %v348_v17 = vsub.f32 %v343_v4, %v347_v16 }
 0x313   :  { %v349_v18 = vmul.f32 1.442695, %v348_v17 }
 0x315   :  { %4350 = vpow2.f32 %v349_v18 }
 0x316   :  { %v282_v19 = vpop.xlane.xlu2 %281 }
 0x317   :  { %v283_v20 = vsub.f32 %v278_v7, %v282_v19 }
 0x319   :  { %v284_v21 = vmul.f32 1.442695, %v283_v20 }
 0x31b   :  { %v4351_v22 = vpop.eup %4350  ;;  %4352 = vpow2.f32 %v284_v21 }
 0x31c   :  { %226 = vrot.lane.b32.xlu0 %v4625_v54, %s6100_s1  ;;  %v351_v23 = vsel %vm190_vm8, %v4351_v22, 0.0 }
 0x31d   :  { %352 = vadd.xlane.f32.xlu1 %v351_v23 }
 0x321   :  { %v4353_v24 = vpop.eup %4352 }
 0x322   :  { %v286_v25 = vsel %vm190_vm8, %v4353_v24, 0.0 }
 0x323   :  { %287 = vadd.xlane.f32.xlu2 %v286_v25 }
 0x336   :  { %356 = vrot.lane.b32.xlu1 %v4625_v54, %s6077_s0 }
 0x33b   :  { %291 = vrot.lane.b32.xlu2 %v4625_v54, %s6081_s29 }
 0x343   :  { %382 = vrot.lane.b32.xlu2 %v4625_v54, %s6083_s5 }
 0x34b   :  { %503 = vrot.lane.b32.xlu2 %v4637_v56, %s6100_s1  ;;  %s6127_s1 = smov 88  }
 0x353   :  { %529 = vrot.lane.b32.xlu2 %v4637_v56, %s6094_s27  ;;  %s6126_s27 = smov 120  }
 0x35b   :  { %661 = vrot.lane.b32.xlu2 %v4637_v56, %s6087_s9 }
 0x363   :  { %659 = vrot.lane.b32.xlu2 %v4637_v56, %s6083_s5  ;;  %s6119_s5 = sld [smem:[#allocation9_spill]] }
 0x37b   :  { %v223_v26 = vpop.xlane.xlu0 %222 }
 0x37c   :  { %4354 = vrcp.f32 %v223_v26 }
 0x382   :  { %v4355_v27 = vpop.eup %4354 }
 0x383   :  { %v225_v29 = vmul.f32 %v4355_v27, %v4349_v13 }
 0x38e   :  { %v227_v28 = vpop.permute.xlu0 %226 }
 0x38f   :  { %247 = vmatpush.msra.mxu2 %v227_v28 }
 0x390   :  { %3281 = vmatmul.msk.f32.vlgmr.msra.gmra.mxu2 %vm190_vm8, %v225_v29  ;;  %v353_v31 = vpop.xlane.xlu1 %352 }
 0x396   :  { %v288_v30 = vpop.xlane.xlu2 %287 }
 0x397   :  { %4356 = vrcp.f32 %v288_v30 }
 0x398   :  { %4358 = vrcp.f32 %v353_v31 }
 0x39d   :  { %v4357_v32 = vpop.eup %4356 }
 0x39e   :  { %v292_v33 = vpop.permute.xlu2 %291  ;;  %v290_v34 = vmul.f32 %v4357_v32, %v4353_v24  ;;  %v4359_v35 = vpop.eup %4358 }
 0x39f   :  { %312 = vmatpush.msrb.mxu2 %v292_v33  ;;  %v355_v37 = vmul.f32 %v4359_v35, %v4351_v22 }
 0x3a0   :  { %3284 = vmatmul.msk.f32.vlgmr.msrb.gmra.mxu2 %vm190_vm8, %v290_v34 }
 0x3a6   :  { %v383_v48 = vpop.permute.xlu2 %382 }
 0x3a8   :  { %v357_v36 = vpop.permute.xlu1 %356 }
 0x3a9   :  { %377 = vmatpush.msrb.mxu3 %v357_v36 }
 0x3aa   :  { %3287 = vmatmul.msk.f32.vlgmr.msrb.gmra.mxu3 %vm190_vm8, %v355_v37 }
 0x3ab   :  { %3291 = vmatpush.xpose.msk.msra.mxu3 %vm190_vm8, %v467_v15 }
 0x3ae   :  { %v504_v52 = vpop.permute.xlu2 %503 }
 0x3b2   :  { %3292 = vmatmul.msk.f32.vlgmr.msra.gmra.mxu3 %vm190_vm8, %v4637_v56 }
 0x3b6   :  { %v530_v58 = vpop.permute.xlu2 %529 }
 0x3be   :  { %v662_v62 = vpop.permute.xlu2 %661 }
 0x3c6   :  { %v660_v2 = vpop.permute.xlu2 %659 }
 0x413   :  { %v4710_v0 = vpop.f32.mrf.mxu2 }
 0x423   :  { %v4713_v1 = vpop.f32.mrf.mxu2 }
 0x42d   :  { %v4687_v38 = vpop.f32.mrf.mxu3 }
 0x435   :  { %v489_v40 = vpop.f32.mrf.mxu3 }
 0x436   :  { %v490_v41 = vadd.f32 %v489_v40, %v4690_v39 }
 0x438   :  { %v492_v42 = vsel %vm190_vm8, %v490_v41, -inf }
 0x439   :  { %493 = vmax.xlane.f32.xlu1 %v492_v42 }
 0x452   :  { %384 = vrot.lane.b32.xlu1 %v4625_v54, %s6087_s9  ;;  %s6120_s9 = sld [smem:[#allocation8_spill]] }
 0x45a   :  { %531 = vrot.lane.b32.xlu1 %v4637_v56, %s6092_s10  ;;  %s6125_s10 = smov 112  }
 0x462   :  { %596 = vrot.lane.b32.xlu1 %v4637_v56, %s6085_s26  ;;  %s6121_s26 = sld [smem:[#allocation10_spill]] }
 0x46a   :  { %594 = vrot.lane.b32.xlu1 %v4637_v56, %s6096_s8  ;;  %s6123_s8 = smov 64  }
 0x4ac   :  { %v494_v43 = vpop.xlane.xlu1 %493 }
 0x4ad   :  { %v495_v44 = vsub.f32 %v490_v41, %v494_v43 }
 0x4af   :  { %v496_v45 = vmul.f32 1.442695, %v495_v44 }
 0x4b1   :  { %4360 = vpow2.f32 %v496_v45 }
 0x4b7   :  { %v4361_v46 = vpop.eup %4360 }
 0x4b8   :  { %v498_v47 = vsel %vm190_vm8, %v4361_v46, 0.0 }
 0x4b9   :  { %499 = vadd.xlane.f32.xlu0 %v498_v47 }
 0x4c4   :  { %v385_v51 = vpop.permute.xlu1 %384 }
 0x4c5   :  { %3288 = vmatpush.xpose.msk.msra.mxu2 %vm190_vm8, %v385_v51 }
 0x4c8   :  { %3289 = vmatmul.msk.f32.vlgmr.msra.gmra.mxu2 %vm190_vm8, %v383_v48 }
 0x4c9   :  { %524 = vmatpush.msrb.mxu2 %v504_v52 }
 0x4cc   :  { %v532_v53 = vpop.permute.xlu1 %531 }
 0x4cd   :  { %3294 = vmatpush.xpose.msk.msra.mxu2 %vm190_vm8, %v532_v53 }
 0x4d4   :  { %v597_v55 = vpop.permute.xlu1 %596 }
 0x4d5   :  { %3297 = vmatpush.xpose.msk.msrb.mxu3 %vm190_vm8, %v597_v55 }
 0x4dc   :  { %v595_v57 = vpop.permute.xlu1 %594 }
 0x4dd   :  { %3298 = vmatmul.msk.f32.vlgmr.msrb.gmra.mxu3 %vm190_vm8, %v595_v57 }
 0x52c   :  { %v500_v59 = vpop.xlane.xlu0 %499 }
 0x52d   :  { %4362 = vrcp.f32 %v500_v59 }
 0x533   :  { %v4363_v60 = vpop.eup %4362 }
 0x534   :  { %v502_v61 = vmul.f32 %v4363_v60, %v4361_v46 }
 0x536   :  { %3293 = vmatmul.msk.f32.vlgmr.msrb.gmra.mxu2 %vm190_vm8, %v502_v61 }
 0x537   :  { %3300 = vmatpush.xpose.msk.msrb.mxu2 %vm190_vm8, %v662_v62 }
 0x53e   :  { %3295 = vmatmul.msk.f32.vlgmr.msra.gmra.mxu2 %vm190_vm8, %v530_v58 }
 0x546   :  { %3301 = vmatmul.msk.f32.vlgmr.msrb.gmra.mxu2 %vm190_vm8, %v660_v2 }
 0x54b   :  { %v407_v3 = vpop.f32.mrf.mxu2 }
 0x54c   :  { %v408_v4 = vadd.f32 %v407_v3, %v4654_v63  ;;  %v4096_v3 = vld [vmem:[%s6119_s5 + $0x8] sm:$0xff] }
 0x54d   :  { %769 = vmatpush.bf16.msra.mxu3 %v4096_v3 }
 0x54e   :  { %v410_v5 = vsel %vm190_vm8, %v408_v4, -inf }
 0x54f   :  { %411 = vmax.xlane.f32.xlu0 %v410_v5 }
 0x560   :  { %v619_v6 = vpop.f32.mrf.mxu3 }
 0x561   :  { %v620_v7 = vadd.f32 %v619_v6, %v4690_v39 }
 0x563   :  { %v622_v8 = vsel %vm190_vm8, %v620_v7, -inf }
 0x564   :  { %623 = vmax.xlane.f32.xlu2 %v622_v8 }
 0x5b9   :  { %v4720_v9 = vpop.f32.mrf.mxu2 }
 0x5c1   :  { %v554_v11 = vpop.f32.mrf.mxu2 }
 0x5c2   :  { %v555_v12 = vadd.f32 %v554_v11, %v4690_v39  ;;  %v412_v13 = vpop.xlane.xlu0 %411 }
 0x5c3   :  { %v413_v14 = vsub.f32 %v408_v4, %v412_v13 }
 0x5c4   :  { %v557_v15 = vsel %vm190_vm8, %v555_v12, -inf }
 0x5c5   :  { %v414_v16 = vmul.f32 1.442695, %v413_v14  ;;  %558 = vmax.xlane.f32.xlu1 %v557_v15 }
 0x5c7   :  { %4364 = vpow2.f32 %v414_v16 }
 0x5c9   :  { %v684_v19 = vpop.f32.mrf.mxu2 }
 0x5ca   :  { %v685_v20 = vadd.f32 %v684_v19, %v4690_v39 }
 0x5cc   :  { %v687_v21 = vsel %vm190_vm8, %v685_v20, -inf }
 0x5cd   :  { %v4365_v17 = vpop.eup %4364 }
 0x5ce   :  { %v416_v18 = vsel %vm190_vm8, %v4365_v17, 0.0 }
 0x5cf   :  { %417 = vadd.xlane.f32.xlu0 %v416_v18 }
 0x5d7   :  { %688 = vmax.xlane.f32.xlu0 %v687_v21  ;;  %v624_v22 = vpop.xlane.xlu2 %623 }
 0x5d8   :  { %v625_v23 = vsub.f32 %v620_v7, %v624_v22 }
 0x5da   :  { %v626_v24 = vmul.f32 1.442695, %v625_v23 }
 0x5dc   :  { %4366 = vpow2.f32 %v626_v24 }
 0x5e2   :  { %v4367_v25 = vpop.eup %4366 }
 0x5e3   :  { %v628_v26 = vsel %vm190_vm8, %v4367_v25, 0.0 }
 0x5e4   :  { %629 = vadd.xlane.f32.xlu1 %v628_v26 }
 0x5eb   :  { %421 = vrot.lane.b32.xlu0 %v4625_v54, %s6079_s6 }
 0x5fd   :  { %568 = vrot.lane.b32.xlu1 %v4637_v56, %s6081_s29  ;;  %s6133_s29 = smov 48  }
 0x638   :  { %v559_v27 = vpop.xlane.xlu1 %558 }
 0x639   :  { %v560_v28 = vsub.f32 %v555_v12, %v559_v27 }
 0x63b   :  { %v561_v29 = vmul.f32 1.442695, %v560_v28 }
 0x63d   :  { %4368 = vpow2.f32 %v561_v29 }
 0x642   :  { %v418_v30 = vpop.xlane.xlu0 %417 }
 0x643   :  { %v4369_v31 = vpop.eup %4368 }
 0x644   :  { %v563_v32 = vsel %vm190_vm8, %v4369_v31, 0.0 }
 0x645   :  { %564 = vadd.xlane.f32.xlu0 %v563_v32 }
 0x64a   :  { %v689_v33 = vpop.xlane.xlu0 %688 }
 0x64b   :  { %v690_v34 = vsub.f32 %v685_v20, %v689_v33 }
 0x64d   :  { %v691_v35 = vmul.f32 1.442695, %v690_v34 }
 0x64f   :  { %4370 = vpow2.f32 %v691_v35 }
 0x650   :  { %4372 = vrcp.f32 %v418_v30 }
 0x655   :  { %v4371_v36 = vpop.eup %4370 }
 0x656   :  { %v693_v54 = vsel %vm190_vm8, %v4371_v36, 0.0  ;;  %v4373_v37 = vpop.eup %4372 }
 0x657   :  { %694 = vadd.xlane.f32.xlu2 %v693_v54  ;;  %v420_v40 = vmul.f32 %v4373_v37, %v4365_v17  ;;  %v630_v42 = vpop.xlane.xlu1 %629 }
 0x659   :  { %633 = vrot.lane.b32.xlu0 %v4637_v56, %s6077_s0  ;;  %s6089_s0 = smov 24  }
 0x65d   :  { %v422_v41 = vpop.permute.xlu0 %421 }
 0x65e   :  { %442 = vmatpush.msra.mxu1 %v422_v41  ;;  %v4097_v41 = vld [vmem:[%s6055_s12] sm:$0xff] }
 0x65f   :  { %3290 = vmatmul.msk.f32.vlgmr.msra.gmra.mxu1 %vm190_vm8, %v420_v40 }
 0x66f   :  { %698 = vrot.lane.b32.xlu2 %v4637_v56, %s6079_s6  ;;  %v569_v43 = vpop.permute.xlu1 %568  ;;  %s6131_s6 = smov 56  }
 0x670   :  { %589 = vmatpush.msrb.mxu1 %v569_v43 }
 0x6b8   :  { %v565_v44 = vpop.xlane.xlu0 %564 }
 0x6b9   :  { %4374 = vrcp.f32 %v565_v44 }
 0x6ba   :  { %4376 = vrcp.f32 %v630_v42 }
 0x6bf   :  { %v4375_v45 = vpop.eup %4374 }
 0x6c0   :  { %v567_v46 = vmul.f32 %v4375_v45, %v4369_v31  ;;  %v4377_v47 = vpop.eup %4376 }
 0x6c1   :  { %v632_v52 = vmul.f32 %v4377_v47, %v4367_v25 }
 0x6c2   :  { %3296 = vmatmul.msk.f32.vlgmr.msrb.gmra.mxu1 %vm190_vm8, %v567_v46 }
 0x6ca   :  { %v695_v48 = vpop.xlane.xlu2 %694 }
 0x6cb   :  { %4378 = vrcp.f32 %v695_v48  ;;  %v634_v51 = vpop.permute.xlu0 %633 }
 0x6cc   :  { %654 = vmatpush.msrb.mxu0 %v634_v51 }
 0x6cd   :  { %3299 = vmatmul.msk.f32.vlgmr.msrb.gmra.mxu0 %vm190_vm8, %v632_v52 }
 0x6d1   :  { %v4379_v53 = vpop.eup %4378 }
 0x6d2   :  { %v697_v55 = vmul.f32 %v4379_v53, %v4371_v36  ;;  %v699_v56 = vpop.permute.xlu2 %698 }
 0x6d3   :  { %719 = vmatpush.msra.mxu1 %v699_v56 }
 0x6d4   :  { %3302 = vmatmul.msk.f32.vlgmr.msra.gmra.mxu1 %vm190_vm8, %v697_v55 }
 0x6dc   :  { %v444_v57 = vpop.f32.mrf.mxu1 }
 0x73f   :  { %v591_v58 = vpop.f32.mrf.mxu1 }
 0x740   :  { %v4292_v59 = vpack.i.bf16 %v591_v58, %v4713_v1  ;;  %v4095_v1 = vld [vmem:[%s6119_s5] sm:$0xff] }
 0x741   :  { %770 = vmatpush.bf16.msra.mxu3 %v4095_v1 }
 0x742   :  { %4293 = vrot.lane.b32.xlu0 %v4292_v59, %s6091_s28  ;;  %s6122_s28 = sld [smem:[#allocation11_spill]] }
 0x748   :  { %v4327_v3 = vld [vmem:[%s6122_s28] ss:$0 sm:$0xff] }
 0x74a   :  { %v656_v60 = vpop.f32.mrf.mxu0 }
 0x74b   :  { %v4297_v61 = vpack.i.bf16 %v656_v60, %v4687_v38  ;;  %v4326_v60 = vld [vmem:[%s6121_s26] ss:$0 sm:$0xff] }
 0x74d   :  { %4298 = vrot.lane.b32.xlu0 %v4297_v61, %s6090_s11  ;;  %s6132_s11 = smov 40  }
 0x751   :  { %v721_v62 = vpop.f32.mrf.mxu1 }
 0x752   :  { %v4302_v2 = vpack.i.bf16 %v721_v62, %v444_v57 }
 0x754   :  { %4303 = vrot.lane.b32.xlu1 %v4302_v2, %s6089_s0  ;;  %s6130_s0 = smov 104  }
 0x7b4   :  { %v4294_v4 = vpop.permute.xlu0 %4293 }
 0x7b5   :  { %v4296_v5 = vunpack.i.h.bf16 %v4294_v4  ;;  %v4295_v6 = vunpack.i.l.bf16 %v4294_v4 }
 0x7b7   :  { %v736_v12 = vsel %vm190_vm8, %v4720_v9, %v4296_v5  ;;  %v459_v13 = vsel %vm190_vm8, %v4710_v0, %v4295_v6  ;;  %v4325_v9 = vld [vmem:[%s6120_s9] ss:$0 sm:$0xff] }
 0x7bf   :  { %v4299_v38 = vpop.permute.xlu0 %4298 }
 0x7c0   :  { %v4301_v7 = vunpack.i.h.bf16 %v4299_v38  ;;  %v4300_v8 = vunpack.i.l.bf16 %v4299_v38 }
 0x7c2   :  { %v461_v16 = vsel %vm460_vm9, %v459_v13, %v4300_v8  ;;  %v737_v17 = vsel %vm460_vm9, %v736_v12, %v4301_v7  ;;  %v4102_v8 = vld [vmem:[%s6057_s14 + $0x18] sm:$0xff]  ;;  %v4100_v12 = vld [vmem:[%s6057_s14 + $0x8] sm:$0xff]  ;;  %v4099_v13 = vld [vmem:[%s6057_s14] sm:$0xff] }
 0x7c3   :  { %936 = vmatpush.bf16.msra.mxu2 %v4102_v8 }
 0x7c6   :  { %v4304_v11 = vpop.permute.xlu1 %4303 }
 0x7c7   :  { %v4306_v14 = vunpack.i.h.bf16 %v4304_v11  ;;  %v4305_v15 = vunpack.i.l.bf16 %v4304_v11  ;;  %v4101_v11 = vld [vmem:[%s6057_s14 + $0x10] sm:$0xff] }
 0x7c8   :  { %937 = vmatpush.bf16.msra.mxu2 %v4101_v11 }
 0x7c9   :  { %v738_v18 = vsel %vm462_vm10, %v737_v17, %v4306_v14  ;;  %v463_v19 = vsel %vm462_vm10, %v461_v16, %v4305_v15  ;;  %v4328_v14 = vld [vmem:[%s6054_s13] ss:$0 sm:$0xff] }
 0x7ca   :  { %v743_v20 = vpack.c.bf16 %v738_v18, %v463_v19 }
 0x7cc   :  { %3311 = vmatmul.msk.bf16.vlgmr.msra.gmra.mxu3 %vm85_vm0, %v743_v20  ;;  %938 = vmatpush.bf16.msra.mxu2 %v4100_v12 }
 0x7d0   :  { %939 = vmatpush.bf16.msra.mxu2 %v4099_v13 }
 0x84f   :  { %v772_v21 = vpop.f32.mrf.mxu3 }
 0x850   :  { %v773_v22 = vadd.f32 %v4325_v9, %v772_v21 }
 0x852   :  { %v777_v0 = vadd.f32 %v773_v22, %v4615_v49 }
 0x854   :  { %v781_v23 = vsel %vm85_vm0, %v777_v0, 0.0 }
 0x855   :  { %782 = vadd.xlane.f32.xlu0 %v781_v23 }
 0x857   :  { %v774_v24 = vpop.f32.mrf.mxu3 }
 0x858   :  { %v775_v25 = vadd.f32 %v4325_v9, %v774_v24 }
 0x85a   :  { %v778_v26 = vadd.f32 %v775_v25, %v4617_v50  ;;  %v4098_v50 = vld [vmem:[%s6055_s12 + $0x8] sm:$0xff] }
 0x85b   :  { %865 = vmatpush.bf16.msra.mxu0 %v4098_v50 }
 0x85c   :  { %v784_v27 = vsel %vm85_vm0, %v778_v26, 0.0 }
 0x85d   :  { %785 = vadd.xlane.f32.xlu2 %v784_v27 }
 0x85f   :  { %866 = vmatpush.bf16.msra.mxu0 %v4097_v41 }
 0x8c8   :  { %v783_v28 = vpop.xlane.xlu0 %782 }
 0x8c9   :  { %v787_v29 = vmul.f32 %v783_v28, %v4595_v10 }
 0x8cb   :  { %v789_v30 = vsub.f32 %v777_v0, %v787_v29 }
 0x8cd   :  { %v791_v31 = vmul.f32 %v789_v30, %v789_v30 }
 0x8cf   :  { %v793_v32 = vsel %vm85_vm0, %v791_v31, 0.0 }
 0x8d0   :  { %v786_v33 = vpop.xlane.xlu2 %785  ;;  %794 = vadd.xlane.f32.xlu1 %v793_v32 }
 0x8d1   :  { %v788_v49 = vmul.f32 %v786_v33, %v4595_v10 }
 0x8d3   :  { %v790_v34 = vsub.f32 %v778_v26, %v788_v49 }
 0x8d5   :  { %v792_v35 = vmul.f32 %v790_v34, %v790_v34 }
 0x8d7   :  { %v796_v36 = vsel %vm85_vm0, %v792_v35, 0.0  ;;  %v4329_v35 = vld [vmem:[%s6056_s15] ss:$0 sm:$0xff] }
 0x8d8   :  { %797 = vadd.xlane.f32.xlu0 %v796_v36 }
 0x943   :  { %v795_v54 = vpop.xlane.xlu1 %794 }
 0x944   :  { %v799_v37 = vmul.f32 %v795_v54, %v4595_v10 }
 0x946   :  { %v801_v40 = vadd.f32 1e-12, %v799_v37 }
 0x948   :  { %4380 = vrsqrt.f32 %v801_v40  ;;  %vm809_vm12 = vweird.f32 %v801_v40 }
 0x94b   :  { %v798_v42 = vpop.xlane.xlu0 %797 }
 0x94c   :  { %v800_v43 = vmul.f32 %v798_v42, %v4595_v10 }
 0x94e   :  { %v4381_v44 = vpop.eup %4380  ;;  %v802_v45 = vadd.f32 1e-12, %v800_v43 }
 0x94f   :  { %v804_v46 = vmul.f32 %v4381_v44, %v801_v40  ;;  %vm810_vm11 = vweird.f32 %v4381_v44 }
 0x950   :  { %4382 = vrsqrt.f32 %v802_v45  ;;  %vm811_vm13 = vmor %vm809_vm12, %vm810_vm11  ;;  %vm819_vm15 = vweird.f32 %v802_v45 }
 0x951   :  { %v805_v47 = vmul.f32 %v4381_v44, %v804_v46 }
 0x953   :  { %v806_v48 = vmul.f32 0.5, %v805_v47 }
 0x955   :  { %v807_v51 = vsub.f32 1.5, %v806_v48 }
 0x956   :  { %v4383_v52 = vpop.eup %4382 }
 0x957   :  { %v808_v53 = vmul.f32 %v4381_v44, %v807_v51  ;;  %v814_v55 = vmul.f32 %v4383_v52, %v802_v45  ;;  %vm820_vm14 = vweird.f32 %v4383_v52 }
 0x958   :  { %vm821_vm1 = vmor %vm819_vm15, %vm820_vm14 }
 0x959   :  { %v815_v56 = vmul.f32 %v4383_v52, %v814_v55  ;;  %v812_v57 = vsel %vm811_vm13, %v4381_v44, %v808_v53 }
 0x95a   :  { %v823_v61 = vmul.f32 %v812_v57, %v789_v30  ;;  %v4104_v57 = vld [vmem:[%s6114_s4 + $0x18] sm:$0xff] }
 0x95b   :  { %v816_v58 = vmul.f32 0.5, %v815_v56  ;;  %1036 = vmatpush.bf16.msrb.mxu1 %v4104_v57 }
 0x95c   :  { %v828_v1 = vmul.f32 %v4326_v60, %v823_v61  ;;  %v4103_v61 = vld [vmem:[%s6114_s4 + $0x10] sm:$0xff]  ;;  %s6129_s4 = smov 80  }
 0x95d   :  { %v817_v59 = vsub.f32 1.5, %v816_v58 }
 0x95e   :  { %v833_v5 = vadd.f32 %v4327_v3, %v828_v1 }
 0x95f   :  { %v818_v62 = vmul.f32 %v4383_v52, %v817_v59  ;;  %1037 = vmatpush.bf16.msrb.mxu1 %v4103_v61 }
 0x961   :  { %v822_v2 = vsel %vm821_vm1, %v4383_v52, %v818_v62 }
 0x962   :  { %v824_v4 = vmul.f32 %v822_v2, %v790_v34 }
 0x964   :  { %v829_v38 = vmul.f32 %v4326_v60, %v824_v4 }
 0x966   :  { %v834_v6 = vadd.f32 %v4327_v3, %v829_v38 }
 0x968   :  { %v839_v7 = vpack.c.bf16 %v834_v6, %v833_v5 }
 0x96a   :  { %3320 = vmatmul.msk.bf16.vlgmr.msra.gmra.mxu0 %vm85_vm0, %v839_v7 }
 0x9e7   :  { %v868_v15 = vpop.f32.mrf.mxu0 }
 0x9e8   :  { %v869_v16 = vadd.f32 %v4328_v14, %v868_v15 }
 0x9ea   :  { %v875_v17 = vmul.f32 0.044715, %v869_v16  ;;  %v873_v30 = vmul.f32 0.5, %v869_v16 }
 0x9ec   :  { %v877_v18 = vmul.f32 %v875_v17, %v869_v16 }
 0x9ee   :  { %v879_v19 = vmul.f32 %v877_v18, %v869_v16 }
 0x9ef   :  { %v870_v20 = vpop.f32.mrf.mxu0 }
 0x9f0   :  { %v881_v9 = vadd.f32 %v879_v19, %v869_v16  ;;  %v871_v21 = vadd.f32 %v4328_v14, %v870_v20  ;;  %v4330_v16 = vld [vmem:[%s6058_s16] ss:$0 sm:$0xff] }
 0x9f1   :  { %v4331_v20 = vld [vmem:[%s6059_s17] ss:$0 sm:$0xff] }
 0x9f2   :  { %v876_v22 = vmul.f32 0.044715, %v871_v21  ;;  %v883_v0 = vmul.f32 0.7978846, %v881_v9  ;;  %v874_v31 = vmul.f32 0.5, %v871_v21 }
 0x9f4   :  { %v878_v23 = vmul.f32 %v876_v22, %v871_v21  ;;  %4384 = vtanh.f32 %v883_v0 }
 0x9f6   :  { %v880_v24 = vmul.f32 %v878_v23, %v871_v21 }
 0x9f8   :  { %v882_v25 = vadd.f32 %v880_v24, %v871_v21 }
 0x9fa   :  { %v884_v26 = vmul.f32 0.7978846, %v882_v25  ;;  %v4385_v27 = vpop.eup %4384  ;;  %v4332_v25 = vld [vmem:[%s6117_s30 + $0x1] ss:$0 sm:$0xff]  ;;  %s6128_s30 = smov 72  }
 0x9fb   :  { %v887_v28 = vadd.f32 1.0, %v4385_v27 }
 0x9fc   :  { %4386 = vtanh.f32 %v884_v26 }
 0x9fd   :  { %v889_v33 = vmul.f32 %v887_v28, %v873_v30 }
 0xa02   :  { %v4387_v29 = vpop.eup %4386 }
 0xa03   :  { %v888_v32 = vadd.f32 1.0, %v4387_v29 }
 0xa05   :  { %v890_v49 = vmul.f32 %v888_v32, %v874_v31 }
 0xa07   :  { %v899_v34 = vpack.c.bf16 %v890_v49, %v889_v33 }
 0xa09   :  { %3337 = vmatmul.msk.bf16.vlgmr.msra.gmra.mxu2 %vm928_vm2, %v899_v34 }
 0xa8c   :  { %v941_v36 = vpop.f32.mrf.mxu2 }
 0xa8d   :  { %v942_v50 = vadd.f32 %v4329_v35, %v941_v36 }
 0xa8f   :  { %v946_v54 = vadd.f32 %v942_v50, %v833_v5 }
 0xa91   :  { %v950_v37 = vsel %vm85_vm0, %v946_v54, 0.0 }
 0xa92   :  { %951 = vadd.xlane.f32.xlu2 %v950_v37 }
 0xa94   :  { %v943_v40 = vpop.f32.mrf.mxu2 }
 0xa95   :  { %v944_v41 = vadd.f32 %v4329_v35, %v943_v40 }
 0xa97   :  { %v947_v42 = vadd.f32 %v944_v41, %v834_v6 }
 0xa99   :  { %v953_v43 = vsel %vm85_vm0, %v947_v42, 0.0 }
 0xa9a   :  { %954 = vadd.xlane.f32.xlu1 %v953_v43 }
 0xb05   :  { %v952_v44 = vpop.xlane.xlu2 %951 }
 0xb06   :  { %v956_v45 = vmul.f32 %v952_v44, %v4595_v10 }
 0xb08   :  { %v958_v46 = vsub.f32 %v946_v54, %v956_v45 }
 0xb0a   :  { %v960_v47 = vmul.f32 %v958_v46, %v958_v46 }
 0xb0c   :  { %v962_v48 = vsel %vm85_vm0, %v960_v47, 0.0 }
 0xb0d   :  { %v955_v51 = vpop.xlane.xlu1 %954  ;;  %963 = vadd.xlane.f32.xlu0 %v962_v48 }
 0xb0e   :  { %v957_v52 = vmul.f32 %v955_v51, %v4595_v10 }
 0xb10   :  { %v959_v53 = vsub.f32 %v947_v42, %v957_v52 }
 0xb12   :  { %v961_v55 = vmul.f32 %v959_v53, %v959_v53 }
 0xb14   :  { %v965_v56 = vsel %vm85_vm0, %v961_v55, 0.0 }
 0xb15   :  { %966 = vadd.xlane.f32.xlu2 %v965_v56 }
 0xb80   :  { %v964_v58 = vpop.xlane.xlu0 %963 }
 0xb81   :  { %v968_v59 = vmul.f32 %v964_v58, %v4595_v10 }
 0xb83   :  { %v970_v60 = vadd.f32 1e-12, %v968_v59 }
 0xb85   :  { %4388 = vrsqrt.f32 %v970_v60  ;;  %vm978_vm4 = vweird.f32 %v970_v60 }
 0xb88   :  { %v967_v62 = vpop.xlane.xlu2 %966 }
 0xb89   :  { %v969_v2 = vmul.f32 %v967_v62, %v4595_v10 }
 0xb8b   :  { %v4389_v3 = vpop.eup %4388  ;;  %v971_v1 = vadd.f32 1e-12, %v969_v2 }
 0xb8c   :  { %v973_v4 = vmul.f32 %v4389_v3, %v970_v60  ;;  %vm979_vm3 = vweird.f32 %v4389_v3 }
 0xb8d   :  { %4390 = vrsqrt.f32 %v971_v1  ;;  %vm980_vm5 = vmor %vm978_vm4, %vm979_vm3  ;;  %vm988_vm7 = vweird.f32 %v971_v1 }
 0xb8e   :  { %v974_v38 = vmul.f32 %v4389_v3, %v973_v4 }
 0xb90   :  { %v975_v5 = vmul.f32 0.5, %v974_v38 }
 0xb92   :  { %v976_v6 = vsub.f32 1.5, %v975_v5 }
 0xb93   :  { %v4391_v7 = vpop.eup %4390 }
 0xb94   :  { %v977_v8 = vmul.f32 %v4389_v3, %v976_v6  ;;  %v983_v11 = vmul.f32 %v4391_v7, %v971_v1  ;;  %vm989_vm6 = vweird.f32 %v4391_v7 }
 0xb95   :  { %vm990_vm11 = vmor %vm988_vm7, %vm989_vm6 }
 0xb96   :  { %v984_v12 = vmul.f32 %v4391_v7, %v983_v11  ;;  %v981_v13 = vsel %vm980_vm5, %v4389_v3, %v977_v8 }
 0xb97   :  { %v992_v17 = vmul.f32 %v981_v13, %v958_v46 }
 0xb98   :  { %v985_v14 = vmul.f32 0.5, %v984_v12 }
 0xb99   :  { %v997_v9 = vmul.f32 %v4330_v16, %v992_v17 }
 0xb9a   :  { %v986_v15 = vsub.f32 1.5, %v985_v14 }
 0xb9b   :  { %v4827_v0 = vadd.f32 %v4331_v20, %v997_v9 }
 0xb9c   :  { %v987_v18 = vmul.f32 %v4391_v7, %v986_v15 }
 0xb9e   :  { %v991_v19 = vsel %vm990_vm11, %v4391_v7, %v987_v18 }
 0xb9f   :  { %v993_v21 = vmul.f32 %v991_v19, %v959_v53 }
 0xba1   :  { %v998_v22 = vmul.f32 %v4330_v16, %v993_v21 }
 0xba3   :  { %v4829_v23 = vadd.f32 %v4331_v20, %v998_v22 }
 0xba5   :  { %v1009_v24 = vpack.c.bf16 %v4829_v23, %v4827_v0 }
 0xba7   :  { %3351 = vmatmul.msk.bf16.vlgmr.msrb.gmra.mxu1 %vm85_vm0, %v1009_v24 }
 0xc24   :  { %v1039_v26 = vpop.f32.mrf.mxu1 }
 0xc25   :  { %v4837_v27 = vadd.f32 %v4332_v25, %v1039_v26 }
 0xc27   :  { %1082 = vrot.lane.b32.xlu2 %v4837_v27, %s6123_s8  ;;  %1045 = vrot.lane.b32.xlu1 %v4837_v27, %s6124_s7 }
 0xc2c   :  { %v1041_v28 = vpop.f32.mrf.mxu1 }
 0xc2d   :  { %v4847_v29 = vadd.f32 %v4332_v25, %v1041_v28 }
 0xc2f   :  { %1173 = vrot.lane.b32.xlu2 %v4837_v27, %s6125_s10  ;;  %1108 = vrot.lane.b32.xlu1 %v4837_v27, %s6126_s27 }
 0xc37   :  { %1384 = vrot.lane.b32.xlu2 %v4847_v29, %s6127_s1  ;;  %1240 = vrot.lane.b32.xlu1 %v4837_v27, %s6128_s30 }
 0xc3f   :  { %1319 = vrot.lane.b32.xlu1 %v4847_v29, %s6124_s7  ;;  %s6136_s7 = smov 24  }
 0xc47   :  { %1449 = vrot.lane.b32.xlu1 %v4847_v29, %s6129_s4 }
 0xc4f   :  { %1512 = vrot.lane.b32.xlu1 %v4847_v29, %s6130_s0 }
 0xc81   :  { %v1083_v30 = vpop.permute.xlu2 %1082 }
 0xc82   :  { %1103 = vmatpush.msrb.mxu0 %v1083_v30 }
 0xc89   :  { %v1174_v40 = vpop.permute.xlu2 %1173 }
 0xc91   :  { %v1385_v43 = vpop.permute.xlu2 %1384 }
 0xc99   :  { %v1046_v31 = vpop.permute.xlu1 %1045 }
 0xc9a   :  { %3352 = vmatpush.xpose.msk.msrb.mxu3 %vm190_vm8, %v1046_v31 }
 0xc9d   :  { %3353 = vmatmul.msk.f32.vlgmr.msrb.gmra.mxu3 %vm190_vm8, %v4837_v27 }
 0xca1   :  { %v1109_v50 = vpop.permute.xlu1 %1108 }
 0xca9   :  { %v1241_v42 = vpop.permute.xlu1 %1240 }
 0xcb1   :  { %v1320_v47 = vpop.permute.xlu1 %1319 }
 0xcb9   :  { %v1450_v51 = vpop.permute.xlu1 %1449 }
 0xcc1   :  { %v1513_v56 = vpop.permute.xlu1 %1512 }
 0xd20   :  { %v1068_v32 = vpop.f32.mrf.mxu3 }
 0xd21   :  { %v1069_v33 = vadd.f32 %v1068_v32, %v4654_v63 }
 0xd23   :  { %v1071_v49 = vsel %vm190_vm8, %v1069_v33, -inf }
 0xd24   :  { %1072 = vmax.xlane.f32.xlu0 %v1071_v49 }
 0xd38   :  { %1110 = vrot.lane.b32.xlu0 %v4837_v27, %s6127_s1 }
 0xd40   :  { %1175 = vrot.lane.b32.xlu0 %v4837_v27, %s6129_s4 }
 0xd48   :  { %1238 = vrot.lane.b32.xlu0 %v4837_v27, %s6130_s0 }
 0xd50   :  { %1382 = vrot.lane.b32.xlu0 %v4847_v29, %s6126_s27 }
 0xd58   :  { %1447 = vrot.lane.b32.xlu0 %v4847_v29, %s6125_s10 }
 0xd97   :  { %v1073_v34 = vpop.xlane.xlu0 %1072 }
 0xd98   :  { %v1074_v35 = vsub.f32 %v1069_v33, %v1073_v34 }
 0xd9a   :  { %v1075_v36 = vmul.f32 1.442695, %v1074_v35 }
 0xd9c   :  { %4392 = vpow2.f32 %v1075_v36 }
 0xda2   :  { %v4393_v54 = vpop.eup %4392 }
 0xda3   :  { %v1077_v37 = vsel %vm190_vm8, %v4393_v54, 0.0 }
 0xda4   :  { %1078 = vadd.xlane.f32.xlu2 %v1077_v37 }
 0xdaa   :  { %v1111_v41 = vpop.permute.xlu0 %1110 }
 0xdab   :  { %3355 = vmatpush.xpose.msk.msra.mxu1 %vm190_vm8, %v1111_v41 }
 0xdae   :  { %3356 = vmatmul.msk.f32.vlgmr.msra.gmra.mxu1 %vm190_vm8, %v1109_v50 }
 0xdaf   :  { %3361 = vmatpush.xpose.msk.msrb.mxu1 %vm190_vm8, %v1241_v42 }
 0xdb2   :  { %v1176_v44 = vpop.permute.xlu0 %1175 }
 0xdb3   :  { %3367 = vmatpush.xpose.msk.msra.mxu1 %vm190_vm8, %v1385_v43  ;;  %3358 = vmatpush.xpose.msk.msra.mxu0 %vm190_vm8, %v1176_v44 }
 0xdba   :  { %v1239_v45 = vpop.permute.xlu0 %1238 }
 0xdbb   :  { %3362 = vmatmul.msk.f32.vlgmr.msrb.gmra.mxu1 %vm190_vm8, %v1239_v45 }
 0xdbc   :  { %1514 = vrot.lane.b32.xlu2 %v4847_v29, %s6128_s30 }
 0xdc2   :  { %v1383_v46 = vpop.permute.xlu0 %1382 }
 0xdc3   :  { %3368 = vmatmul.msk.f32.vlgmr.msra.gmra.mxu1 %vm190_vm8, %v1383_v46 }
 0xdca   :  { %v1448_v60 = vpop.permute.xlu0 %1447 }
 0xe17   :  { %v1079_v48 = vpop.xlane.xlu2 %1078 }
 0xe18   :  { %4394 = vrcp.f32 %v1079_v48 }
 0xe1e   :  { %v4395_v52 = vpop.eup %4394 }
 0xe1f   :  { %v1081_v53 = vmul.f32 %v4395_v52, %v4393_v54  ;;  %v1515_v55 = vpop.permute.xlu2 %1514 }
 0xe20   :  { %3373 = vmatpush.xpose.msk.msrb.mxu1 %vm190_vm8, %v1515_v55 }
 0xe21   :  { %3354 = vmatmul.msk.f32.vlgmr.msrb.gmra.mxu0 %vm190_vm8, %v1081_v53 }
 0xe22   :  { %3364 = vmatpush.xpose.msk.msrb.mxu0 %vm190_vm8, %v1320_v47 }
 0xe23   :  { %3374 = vmatmul.msk.f32.vlgmr.msrb.gmra.mxu1 %vm190_vm8, %v1513_v56 }
 0xe29   :  { %3359 = vmatmul.msk.f32.vlgmr.msra.gmra.mxu0 %vm190_vm8, %v1174_v40 }
 0xe2a   :  { %3370 = vmatpush.xpose.msk.msra.mxu0 %vm190_vm8, %v1450_v51 }
 0xe2b   :  { %v1133_v57 = vpop.f32.mrf.mxu1 }
 0xe2c   :  { %v1134_v58 = vadd.f32 %v1133_v57, %v4654_v63 }
 0xe2e   :  { %v1136_v59 = vsel %vm190_vm8, %v1134_v58, -inf }
 0xe2f   :  { %1137 = vmax.xlane.f32.xlu2 %v1136_v59 }
 0xe31   :  { %3365 = vmatmul.msk.f32.vlgmr.msrb.gmra.mxu0 %vm190_vm8, %v4847_v29 }
 0xe38   :  { %v1263_v61 = vpop.f32.mrf.mxu1 }
 0xe39   :  { %v1264_v62 = vadd.f32 %v1263_v61, %v4654_v63  ;;  %3371 = vmatmul.msk.f32.vlgmr.msra.gmra.mxu0 %vm190_vm8, %v1448_v60 }
 0xe3b   :  { %v1266_v2 = vsel %vm190_vm8, %v1264_v62, -inf }
 0xe3c   :  { %1267 = vmax.xlane.f32.xlu1 %v1266_v2 }
 0xe40   :  { %v1407_v7 = vpop.f32.mrf.mxu1 }
 0xe41   :  { %v1408_v11 = vadd.f32 %v1407_v7, %v4690_v39 }
 0xe43   :  { %v1410_v16 = vsel %vm190_vm8, %v1408_v11, -inf }
 0xe9e   :  { %v4897_v3 = vpop.f32.mrf.mxu0 }
 0xea0   :  { %v1537_v18 = vpop.f32.mrf.mxu1 }
 0xea1   :  { %v1538_v19 = vadd.f32 %v1537_v18, %v4690_v39 }
 0xea2   :  { %v1138_v1 = vpop.xlane.xlu2 %1137 }
 0xea3   :  { %v1139_v5 = vsub.f32 %v1134_v58, %v1138_v1  ;;  %v1540_v21 = vsel %vm190_vm8, %v1538_v19, -inf }
 0xea5   :  { %v1140_v8 = vmul.f32 1.442695, %v1139_v5 }
 0xea6   :  { %v1198_v4 = vpop.f32.mrf.mxu0 }
 0xea7   :  { %v1199_v38 = vadd.f32 %v1198_v4, %v4654_v63  ;;  %4396 = vpow2.f32 %v1140_v8 }
 0xea9   :  { %v1201_v6 = vsel %vm190_vm8, %v1199_v38, -inf }
 0xeaa   :  { %1202 = vmax.xlane.f32.xlu0 %v1201_v6 }
 0xead   :  { %v4397_v20 = vpop.eup %4396 }
 0xeae   :  { %v1342_v12 = vpop.f32.mrf.mxu0  ;;  %v1142_v9 = vsel %vm190_vm8, %v4397_v20, 0.0 }
 0xeaf   :  { %v1343_v13 = vadd.f32 %v1342_v12, %v4690_v39  ;;  %v1268_v14 = vpop.xlane.xlu1 %1267 }
 0xeb0   :  { %v1269_v15 = vsub.f32 %v1264_v62, %v1268_v14 }
 0xeb1   :  { %v1345_v17 = vsel %vm190_vm8, %v1343_v13, -inf }
 0xeb2   :  { %1411 = vmax.xlane.f32.xlu0 %v1410_v16  ;;  %1346 = vmax.xlane.f32.xlu2 %v1345_v17  ;;  %v1270_v63 = vmul.f32 1.442695, %v1269_v15 }
 0xeb4   :  { %4398 = vpow2.f32 %v1270_v63 }
 0xeb6   :  { %v1472_v40 = vpop.f32.mrf.mxu0 }
 0xeb7   :  { %v1473_v43 = vadd.f32 %v1472_v40, %v4690_v39 }
 0xeb9   :  { %v1475_v48 = vsel %vm190_vm8, %v1473_v43, -inf }
 0xeba   :  { %1143 = vadd.xlane.f32.xlu0 %v1142_v9  ;;  %1541 = vmax.xlane.f32.xlu2 %v1540_v21  ;;  %v4399_v22 = vpop.eup %4398 }
 0xebb   :  { %v1272_v24 = vsel %vm190_vm8, %v4399_v22, 0.0 }
 0xec2   :  { %1273 = vadd.xlane.f32.xlu2 %v1272_v24 }
 0xece   :  { %1147 = vrot.lane.b32.xlu0 %v4837_v27, %s6131_s6 }
 0xed6   :  { %1277 = vrot.lane.b32.xlu0 %v4837_v27, %s6132_s11 }
 0xeda   :  { %1212 = vrot.lane.b32.xlu2 %v4837_v27, %s6133_s29 }
 0xede   :  { %1356 = vrot.lane.b32.xlu0 %v4847_v29, %s6123_s8  ;;  %s6135_s8 = smov 16  }
 0xee2   :  { %1421 = vrot.lane.b32.xlu2 %v4847_v29, %s6131_s6 }
 0xee6   :  { %1486 = vrot.lane.b32.xlu0 %v4847_v29, %s6133_s29 }
 0xf1d   :  { %v1203_v25 = vpop.xlane.xlu0 %1202 }
 0xf1e   :  { %v1204_v54 = vsub.f32 %v1199_v38, %v1203_v25 }
 0xf20   :  { %v1205_v41 = vmul.f32 1.442695, %v1204_v54 }
 0xf25   :  { %v1412_v26 = vpop.xlane.xlu0 %1411  ;;  %v1347_v28 = vpop.xlane.xlu2 %1346 }
 0xf26   :  { %v1413_v30 = vsub.f32 %v1408_v11, %v1412_v26  ;;  %v1348_v45 = vsub.f32 %v1343_v13, %v1347_v28 }
 0xf28   :  { %v1414_v31 = vmul.f32 1.442695, %v1413_v30  ;;  %v1349_v51 = vmul.f32 1.442695, %v1348_v45 }
 0xf2a   :  { %4400 = vpow2.f32 %v1414_v31 }
 0xf2d   :  { %v1542_v32 = vpop.xlane.xlu2 %1541  ;;  %v1144_v35 = vpop.xlane.xlu0 %1143 }
 0xf2e   :  { %v1543_v33 = vsub.f32 %v1538_v19, %v1542_v32 }
 0xf30   :  { %v4401_v49 = vpop.eup %4400  ;;  %v1544_v34 = vmul.f32 1.442695, %v1543_v33  ;;  %v4106_v33 = vld [vmem:[%s6119_s5 + $0x18] sm:$0xff] }
 0xf31   :  { %v1416_v27 = vsel %vm190_vm8, %v4401_v49, 0.0  ;;  %1624 = vmatpush.bf16.msrb.mxu0 %v4106_v33 }
 0xf32   :  { %4402 = vpow2.f32 %v1544_v34  ;;  %1417 = vadd.xlane.f32.xlu1 %v1416_v27 }
 0xf33   :  { %4404 = vrcp.f32 %v1144_v35 }
 0xf35   :  { %v1274_v36 = vpop.xlane.xlu2 %1273 }
 0xf36   :  { %4406 = vrcp.f32 %v1274_v36 }
 0xf37   :  { %4408 = vpow2.f32 %v1205_v41 }
 0xf38   :  { %v4922_v50 = vpop.eup %4402  ;;  %4410 = vpow2.f32 %v1349_v51  ;;  %v4333_v51 = vld [vmem:[%s6120_s9 + $0x1] ss:$0 sm:$0xff] }
 0xf39   :  { %v1546_v37 = vsel %vm190_vm8, %v4922_v50, 0.0  ;;  %v4405_v42 = vpop.eup %4404 }
 0xf3a   :  { %1547 = vadd.xlane.f32.xlu1 %v1546_v37  ;;  %v1146_v46 = vmul.f32 %v4405_v42, %v4397_v20 }
 0xf3c   :  { %v4407_v52 = vpop.eup %4406 }
 0xf3d   :  { %v1213_v44 = vpop.permute.xlu2 %1212  ;;  %v4409_v53 = vpop.eup %4408  ;;  %v1276_v55 = vmul.f32 %v4407_v52, %v4399_v22 }
 0xf3e   :  { %1233 = vmatpush.msrb.mxu2 %v1213_v44  ;;  %v1207_v39 = vsel %vm190_vm8, %v4409_v53, 0.0  ;;  %v4411_v58 = vpop.eup %4410 }
 0xf3f   :  { %v1351_v60 = vsel %vm190_vm8, %v4411_v58, 0.0 }
 0xf40   :  { %v1148_v47 = vpop.permute.xlu0 %1147 }
 0xf41   :  { %1168 = vmatpush.msra.mxu3 %v1148_v47 }
 0xf42   :  { %3357 = vmatmul.msk.f32.vlgmr.msra.gmra.mxu3 %vm190_vm8, %v1146_v46  ;;  %1476 = vmax.xlane.f32.xlu1 %v1475_v48 }
 0xf45   :  { %v1422_v57 = vpop.permute.xlu2 %1421 }
 0xf48   :  { %v1278_v56 = vpop.permute.xlu0 %1277 }
 0xf49   :  { %1298 = vmatpush.msrb.mxu3 %v1278_v56 }
 0xf4a   :  { %1208 = vadd.xlane.f32.xlu1 %v1207_v39  ;;  %3363 = vmatmul.msk.f32.vlgmr.msrb.gmra.mxu3 %vm190_vm8, %v1276_v55 }
 0xf4b   :  { %1442 = vmatpush.msra.mxu3 %v1422_v57 }
 0xf50   :  { %v1357_v59 = vpop.permute.xlu0 %1356 }
 0xf51   :  { %1377 = vmatpush.msra.mxu2 %v1357_v59 }
 0xf52   :  { %1352 = vadd.xlane.f32.xlu1 %v1351_v60 }
 0xf58   :  { %v1487_v14 = vpop.permute.xlu0 %1486 }
 0xfa5   :  { %v1418_v61 = vpop.xlane.xlu1 %1417 }
 0xfa6   :  { %4412 = vrcp.f32 %v1418_v61 }
 0xfac   :  { %v4413_v62 = vpop.eup %4412 }
 0xfad   :  { %v1420_v2 = vmul.f32 %v4413_v62, %v4401_v49  ;;  %v1548_v1 = vpop.xlane.xlu1 %1547  ;;  %v4105_v49 = vld [vmem:[%s6119_s5 + $0x10] sm:$0xff] }
 0xfae   :  { %1625 = vmatpush.bf16.msrb.mxu0 %v4105_v49 }
 0xfaf   :  { %3369 = vmatmul.msk.f32.vlgmr.msra.gmra.mxu3 %vm190_vm8, %v1420_v2 }
 0xfb5   :  { %v1477_v4 = vpop.xlane.xlu1 %1476 }
 0xfb6   :  { %v1478_v38 = vsub.f32 %v1473_v43, %v1477_v4 }
 0xfb8   :  { %v1479_v5 = vmul.f32 1.442695, %v1478_v38 }
 0xfba   :  { %4414 = vpow2.f32 %v1479_v5 }
 0xfbd   :  { %v1209_v6 = vpop.xlane.xlu1 %1208 }
 0xfbe   :  { %4416 = vrcp.f32 %v1209_v6 }
 0xfc0   :  { %v4415_v7 = vpop.eup %4414 }
 0xfc1   :  { %v1481_v8 = vsel %vm190_vm8, %v4415_v7, 0.0 }
 0xfc2   :  { %1482 = vadd.xlane.f32.xlu1 %v1481_v8 }
 0xfc4   :  { %v4417_v11 = vpop.eup %4416 }
 0xfc5   :  { %v1211_v12 = vmul.f32 %v4417_v11, %v4409_v53  ;;  %v1353_v13 = vpop.xlane.xlu1 %1352  ;;  %v1170_v17 = vpop.f32.mrf.mxu3  ;;  %v4107_v11 = vld [vmem:[%s6055_s12 + $0x10] sm:$0xff] }
 0xfc6   :  { %4418 = vrcp.f32 %v1353_v13 }
 0xfc7   :  { %3360 = vmatmul.msk.f32.vlgmr.msrb.gmra.mxu2 %vm190_vm8, %v1211_v12 }
 0xfc8   :  { %1507 = vmatpush.msrb.mxu2 %v1487_v14 }
 0xfcc   :  { %v4419_v15 = vpop.eup %4418 }
 0xfcd   :  { %v1355_v16 = vmul.f32 %v4419_v15, %v4411_v58  ;;  %v1300_v18 = vpop.f32.mrf.mxu3 }
 0xfcf   :  { %3366 = vmatmul.msk.f32.vlgmr.msra.gmra.mxu2 %vm190_vm8, %v1355_v16 }
 0xfdb   :  { %1551 = vrot.lane.b32.xlu1 %v4847_v29, %s6132_s11 }
0x1032   :  { %v1444_v63 = vpop.f32.mrf.mxu3 }
0x1033   :  { %v4307_v19 = vpack.i.bf16 %v1444_v63, %v1170_v17 }
0x1035   :  { %4308 = vrot.lane.b32.xlu2 %v4307_v19, %s6134_s25  ;;  %v1483_v20 = vpop.xlane.xlu1 %1482 }
0x1036   :  { %4420 = vrcp.f32 %v1483_v20 }
0x1037   :  { %4422 = vrcp.f32 %v1548_v1 }
0x103c   :  { %v4421_v9 = vpop.eup %4420 }
0x103d   :  { %v1485_v21 = vmul.f32 %v4421_v9, %v4415_v7  ;;  %v4423_v22 = vpop.eup %4422 }
0x103e   :  { %v1550_v24 = vmul.f32 %v4423_v22, %v4922_v50 }
0x103f   :  { %3372 = vmatmul.msk.f32.vlgmr.msrb.gmra.mxu2 %vm190_vm8, %v1485_v21 }
0x104a   :  { %v1235_v29 = vpop.f32.mrf.mxu2 }
0x104d   :  { %v1552_v25 = vpop.permute.xlu1 %1551 }
0x104e   :  { %1572 = vmatpush.msrb.mxu3 %v1552_v25 }
0x104f   :  { %3375 = vmatmul.msk.f32.vlgmr.msrb.gmra.mxu3 %vm190_vm8, %v1550_v24 }
0x1052   :  { %v1379_v26 = vpop.f32.mrf.mxu2 }
0x108f   :  { %v4309_v34 = vpop.permute.xlu2 %4308 }
0x1090   :  { %v4311_v27 = vunpack.i.h.bf16 %v4309_v34  ;;  %v4310_v35 = vunpack.i.l.bf16 %v4309_v34 }
0x1092   :  { %v1315_v40 = vsel %vm190_vm8, %v4897_v3, %v4310_v35  ;;  %v1589_v41 = vsel %vm190_vm8, %v1379_v26, %v4311_v27 }
0x10c2   :  { %v1509_v28 = vpop.f32.mrf.mxu2 }
0x10c3   :  { %v4312_v30 = vpack.i.bf16 %v1509_v28, %v1235_v29  ;;  %v4334_v29 = vld [vmem:[%s6121_s26 + $0x1] ss:$0 sm:$0xff] }
0x10c5   :  { %4313 = vrot.lane.b32.xlu0 %v4312_v30, %s6135_s8  ;;  %s6139_s8 = sld [smem:[#allocation12_spill]] }
0x10d2   :  { %v1574_v31 = vpop.f32.mrf.mxu3 }
0x10d3   :  { %v4317_v32 = vpack.i.bf16 %v1574_v31, %v1300_v18  ;;  %v4335_v31 = vld [vmem:[%s6122_s28 + $0x1] ss:$0 sm:$0xff] }
0x10d5   :  { %4318 = vrot.lane.b32.xlu2 %v4317_v32, %s6136_s7 }
0x112f   :  { %v4319_v36 = vpop.permute.xlu2 %4318 }
0x1130   :  { %v4321_v42 = vunpack.i.h.bf16 %v4319_v36  ;;  %v4320_v43 = vunpack.i.l.bf16 %v4319_v36  ;;  %v4112_v36 = vld [vmem:[%s6057_s14 + $0x38] sm:$0xff] }
0x1131   :  { %1796 = vmatpush.bf16.msra.mxu1 %v4112_v36 }
0x1137   :  { %v4314_v50 = vpop.permute.xlu0 %4313 }
0x1138   :  { %v4316_v54 = vunpack.i.h.bf16 %v4314_v50  ;;  %v4315_v37 = vunpack.i.l.bf16 %v4314_v50  ;;  %v4111_v50 = vld [vmem:[%s6057_s14 + $0x30] sm:$0xff] }
0x1139   :  { %1797 = vmatpush.bf16.msra.mxu1 %v4111_v50 }
0x113a   :  { %v1590_v44 = vsel %vm460_vm9, %v1589_v41, %v4316_v54  ;;  %v1316_v45 = vsel %vm460_vm9, %v1315_v40, %v4315_v37  ;;  %v4110_v54 = vld [vmem:[%s6057_s14 + $0x28] sm:$0xff]  ;;  %v4109_v37 = vld [vmem:[%s6057_s14 + $0x20] sm:$0xff] }
0x113b   :  { %v1317_v46 = vsel %vm462_vm10, %v1316_v45, %v4320_v43  ;;  %v1591_v47 = vsel %vm462_vm10, %v1590_v44, %v4321_v42  ;;  %v4336_v40 = vld [vmem:[%s6054_s13 + $0x1] ss:$0 sm:$0xff] }
0x113c   :  { %v1597_v48 = vpack.c.bf16 %v1591_v47, %v1317_v46 }
0x113d   :  { %1798 = vmatpush.bf16.msra.mxu1 %v4110_v54 }
0x113e   :  { %3389 = vmatmul.msk.bf16.vlgmr.msrb.gmra.mxu0 %vm85_vm0, %v1597_v48 }
0x1141   :  { %1799 = vmatpush.bf16.msra.mxu1 %v4109_v37  ;;  %v3550_v37 = vld [vmem:[%s6060_s20 + $0xd0] sm:$0xf] }
0x11bb   :  { %v1627_v3 = vpop.f32.mrf.mxu0 }
0x11bc   :  { %v1628_v52 = vadd.f32 %v4333_v51, %v1627_v3 }
0x11be   :  { %v1632_v53 = vadd.f32 %v1628_v52, %v4827_v0 }
0x11c0   :  { %v1638_v55 = vsel %vm85_vm0, %v1632_v53, 0.0 }
0x11c1   :  { %1639 = vadd.xlane.f32.xlu0 %v1638_v55 }
0x11c3   :  { %v1629_v56 = vpop.f32.mrf.mxu0 }
0x11c4   :  { %v1630_v39 = vadd.f32 %v4333_v51, %v1629_v56 }
0x11c6   :  { %v1633_v57 = vadd.f32 %v1630_v39, %v4829_v23  ;;  %v4108_v23 = vld [vmem:[%s6055_s12 + $0x18] sm:$0xff] }
0x11c7   :  { %1724 = vmatpush.bf16.msra.mxu2 %v4108_v23 }
0x11c8   :  { %v1641_v58 = vsel %vm85_vm0, %v1633_v57, 0.0 }
0x11c9   :  { %1642 = vadd.xlane.f32.xlu2 %v1641_v58 }
0x11cb   :  { %1725 = vmatpush.bf16.msra.mxu2 %v4107_v11 }
0x1234   :  { %v1640_v59 = vpop.xlane.xlu0 %1639 }
0x1235   :  { %v1644_v60 = vmul.f32 %v1640_v59, %v4595_v10 }
0x1237   :  { %v1646_v61 = vsub.f32 %v1632_v53, %v1644_v60 }
0x1239   :  { %v1648_v62 = vmul.f32 %v1646_v61, %v1646_v61 }
0x123b   :  { %v1650_v2 = vsel %vm85_vm0, %v1648_v62, 0.0 }
0x123c   :  { %v1643_v1 = vpop.xlane.xlu2 %1642  ;;  %1651 = vadd.xlane.f32.xlu1 %v1650_v2 }
0x123d   :  { %v1645_v0 = vmul.f32 %v1643_v1, %v4595_v10 }
0x123f   :  { %v1647_v4 = vsub.f32 %v1633_v57, %v1645_v0  ;;  %v4337_v0 = vld [vmem:[%s6056_s15 + $0x1] ss:$0 sm:$0xff] }
0x1241   :  { %v1649_v38 = vmul.f32 %v1647_v4, %v1647_v4 }
0x1243   :  { %v1653_v5 = vsel %vm85_vm0, %v1649_v38, 0.0 }
0x1244   :  { %1654 = vadd.xlane.f32.xlu2 %v1653_v5 }
0x12af   :  { %v1652_v6 = vpop.xlane.xlu1 %1651 }
0x12b0   :  { %v1656_v7 = vmul.f32 %v1652_v6, %v4595_v10 }
0x12b2   :  { %v1658_v8 = vadd.f32 1e-12, %v1656_v7 }
0x12b4   :  { %4424 = vrsqrt.f32 %v1658_v8  ;;  %vm1666_vm10 = vweird.f32 %v1658_v8 }
0x12b7   :  { %v1655_v12 = vpop.xlane.xlu2 %1654 }
0x12b8   :  { %v1657_v13 = vmul.f32 %v1655_v12, %v4595_v10 }
0x12ba   :  { %v4425_v14 = vpop.eup %4424  ;;  %v1659_v15 = vadd.f32 1e-12, %v1657_v13 }
0x12bb   :  { %v1661_v16 = vmul.f32 %v4425_v14, %v1658_v8  ;;  %vm1667_vm8 = vweird.f32 %v4425_v14 }
0x12bc   :  { %4426 = vrsqrt.f32 %v1659_v15  ;;  %vm1668_vm12 = vmor %vm1666_vm10, %vm1667_vm8  ;;  %vm1676_vm14 = vweird.f32 %v1659_v15 }
0x12bd   :  { %v1662_v17 = vmul.f32 %v4425_v14, %v1661_v16 }
0x12bf   :  { %v1663_v18 = vmul.f32 0.5, %v1662_v17 }
0x12c1   :  { %v1664_v63 = vsub.f32 1.5, %v1663_v18 }
0x12c2   :  { %v4427_v19 = vpop.eup %4426 }
0x12c3   :  { %v1665_v20 = vmul.f32 %v4425_v14, %v1664_v63  ;;  %v1671_v9 = vmul.f32 %v4427_v19, %v1659_v15  ;;  %vm1677_vm13 = vweird.f32 %v4427_v19 }
0x12c4   :  { %vm1678_vm15 = vmor %vm1676_vm14, %vm1677_vm13 }
0x12c5   :  { %v1672_v21 = vmul.f32 %v4427_v19, %v1671_v9  ;;  %v1669_v22 = vsel %vm1668_vm12, %v4425_v14, %v1665_v20 }
0x12c6   :  { %v1680_v26 = vmul.f32 %v1669_v22, %v1646_v61 }
0x12c7   :  { %v1673_v24 = vmul.f32 0.5, %v1672_v21 }
0x12c8   :  { %v1685_v32 = vmul.f32 %v4334_v29, %v1680_v26  ;;  %v3502_v26 = vld [vmem:[%s6060_s20 + $0x70] sm:$0xf] }
0x12c9   :  { %v1674_v25 = vsub.f32 1.5, %v1673_v24 }
0x12ca   :  { %v1690_v34 = vadd.f32 %v4335_v31, %v1685_v32  ;;  %v3558_v32 = vld [vmem:[%s6060_s20 + $0xe0] sm:$0xf] }
0x12cb   :  { %v1675_v28 = vmul.f32 %v4427_v19, %v1674_v25  ;;  %v3566_v25 = vld [vmem:[%s6060_s20 + $0xf0] sm:$0xf] }
0x12cd   :  { %v1679_v30 = vsel %vm1678_vm15, %v4427_v19, %v1675_v28 }
0x12ce   :  { %v1681_v33 = vmul.f32 %v1679_v30, %v1647_v4 }
0x12d0   :  { %v1686_v49 = vmul.f32 %v4334_v29, %v1681_v33  ;;  %v4146_v29 = vld [vmem:[%s6060_s20 + $0xf4] sm:$0xf0]  ;;  %v4144_v33 = vld [vmem:[%s6060_s20 + $0xe4] sm:$0xf0] }
0x12d1   :  { %v3567_v30 = vor.u32 %v4146_v29, %v3566_v25  ;;  %v3559_v36 = vor.u32 %v4144_v33, %v3558_v32  ;;  %v3518_v25 = vld [vmem:[%s6060_s20 + $0x90] sm:$0xf]  ;;  %v4154_v32 = vld [vmem:[%s6060_s20 + $0x134] sm:$0xf0] }
0x12d2   :  { %v1691_v27 = vadd.f32 %v4335_v31, %v1686_v49  ;;  %v4130_v31 = vld [vmem:[%s6060_s20 + $0x74] sm:$0xf0] }
0x12d3   :  { %v3503_v49 = vor.u32 %v4130_v31, %v3502_v26  ;;  %2848 = vmatpush.bf16.msrb.mxu2 %v3567_v30  ;;  %v4134_v30 = vld [vmem:[%s6060_s20 + $0x94] sm:$0xf0]  ;;  %v3598_v31 = vld [vmem:[%s6060_s20 + $0x130] sm:$0xf] }
0x12d4   :  { %v1697_v35 = vpack.c.bf16 %v1691_v27, %v1690_v34 }
0x12d5   :  { %2835 = vmatpush.bf16.msra.mxu0 %v3503_v49  ;;  %v3454_v49 = vld [vmem:[%s6060_s20 + $0x10] sm:$0xf] }
0x12d6   :  { %3405 = vmatmul.msk.bf16.vlgmr.msra.gmra.mxu2 %vm85_vm0, %v1697_v35 }
0x12d7   :  { %2849 = vmatpush.bf16.msrb.mxu2 %v3559_v36  ;;  %v3599_v36 = vor.u32 %v4154_v32, %v3598_v31  ;;  %v4188_v31 = vld [vmem:[%s6060_s20 + $0x244] sm:$0xf0] }
0x1359   :  { %v1727_v41 = vpop.f32.mrf.mxu2 }
0x135a   :  { %v1728_v42 = vadd.f32 %v4336_v40, %v1727_v41  ;;  %v3486_v41 = vld [vmem:[%s6060_s20 + $0x50] sm:$0xf] }
0x135c   :  { %v1734_v43 = vmul.f32 0.044715, %v1728_v42  ;;  %v1732_v59 = vmul.f32 0.5, %v1728_v42 }
0x135e   :  { %v1736_v44 = vmul.f32 %v1734_v43, %v1728_v42 }
0x1360   :  { %v1738_v45 = vmul.f32 %v1736_v44, %v1728_v42 }
0x1361   :  { %v1729_v46 = vpop.f32.mrf.mxu2 }
0x1362   :  { %v1740_v47 = vadd.f32 %v1738_v45, %v1728_v42  ;;  %v1730_v48 = vadd.f32 %v4336_v40, %v1729_v46  ;;  %v4142_v40 = vld [vmem:[%s6060_s20 + $0xd4] sm:$0xf0]  ;;  %v3542_v45 = vld [vmem:[%s6060_s20 + $0xc0] sm:$0xf]  ;;  %v4140_v46 = vld [vmem:[%s6060_s20 + $0xc4] sm:$0xf0] }
0x1363   :  { %v4126_v42 = vld [vmem:[%s6060_s20 + $0x54] sm:$0xf0]  ;;  %v3551_v44 = vor.u32 %v4142_v40, %v3550_v37  ;;  %v4339_v40 = vld [vmem:[%s6059_s17 + $0x1] ss:$0 sm:$0xff] }
0x1364   :  { %v1735_v51 = vmul.f32 0.044715, %v1730_v48  ;;  %v1742_v3 = vmul.f32 0.7978846, %v1740_v47  ;;  %v1733_v60 = vmul.f32 0.5, %v1730_v48 }
0x1365   :  { %2850 = vmatpush.bf16.msrb.mxu2 %v3551_v44  ;;  %v4116_v44 = vld [vmem:[%s6060_s20 + $0x4] sm:$0xf0] }
0x1366   :  { %v1737_v52 = vmul.f32 %v1735_v51, %v1730_v48  ;;  %4428 = vtanh.f32 %v1742_v3  ;;  %v3630_v51 = vld [vmem:[%s6060_s20 + $0x170] sm:$0xf]  ;;  %v4162_v3 = vld [vmem:[%s6060_s20 + $0x174] sm:$0xf0] }
0x1368   :  { %v1739_v53 = vmul.f32 %v1737_v52, %v1730_v48  ;;  %v3478_v52 = vld [vmem:[%s6060_s20 + $0x40] sm:$0xf] }
0x136a   :  { %v1741_v55 = vadd.f32 %v1739_v53, %v1730_v48  ;;  %v3487_v48 = vor.u32 %v4126_v42, %v3486_v41  ;;  %v4124_v53 = vld [vmem:[%s6060_s20 + $0x44] sm:$0xf0]  ;;  %v3822_v41 = vld [vmem:[%s6060_s20 + $0x2f0] sm:$0xf]  ;;  %v4210_v42 = vld [vmem:[%s6060_s20 + $0x2f4] sm:$0xf0] }
0x136c   :  { %v1743_v56 = vmul.f32 0.7978846, %v1741_v55  ;;  %v4429_v39 = vpop.eup %4428  ;;  %v3631_v55 = vor.u32 %v4162_v3, %v3630_v51  ;;  %v3590_v51 = vld [vmem:[%s6060_s20 + $0x120] sm:$0xf]  ;;  %v4152_v3 = vld [vmem:[%s6060_s20 + $0x124] sm:$0xf0] }
0x136d   :  { %v1746_v57 = vadd.f32 1.0, %v4429_v39  ;;  %v3622_v39 = vld [vmem:[%s6060_s20 + $0x160] sm:$0xf] }
0x136e   :  { %4430 = vtanh.f32 %v1743_v56  ;;  %2861 = vmatpush.bf16.msrb.mxu1 %v3631_v55 }
0x136f   :  { %v1748_v62 = vmul.f32 %v1746_v57, %v1732_v59  ;;  %v4160_v59 = vld [vmem:[%s6060_s20 + $0x164] sm:$0xf0] }
0x1374   :  { %v4431_v58 = vpop.eup %4430 }
0x1375   :  { %v1747_v61 = vadd.f32 1.0, %v4431_v58  ;;  %v3543_v58 = vor.u32 %v4140_v46, %v3542_v45  ;;  %v3758_v45 = vld [vmem:[%s6060_s20 + $0x270] sm:$0xf] }
0x1377   :  { %v1749_v2 = vmul.f32 %v1747_v61, %v1733_v60  ;;  %v3479_v61 = vor.u32 %v4124_v53, %v3478_v52  ;;  %2851 = vmatpush.bf16.msrb.mxu2 %v3543_v58  ;;  %v1866_v52 = vld [vmem:[%s6061_s3] sm:$0x3]  ;;  %v3823_v53 = vor.u32 %v4210_v42, %v3822_v41  ;;  %v4208_v58 = vld [vmem:[%s6060_s20 + $0x2e4] sm:$0xf0] }
0x1379   :  { %v1759_v1 = vpack.c.bf16 %v1749_v2, %v1748_v62  ;;  %v3534_v62 = vld [vmem:[%s6060_s20 + $0xb0] sm:$0xf]  ;;  %v4138_v2 = vld [vmem:[%s6060_s20 + $0xb4] sm:$0xf0] }
0x137b   :  { %3431 = vmatmul.msk.bf16.vlgmr.msra.gmra.mxu1 %vm928_vm2, %v1759_v1  ;;  %v3623_v1 = vor.u32 %v4160_v59, %v3622_v39  ;;  %v3694_v59 = vld [vmem:[%s6060_s20 + $0x1f0] sm:$0xf] }
0x137d   :  { %2862 = vmatpush.bf16.msrb.mxu1 %v3623_v1  ;;  %v4192_v1 = vld [vmem:[%s6060_s20 + $0x264] sm:$0xf0] }
0x13f8   :  { %v1801_v4 = vpop.f32.mrf.mxu1 }
0x13f9   :  { %v1802_v38 = vadd.f32 %v4337_v0, %v1801_v4  ;;  %v3470_v4 = vld [vmem:[%s6060_s20 + $0x30] sm:$0xf] }
0x13fb   :  { %v1806_v5 = vadd.f32 %v1802_v38, %v1690_v34  ;;  %v3494_v34 = vld [vmem:[%s6060_s20 + $0x60] sm:$0xf]  ;;  %v4122_v38 = vld [vmem:[%s6060_s20 + $0x34] sm:$0xf0] }
0x13fd   :  { %v1812_v23 = vsel %vm85_vm0, %v1806_v5, 0.0 }
0x13fe   :  { %1813 = vadd.xlane.f32.xlu2 %v1812_v23 }
0x1400   :  { %v1803_v6 = vpop.f32.mrf.mxu1 }
0x1401   :  { %v1804_v7 = vadd.f32 %v4337_v0, %v1803_v6  ;;  %v3614_v0 = vld [vmem:[%s6060_s20 + $0x150] sm:$0xf] }
0x1403   :  { %v1807_v8 = vadd.f32 %v1804_v7, %v1691_v27  ;;  %v3535_v7 = vor.u32 %v4138_v2, %v3534_v62  ;;  %v4178_v62 = vld [vmem:[%s6060_s20 + $0x1f4] sm:$0xf0]  ;;  %v3750_v2 = vld [vmem:[%s6060_s20 + $0x260] sm:$0xf] }
0x1405   :  { %v1815_v11 = vsel %vm85_vm0, %v1807_v8, 0.0  ;;  %2852 = vmatpush.bf16.msrb.mxu2 %v3535_v7  ;;  %v3695_v7 = vor.u32 %v4178_v62, %v3694_v59  ;;  %v4168_v62 = vld [vmem:[%s6060_s20 + $0x1a4] sm:$0xf0] }
0x1406   :  { %1816 = vadd.xlane.f32.xlu0 %v1815_v11  ;;  %v4136_v11 = vld [vmem:[%s6060_s20 + $0xa4] sm:$0xf0] }
0x1471   :  { %v1814_v12 = vpop.xlane.xlu2 %1813 }
0x1472   :  { %v1818_v13 = vmul.f32 %v1814_v12, %v4595_v10 }
0x1474   :  { %v5006_v14 = vsub.f32 %v1806_v5, %v1818_v13  ;;  %v4158_v5 = vld [vmem:[%s6060_s20 + $0x154] sm:$0xf0] }
0x1475   :  { %v3615_v12 = vor.u32 %v4158_v5, %v3614_v0  ;;  %v4113_v5 = vld [vmem:[%s6062_s18] sm:$0xff] }
0x1476   :  { %v1822_v15 = vmul.f32 %v5006_v14, %v5006_v14 }
0x1477   :  { %2863 = vmatpush.bf16.msrb.mxu1 %v3615_v12  ;;  %v3751_v12 = vor.u32 %v4192_v1, %v3750_v2  ;;  %v3710_v2 = vld [vmem:[%s6060_s20 + $0x210] sm:$0xf]  ;;  %v4182_v1 = vld [vmem:[%s6060_s20 + $0x214] sm:$0xf0] }
0x1478   :  { %v1824_v16 = vsel %vm85_vm0, %v1822_v15, 0.0  ;;  %v3471_v15 = vor.u32 %v4122_v38, %v3470_v4  ;;  %v3582_v4 = vld [vmem:[%s6060_s20 + $0x110] sm:$0xf]  ;;  %v4150_v38 = vld [vmem:[%s6060_s20 + $0x114] sm:$0xf0] }
0x1479   :  { %v1817_v17 = vpop.xlane.xlu0 %1816  ;;  %1825 = vadd.xlane.f32.xlu1 %v1824_v16  ;;  %v3606_v16 = vld [vmem:[%s6060_s20 + $0x140] sm:$0xf] }
0x147a   :  { %v1819_v18 = vmul.f32 %v1817_v17, %v4595_v10  ;;  %v4156_v17 = vld [vmem:[%s6060_s20 + $0x144] sm:$0xf0] }
0x147b   :  { %v3607_v29 = vor.u32 %v4156_v17, %v3606_v16  ;;  %v4190_v16 = vld [vmem:[%s6060_s20 + $0x254] sm:$0xf0]  ;;  %v3583_v17 = vor.u32 %v4150_v38, %v3582_v4  ;;  %v3766_v4 = vld [vmem:[%s6060_s20 + $0x280] sm:$0xf]  ;;  %v4196_v38 = vld [vmem:[%s6060_s20 + $0x284] sm:$0xf0] }
0x147c   :  { %v5012_v63 = vsub.f32 %v1807_v8, %v1819_v18  ;;  %v3526_v8 = vld [vmem:[%s6060_s20 + $0xa0] sm:$0xf] }
0x147d   :  { %2864 = vmatpush.bf16.msrb.mxu1 %v3607_v29  ;;  %v3678_v29 = vld [vmem:[%s6060_s20 + $0x1d0] sm:$0xf] }
0x147e   :  { %v1823_v19 = vmul.f32 %v5012_v63, %v5012_v63 }
0x1480   :  { %v1827_v20 = vsel %vm85_vm0, %v1823_v19, 0.0  ;;  %v3462_v19 = vld [vmem:[%s6060_s20 + $0x20] sm:$0xf] }
0x1481   :  { %1828 = vadd.xlane.f32.xlu0 %v1827_v20  ;;  %v4120_v20 = vld [vmem:[%s6060_s20 + $0x24] sm:$0xf0]  ;;  %2865 = vmatpush.bf16.msrb.mxu1 %v3599_v36 }
0x14ec   :  { %v1826_v9 = vpop.xlane.xlu1 %1825 }
0x14ed   :  { %v1830_v21 = vmul.f32 %v1826_v9, %v4595_v10 }
0x14ef   :  { %v5018_v22 = vadd.f32 1e-12, %v1830_v21 }
0x14f1   :  { %4432 = vrsqrt.f32 %v5018_v22  ;;  %vm1840_vm2 = vweird.f32 %v5018_v22 }
0x14f4   :  { %v1829_v24 = vpop.xlane.xlu0 %1828 }
0x14f5   :  { %v1831_v28 = vmul.f32 %v1829_v24, %v4595_v10  ;;  %v4128_v10 = vld [vmem:[%s6060_s20 + $0x64] sm:$0xf0]  ;;  %v3527_v24 = vor.u32 %v4136_v11, %v3526_v8  ;;  %v3686_v8 = vld [vmem:[%s6060_s20 + $0x1e0] sm:$0xf] }
0x14f6   :  { %v3495_v54 = vor.u32 %v4128_v10, %v3494_v34  ;;  %v4118_v34 = vld [vmem:[%s6060_s20 + $0x14] sm:$0xf0]  ;;  %v4176_v11 = vld [vmem:[%s6060_s20 + $0x1e4] sm:$0xf0] }
0x14f7   :  { %v5046_v27 = vpop.eup %4432  ;;  %v5048_v35 = vadd.f32 1e-12, %v1831_v28  ;;  %v3463_v28 = vor.u32 %v4120_v20, %v3462_v19  ;;  %2853 = vmatpush.bf16.msrb.mxu2 %v3527_v24  ;;  %v3798_v19 = vld [vmem:[%s6060_s20 + $0x2c0] sm:$0xf]  ;;  %v4226_v24 = vld [vmem:[%s6060_s20 + $0x374] sm:$0xf0] }
0x14f8   :  { %v1835_v50 = vmul.f32 %v5046_v27, %v5018_v22  ;;  %2836 = vmatpush.bf16.msra.mxu0 %v3495_v54  ;;  %vm1841_vm1 = vweird.f32 %v5046_v27  ;;  %v4338_v22 = vld [vmem:[%s6058_s16 + $0x1] ss:$0 sm:$0xff]  ;;  %v4132_v54 = vld [vmem:[%s6060_s20 + $0x84] sm:$0xf0] }
0x14f9   :  { %4434 = vrsqrt.f32 %v5048_v35  ;;  %vm5124_vm3 = vmor %vm1840_vm2, %vm1841_vm1  ;;  %vm1850_vm5 = vweird.f32 %v5048_v35  ;;  %v3574_v20 = vld [vmem:[%s6060_s20 + $0x100] sm:$0xf] }
0x14fa   :  { %v1836_v43 = vmul.f32 %v5046_v27, %v1835_v50  ;;  %v3455_v50 = vor.u32 %v4118_v34, %v3454_v49  ;;  %v3790_v49 = vld [vmem:[%s6060_s20 + $0x2b0] sm:$0xf] }
0x14fc   :  { %v1837_v47 = vmul.f32 0.5, %v1836_v43  ;;  %2837 = vmatpush.bf16.msra.mxu0 %v3487_v48  ;;  %v3446_v43 = vld [vmem:[%s6060_s20] sm:$0xf]  ;;  %v4194_v48 = vld [vmem:[%s6060_s20 + $0x274] sm:$0xf0] }
0x14fd   :  { %v3447_v39 = vor.u32 %v4116_v44, %v3446_v43  ;;  %v3782_v43 = vld [vmem:[%s6060_s20 + $0x2a0] sm:$0xf] }
0x14fe   :  { %v1838_v56 = vsub.f32 1.5, %v1837_v47 }
0x14ff   :  { %v4435_v57 = vpop.eup %4434 }
0x1500   :  { %v1845_v60 = vmul.f32 %v4435_v57, %v5048_v35  ;;  %v1839_v23 = vmul.f32 %v5046_v27, %v1838_v56  ;;  %2838 = vmatpush.bf16.msra.mxu0 %v3479_v61  ;;  %vm1851_vm4 = vweird.f32 %v4435_v57  ;;  %v3519_v35 = vor.u32 %v4134_v30, %v3518_v25  ;;  %v4114_v56 = vld [vmem:[%s6062_s18 + $0x8] sm:$0xff]  ;;  %v3734_v30 = vld [vmem:[%s6060_s20 + $0x240] sm:$0xf] }
0x1501   :  { %vm1852_vm6 = vmor %vm1850_vm5, %vm1851_vm4  ;;  %v3591_v61 = vor.u32 %v4152_v3, %v3590_v51  ;;  %v3687_v25 = vor.u32 %v4176_v11, %v3686_v8  ;;  %v3662_v51 = vld [vmem:[%s6060_s20 + $0x1b0] sm:$0xf]  ;;  %v4166_v11 = vld [vmem:[%s6060_s20 + $0x194] sm:$0xf0] }
0x1502   :  { %v1846_v6 = vmul.f32 %v4435_v57, %v1845_v60  ;;  %v1843_v9 = vsel %vm5124_vm3, %v5046_v27, %v1839_v23  ;;  %2854 = vmatpush.bf16.msrb.mxu2 %v3519_v35  ;;  %v3759_v60 = vor.u32 %v4194_v48, %v3758_v45  ;;  %v3806_v23 = vld [vmem:[%s6060_s20 + $0x2d0] sm:$0xf]  ;;  %v4224_v35 = vld [vmem:[%s6060_s20 + $0x364] sm:$0xf0] }
0x1503   :  { %v1854_v33 = vmul.f32 %v1843_v9, %v5006_v14  ;;  %v3510_v14 = vld [vmem:[%s6060_s20 + $0x80] sm:$0xf]  ;;  %2866 = vmatpush.bf16.msrb.mxu1 %v3591_v61  ;;  %v4148_v9 = vld [vmem:[%s6060_s20 + $0x104] sm:$0xf0]  ;;  %v3646_v8 = vld [vmem:[%s6060_s20 + $0x190] sm:$0xf] }
0x1504   :  { %v1847_v13 = vmul.f32 0.5, %v1846_v6  ;;  %2839 = vmatpush.bf16.msra.mxu0 %v3471_v15  ;;  %v3511_v47 = vor.u32 %v4132_v54, %v3510_v14  ;;  %v4206_v6 = vld [vmem:[%s6060_s20 + $0x2d4] sm:$0xf0]  ;;  %v3742_v15 = vld [vmem:[%s6060_s20 + $0x250] sm:$0xf]  ;;  %v3575_v32 = vor.u32 %v4148_v9, %v3574_v20  ;;  %v3735_v14 = vor.u32 %v4188_v31, %v3734_v30 }
0x1505   :  { %v3807_v18 = vor.u32 %v4206_v6, %v3806_v23  ;;  %v4200_v45 = vld [vmem:[%s6060_s20 + $0x2a4] sm:$0xf0]  ;;  %v3711_v23 = vor.u32 %v4182_v1, %v3710_v2  ;;  %v4129_v6 = vld [vmem:[%s6060_s20 + $0x74] sm:$0xf]  ;;  %v4127_v31 = vld [vmem:[%s6060_s20 + $0x64] sm:$0xf] }
0x1506   :  { %v1848_v21 = vsub.f32 1.5, %v1847_v13  ;;  %2855 = vmatpush.bf16.msrb.mxu2 %v3511_v47  ;;  %v1928_v13 = vld [vmem:[%s6063_s2] sm:$0xff]  ;;  %v4222_v47 = vld [vmem:[%s6060_s20 + $0x354] sm:$0xf0]  ;;  %v4180_v20 = vld [vmem:[%s6060_s20 + $0x204] sm:$0xf0] }
0x1507   :  { %2078 = vst [vmem:[#allocation1] ss:$4 sm:$0xff] %v1928_v13  ;;  %2867 = vmatpush.bf16.msrb.mxu1 %v3583_v17  ;;  %v4164_v17 = vld [vmem:[%s6060_s20 + $0x184] sm:$0xf0]  ;;  %v3830_v2 = vld [vmem:[%s6060_s20 + $0x300] sm:$0xf] }
0x1508   :  { %v1849_v26 = vmul.f32 %v4435_v57, %v1848_v21  ;;  %2840 = vmatpush.bf16.msra.mxu0 %v3463_v28  ;;  %v4204_v21 = vld [vmem:[%s6060_s20 + $0x2c4] sm:$0xf0]  ;;  %v4174_v28 = vld [vmem:[%s6060_s20 + $0x1d4] sm:$0xf0] }
0x1509   :  { %v3679_v36 = vor.u32 %v4174_v28, %v3678_v29  ;;  %v4258_v28 = vld [vmem:[%s6060_s20 + $0x474] sm:$0xf0]  ;;  %v4212_v1 = vld [vmem:[%s6060_s20 + $0x304] sm:$0xf0] }
0x150a   :  { %v1853_v10 = vsel %vm1852_vm6, %v4435_v57, %v1849_v26  ;;  %v3814_v57 = vld [vmem:[%s6060_s20 + $0x2e0] sm:$0xf]  ;;  %2900 = vmatpush.bf16.msra.mxu2 %v3823_v53  ;;  %v3743_v26 = vor.u32 %v4190_v16, %v3742_v15  ;;  %v3647_v15 = vor.u32 %v4166_v11, %v3646_v8  ;;  %v4145_v8 = vld [vmem:[%s6060_s20 + $0xf4] sm:$0xf]  ;;  %v3568_v11 = vld [vmem:[%s6060_s20 + $0xf8] sm:$0xf0] }
0x150b   :  { %v1855_v27 = vmul.f32 %v1853_v10, %v5012_v63  ;;  %v1859_v63 = vmul.f32 %v4338_v22, %v1854_v33  ;;  %v3815_v0 = vor.u32 %v4208_v58, %v3814_v57  ;;  %v3799_v33 = vor.u32 %v4204_v21, %v3798_v19  ;;  %v4202_v10 = vld [vmem:[%s6060_s20 + $0x2b4] sm:$0xf0]  ;;  %2868 = vmatpush.bf16.msrb.mxu1 %v3575_v32  ;;  %v3718_v53 = vld [vmem:[%s6060_s20 + $0x220] sm:$0xf]  ;;  %v3774_v57 = vld [vmem:[%s6060_s20 + $0x290] sm:$0xf] }
0x150c   :  { %2841 = vmatpush.bf16.msra.mxu0 %v3455_v50  ;;  %v3670_v50 = vld [vmem:[%s6060_s20 + $0x1c0] sm:$0xf]  ;;  %v3791_v42 = vor.u32 %v4202_v10, %v3790_v49  ;;  %v4198_v58 = vld [vmem:[%s6060_s20 + $0x294] sm:$0xf0]  ;;  %v3496_v32 = vld [vmem:[%s6060_s20 + $0x68] sm:$0xf0] }
0x150d   :  { %v1860_v37 = vmul.f32 %v4338_v22, %v1855_v27  ;;  %v1864_v55 = vadd.f32 %v4339_v40, %v1859_v63  ;;  %v3886_v22 = vld [vmem:[%s6060_s20 + $0x370] sm:$0xf]  ;;  %v3878_v27 = vld [vmem:[%s6060_s20 + $0x360] sm:$0xf]  ;;  %v4186_v63 = vld [vmem:[%s6060_s20 + $0x234] sm:$0xf0]  ;;  %v3499_v49 = vor.u32 %v4127_v31, %v3496_v32 }
0x150e   :  { %2901 = vmatpush.bf16.msra.mxu2 %v3815_v0  ;;  %v3887_v34 = vor.u32 %v4226_v24, %v3886_v22  ;;  %v2082_v54 = vld.sshfl [vmem:[#allocation1 + $0x8] sm:$0xff pattern:$0x73625140]  ;;  %v3879_v44 = vor.u32 %v4224_v35, %v3878_v27  ;;  %v3775_v0 = vor.u32 %v4198_v58, %v3774_v57  ;;  %v3638_v16 = vld [vmem:[%s6060_s20 + $0x180] sm:$0xf] }
0x150f   :  { %v1865_v46 = vadd.f32 %v4339_v40, %v1860_v37  ;;  %v4172_v37 = vld [vmem:[%s6060_s20 + $0x1c4] sm:$0xf0]  ;;  %v3726_v40 = vld [vmem:[%s6060_s20 + $0x230] sm:$0xf]  ;;  %v5303_v41 = vpack.c.bf16 %v2082_v54, %v2082_v54  ;;  %v3639_v19 = vor.u32 %v4164_v17, %v3638_v16  ;;  %v3862_v24 = vld [vmem:[%s6060_s20 + $0x340] sm:$0xf] }
0x1510   :  { %2842 = vmatpush.bf16.msra.mxu0 %v3447_v39  ;;  %2913 = vmatpush.bf16.msra.mxu1 %v3887_v34  ;;  %v3671_v48 = vor.u32 %v4172_v37, %v3670_v50  ;;  %v3727_v3 = vor.u32 %v4186_v63, %v3726_v40  ;;  %v2081_v9 = vld.sshfl [vmem:[#allocation1] sm:$0xff pattern:$0x73625140]  ;;  %v4218_v34 = vld [vmem:[%s6060_s20 + $0x334] sm:$0xf0] }
0x1511   :  { %1884 = vmatpush.msra.mxu3 %v1865_v46  ;;  %2856 = vmatmul.bf16.vlgmr.msrb.gmra.mxu2 %v5303_v41  ;;  %v3870_v46 = vld [vmem:[%s6060_s20 + $0x350] sm:$0xf]  ;;  %v5378_v22 = vpack.c.bf16 %v2081_v9, %v2081_v9  ;;  %v4006_v27 = vld [vmem:[%s6060_s20 + $0x460] sm:$0xf]  ;;  %v4256_v35 = vld [vmem:[%s6060_s20 + $0x464] sm:$0xf0] }
0x1512   :  { %2902 = vmatpush.bf16.msra.mxu2 %v3807_v18  ;;  %v3871_v39 = vor.u32 %v4222_v47, %v3870_v46  ;;  %v3702_v18 = vld [vmem:[%s6060_s20 + $0x200] sm:$0xf]  ;;  %v4007_v50 = vor.u32 %v4256_v35, %v4006_v27  ;;  %v4216_v40 = vld [vmem:[%s6060_s20 + $0x324] sm:$0xf0]  ;;  %v3480_v46 = vld [vmem:[%s6060_s20 + $0x48] sm:$0xf0] }
0x1513   :  { %1885 = vmatpush.msra.mxu3 %v1864_v55  ;;  %v4184_v55 = vld [vmem:[%s6060_s20 + $0x224] sm:$0xf0]  ;;  %v3703_v21 = vor.u32 %v4180_v20, %v3702_v18  ;;  %2843 = vmatmul.bf16.vlgmr.msra.gmra.mxu0 %v5378_v22  ;;  %v3846_v37 = vld [vmem:[%s6060_s20 + $0x320] sm:$0xf]  ;;  %v3472_v58 = vld [vmem:[%s6060_s20 + $0x38] sm:$0xf0] }
0x1514   :  { %3434 = vmatmul.msk.f32.vlgmr.msra.gmra.mxu3 %vm460_vm9, %v1866_v52  ;;  %2887 = vmatpush.bf16.msrb.mxu0 %v3759_v60  ;;  %v4170_v52 = vld [vmem:[%s6060_s20 + $0x1b4] sm:$0xf0]  ;;  %v3654_v60 = vld [vmem:[%s6060_s20 + $0x1a0] sm:$0xf]  ;;  %v3719_v61 = vor.u32 %v4184_v55, %v3718_v53  ;;  %v3847_v63 = vor.u32 %v4216_v40, %v3846_v37  ;;  %v4117_v16 = vld [vmem:[%s6060_s20 + $0x14] sm:$0xf] }
0x1515   :  { %1920 = vmatpush.bf16.msrb.mxu3 %v4114_v56  ;;  %v3783_v56 = vor.u32 %v4200_v45, %v3782_v43  ;;  %2914 = vmatpush.bf16.msra.mxu1 %v3879_v44  ;;  %v3663_v59 = vor.u32 %v4170_v52, %v3662_v51  ;;  %v4254_v43 = vld [vmem:[%s6060_s20 + $0x454] sm:$0xf0]  ;;  %v4123_v45 = vld [vmem:[%s6060_s20 + $0x44] sm:$0xf]  ;;  %v3838_v51 = vld [vmem:[%s6060_s20 + $0x310] sm:$0xf] }
0x1516   :  { %2903 = vmatpush.bf16.msra.mxu2 %v3799_v33  ;;  %v3854_v33 = vld [vmem:[%s6060_s20 + $0x330] sm:$0xf]  ;;  %v3483_v47 = vor.u32 %v4123_v45, %v3480_v46  ;;  %v4214_v52 = vld [vmem:[%s6060_s20 + $0x314] sm:$0xf0]  ;;  %v3990_v55 = vld [vmem:[%s6060_s20 + $0x440] sm:$0xf] }
0x1517   :  { %v3855_v10 = vor.u32 %v4218_v34, %v3854_v33  ;;  %v3839_v53 = vor.u32 %v4214_v52, %v3838_v51  ;;  %v3456_v17 = vld [vmem:[%s6060_s20 + $0x18] sm:$0xf0]  ;;  %v4143_v20 = vld [vmem:[%s6060_s20 + $0xe4] sm:$0xf]  ;;  %v3560_v9 = vld [vmem:[%s6060_s20 + $0xe8] sm:$0xf0] }
0x1518   :  { %2888 = vmatpush.bf16.msrb.mxu0 %v3751_v12  ;;  %v3767_v12 = vor.u32 %v4196_v38, %v3766_v4  ;;  %v3982_v4 = vld [vmem:[%s6060_s20 + $0x430] sm:$0xf]  ;;  %v4250_v38 = vld [vmem:[%s6060_s20 + $0x434] sm:$0xf0]  ;;  %v3544_v45 = vld [vmem:[%s6060_s20 + $0xc8] sm:$0xf0] }
0x1519   :  { %1921 = vmatpush.bf16.msrb.mxu3 %v4113_v5  ;;  %2915 = vmatpush.bf16.msra.mxu1 %v3871_v39  ;;  %v3655_v5 = vor.u32 %v4168_v62, %v3654_v60  ;;  %v4121_v39 = vld [vmem:[%s6060_s20 + $0x34] sm:$0xf]  ;;  %v1930_v60 = vld [vmem:[%s6063_s2 + $0x10] sm:$0x3]  ;;  %v1929_v62 = vld [vmem:[%s6063_s2 + $0x8] sm:$0xff] }
0x151a   :  { %2904 = vmatpush.bf16.msra.mxu2 %v3791_v42  ;;  %v3998_v42 = vld [vmem:[%s6060_s20 + $0x450] sm:$0xf]  ;;  %2080 = vst [vmem:[#allocation1 + $0x20] ss:$4 sm:$0xff] %v1929_v62  ;;  %v4177_v51 = vld [vmem:[%s6060_s20 + $0x1f4] sm:$0xf] }
0x151b   :  { %v3999_v44 = vor.u32 %v4254_v43, %v3998_v42  ;;  %v3950_v34 = vld [vmem:[%s6060_s20 + $0x3f0] sm:$0xf]  ;;  %v4244_v42 = vld [vmem:[%s6060_s20 + $0x404] sm:$0xf0]  ;;  %v4139_v43 = vld [vmem:[%s6060_s20 + $0xc4] sm:$0xf] }
0x151c   :  { %2889 = vmatpush.bf16.msrb.mxu0 %v3743_v26  ;;  %v4014_v26 = vld [vmem:[%s6060_s20 + $0x470] sm:$0xf]  ;;  %v3696_v52 = vld [vmem:[%s6060_s20 + $0x1f8] sm:$0xf0] }
0x151d   :  { %2874 = vmatpush.bf16.msra.mxu3 %v3695_v7  ;;  %v3504_v7 = vld [vmem:[%s6060_s20 + $0x78] sm:$0xf0]  ;;  %v4015_v30 = vor.u32 %v4258_v28, %v4014_v26  ;;  %v3448_v26 = vld [vmem:[%s6060_s20 + $0x8] sm:$0xf0]  ;;  %v4141_v28 = vld [vmem:[%s6060_s20 + $0xd4] sm:$0xf] }
0x151e   :  { %2905 = vmatpush.bf16.msra.mxu2 %v3783_v56  ;;  %v3507_v13 = vor.u32 %v4129_v6, %v3504_v7  ;;  %v4252_v56 = vld [vmem:[%s6060_s20 + $0x444] sm:$0xf0]  ;;  %v3983_v6 = vor.u32 %v4250_v38, %v3982_v4  ;;  %v3536_v62 = vld [vmem:[%s6060_s20 + $0xb8] sm:$0xf0]  ;;  %v3934_v4 = vld [vmem:[%s6060_s20 + $0x3d0] sm:$0xf] }
0x151f   :  { %v3991_v57 = vor.u32 %v4252_v56, %v3990_v55  ;;  %v3942_v56 = vld [vmem:[%s6060_s20 + $0x3e0] sm:$0xf] }
0x1520   :  { %2890 = vmatpush.bf16.msrb.mxu0 %v3735_v14  ;;  %v3488_v14 = vld [vmem:[%s6060_s20 + $0x58] sm:$0xf0] }
0x1521   :  { %2875 = vmatpush.bf16.msra.mxu3 %v3687_v25  ;;  %v4220_v25 = vld [vmem:[%s6060_s20 + $0x344] sm:$0xf0]  ;;  %v2085_v32 = vld.sshfl [vmem:[#allocation1 + $0x20] sm:$0xff pattern:$0x73625140] }
0x1522   :  { %2906 = vmatpush.bf16.msra.mxu2 %v3775_v0  ;;  %v3863_v29 = vor.u32 %v4220_v25, %v3862_v24  ;;  %v3831_v0 = vor.u32 %v4212_v1, %v3830_v2  ;;  %v3966_v24 = vld [vmem:[%s6060_s20 + $0x410] sm:$0xf]  ;;  %v4246_v25 = vld [vmem:[%s6060_s20 + $0x414] sm:$0xf0]  ;;  %v5529_v27 = vpack.c.bf16 %v2085_v32, %v2085_v32  ;;  %v4175_v2 = vld [vmem:[%s6060_s20 + $0x1e4] sm:$0xf] }
0x1523   :  { %v2086_v31 = vld.sshfl [vmem:[#allocation1 + $0x28] sm:$0xff pattern:$0x73625140]  ;;  %v3967_v33 = vor.u32 %v4246_v25, %v3966_v24  ;;  %v2087_v37 = vld.sshfl [vmem:[#allocation1 + $0x30] sm:$0xff pattern:$0x73625140] }
0x1524   :  { %2891 = vmatpush.bf16.msrb.mxu0 %v3727_v3  ;;  %2916 = vmatpush.bf16.msra.mxu1 %v3863_v29  ;;  %v4115_v29 = vld [vmem:[%s6060_s20 + $0x4] sm:$0xf]  ;;  %v5542_v40 = vpack.c.bf16 %v2087_v37, %v2087_v37  ;;  %v3688_v1 = vld [vmem:[%s6060_s20 + $0x1e8] sm:$0xf0]  ;;  %v4185_v32 = vld [vmem:[%s6060_s20 + $0x234] sm:$0xf] }
0x1525   :  { %2876 = vmatpush.bf16.msra.mxu3 %v3679_v36  ;;  %v4125_v36 = vld [vmem:[%s6060_s20 + $0x54] sm:$0xf]  ;;  %v3512_v37 = vld [vmem:[%s6060_s20 + $0x88] sm:$0xf0] }
0x1526   :  { %2907 = vmatpush.bf16.msra.mxu2 %v3767_v12  ;;  %v3491_v54 = vor.u32 %v4125_v36, %v3488_v14  ;;  %v3571_v12 = vor.u32 %v4145_v8, %v3568_v11  ;;  %v4193_v36 = vld [vmem:[%s6060_s20 + $0x274] sm:$0xf]  ;;  %v4242_v14 = vld [vmem:[%s6060_s20 + $0x3f4] sm:$0xf0]  ;;  %v4135_v11 = vld [vmem:[%s6060_s20 + $0xa4] sm:$0xf] }
0x1528   :  { %2892 = vmatpush.bf16.msrb.mxu0 %v3719_v61  ;;  %2917 = vmatpush.bf16.msra.mxu1 %v3855_v10  ;;  %v5459_v61 = vld.sshfl [vmem:[#allocation1 + $0x18] sm:$0xff pattern:$0x73625140]  ;;  %v5527_v10 = vpack.c.bf16 %v2086_v31, %v2086_v31  ;;  %v3672_v31 = vld [vmem:[%s6060_s20 + $0x1c8] sm:$0xf0] }
0x1529   :  { %2877 = vmatpush.bf16.msra.mxu3 %v3671_v48  ;;  %v2083_v48 = vld.sshfl [vmem:[#allocation1 + $0x10] sm:$0xff pattern:$0x73625140] }
0x152a   :  { %2952 = vmatpush.bf16.msrb.mxu2 %v3507_v13  ;;  %v5438_v3 = vpack.c.bf16 %v2083_v48, %v2083_v48  ;;  %2089 = vst [vmem:[#allocation1] ss:$4 sm:$0xff] %v1930_v60  ;;  %v3974_v13 = vld [vmem:[%s6060_s20 + $0x420] sm:$0xf]  ;;  %v3547_v48 = vor.u32 %v4139_v43, %v3544_v45  ;;  %v4137_v60 = vld [vmem:[%s6060_s20 + $0xb4] sm:$0xf]  ;;  %v5666_v43 = vpack.c.bf16 %v5459_v61, %v5459_v61 }
0x152b   :  { %2908 = vmatmul.bf16.vlgmr.msra.gmra.mxu2 %v5527_v10  ;;  %v3539_v38 = vor.u32 %v4137_v60, %v3536_v62  ;;  %v3720_v45 = vld [vmem:[%s6060_s20 + $0x228] sm:$0xf0]  ;;  %v3824_v61 = vld [vmem:[%s6060_s20 + $0x2f8] sm:$0xf0] }
0x152c   :  { %2893 = vmatpush.bf16.msrb.mxu0 %v3711_v23  ;;  %2918 = vmatpush.bf16.msra.mxu1 %v3847_v63  ;;  %v3464_v23 = vld [vmem:[%s6060_s20 + $0x28] sm:$0xf0]  ;;  %v3958_v63 = vld [vmem:[%s6060_s20 + $0x400] sm:$0xf] }
0x152d   :  { %2878 = vmatpush.bf16.msra.mxu3 %v3663_v59  ;;  %2869 = vmatmul.bf16.vlgmr.msrb.gmra.mxu1 %v5438_v3  ;;  %v3475_v59 = vor.u32 %v4121_v39, %v3472_v58  ;;  %v4240_v39 = vld [vmem:[%s6060_s20 + $0x3e4] sm:$0xf0]  ;;  %v3752_v58 = vld [vmem:[%s6060_s20 + $0x268] sm:$0xf0] }
0x152e   :  { %2953 = vmatpush.bf16.msrb.mxu2 %v3499_v49  ;;  %v3451_v49 = vor.u32 %v4115_v29, %v3448_v26  ;;  %v4133_v29 = vld [vmem:[%s6060_s20 + $0x94] sm:$0xf]  ;;  %v3816_v60 = vld [vmem:[%s6060_s20 + $0x2e8] sm:$0xf0] }
0x1530   :  { %2894 = vmatpush.bf16.msrb.mxu0 %v3703_v21  ;;  %2919 = vmatpush.bf16.msra.mxu1 %v3839_v53  ;;  %v3563_v21 = vor.u32 %v4143_v20, %v3560_v9  ;;  %v4191_v53 = vld [vmem:[%s6060_s20 + $0x264] sm:$0xf]  ;;  %v4236_v20 = vld [vmem:[%s6060_s20 + $0x3c4] sm:$0xf0] }
0x1531   :  { %2879 = vmatpush.bf16.msra.mxu3 %v3655_v5  ;;  %v4119_v5 = vld [vmem:[%s6060_s20 + $0x24] sm:$0xf] }
0x1532   :  { %2954 = vmatpush.bf16.msrb.mxu2 %v3491_v54  ;;  %v3467_v7 = vor.u32 %v4119_v5, %v3464_v23  ;;  %v4189_v5 = vld [vmem:[%s6060_s20 + $0x254] sm:$0xf]  ;;  %v3744_v23 = vld [vmem:[%s6060_s20 + $0x258] sm:$0xf0] }
0x1533   :  { %2895 = vmatmul.bf16.vlgmr.msrb.gmra.mxu0 %v5529_v27  ;;  %v3747_v8 = vor.u32 %v4189_v5, %v3744_v23  ;;  %v2090_v25 = vld.sshfl [vmem:[#allocation1] sm:$0xff pattern:$0x73625140]  ;;  %v4165_v5 = vld [vmem:[%s6060_s20 + $0x194] sm:$0xf] }
0x1534   :  { %2939 = vmatpush.bf16.msra.mxu0 %v4015_v30  ;;  %2920 = vmatpush.bf16.msra.mxu1 %v3831_v0  ;;  %v3552_v30 = vld [vmem:[%s6060_s20 + $0xd8] sm:$0xf0]  ;;  %v3943_v0 = vor.u32 %v4240_v39, %v3942_v56  ;;  %v5627_v26 = vpack.c.bf16 %v2090_v25, %v2090_v25  ;;  %v4167_v56 = vld [vmem:[%s6060_s20 + $0x1a4] sm:$0xf]  ;;  %v3656_v39 = vld [vmem:[%s6060_s20 + $0x1a8] sm:$0xf0] }
0x1535   :  { %2880 = vmatpush.bf16.msra.mxu3 %v3647_v15  ;;  %v4248_v15 = vld [vmem:[%s6060_s20 + $0x424] sm:$0xf0]  ;;  %v3555_v35 = vor.u32 %v4141_v28, %v3552_v30  ;;  %v3520_v28 = vld [vmem:[%s6060_s20 + $0x98] sm:$0xf0]  ;;  %v4171_v30 = vld [vmem:[%s6060_s20 + $0x1c4] sm:$0xf] }
0x1536   :  { %2955 = vmatpush.bf16.msrb.mxu2 %v3483_v47  ;;  %v3975_v18 = vor.u32 %v4248_v15, %v3974_v13  ;;  %v3951_v47 = vor.u32 %v4242_v14, %v3950_v34  ;;  %v4173_v13 = vld [vmem:[%s6060_s20 + $0x1d4] sm:$0xf]  ;;  %v3680_v15 = vld [vmem:[%s6060_s20 + $0x1d8] sm:$0xf0]  ;;  %v3523_v34 = vor.u32 %v4133_v29, %v3520_v28  ;;  %v4163_v25 = vld [vmem:[%s6060_s20 + $0x184] sm:$0xf] }
0x1537   :  { %v3648_v23 = vld [vmem:[%s6060_s20 + $0x198] sm:$0xf0]  ;;  %v3640_v29 = vld [vmem:[%s6060_s20 + $0x188] sm:$0xf0]  ;;  %v4203_v28 = vld [vmem:[%s6060_s20 + $0x2c4] sm:$0xf] }
0x1538   :  { %2940 = vmatpush.bf16.msra.mxu0 %v4007_v50  ;;  %2965 = vmatpush.bf16.msrb.mxu1 %v3571_v12  ;;  %v3760_v50 = vld [vmem:[%s6060_s20 + $0x278] sm:$0xf0]  ;;  %v3528_v12 = vld [vmem:[%s6060_s20 + $0xa8] sm:$0xf0] }
0x1539   :  { %2881 = vmatpush.bf16.msra.mxu3 %v3639_v19  ;;  %v3459_v19 = vor.u32 %v4117_v16, %v3456_v17  ;;  %v3763_v54 = vor.u32 %v4193_v36, %v3760_v50  ;;  %v4187_v16 = vld [vmem:[%s6060_s20 + $0x244] sm:$0xf]  ;;  %v3736_v17 = vld [vmem:[%s6060_s20 + $0x248] sm:$0xf0]  ;;  %v3531_v9 = vor.u32 %v4135_v11, %v3528_v12  ;;  %v4234_v36 = vld [vmem:[%s6060_s20 + $0x3b4] sm:$0xf0]  ;;  %v3675_v50 = vor.u32 %v4171_v30, %v3672_v31 }
0x153a   :  { %2956 = vmatpush.bf16.msrb.mxu2 %v3475_v59  ;;  %v3755_v59 = vor.u32 %v4191_v53, %v3752_v58  ;;  %v3739_v24 = vor.u32 %v4187_v16, %v3736_v17  ;;  %v3712_v58 = vld [vmem:[%s6060_s20 + $0x218] sm:$0xf0]  ;;  %v3894_v16 = vld [vmem:[%s6060_s20 + $0x380] sm:$0xf]  ;;  %v4228_v17 = vld [vmem:[%s6060_s20 + $0x384] sm:$0xf0] }
0x153b   :  { %v3808_v11 = vld [vmem:[%s6060_s20 + $0x2d8] sm:$0xf0]  ;;  %v3800_v30 = vld [vmem:[%s6060_s20 + $0x2c8] sm:$0xf0]  ;;  %v3895_v31 = vor.u32 %v4228_v17, %v3894_v16  ;;  %v4195_v17 = vld [vmem:[%s6060_s20 + $0x284] sm:$0xf] }
0x153c   :  { %2941 = vmatpush.bf16.msra.mxu0 %v3999_v44  ;;  %2966 = vmatpush.bf16.msrb.mxu1 %v3563_v21  ;;  %v3959_v44 = vor.u32 %v4244_v42, %v3958_v63  ;;  %v3683_v21 = vor.u32 %v4173_v13, %v3680_v15  ;;  %v4169_v63 = vld [vmem:[%s6060_s20 + $0x1b4] sm:$0xf]  ;;  %v3664_v42 = vld [vmem:[%s6060_s20 + $0x1b8] sm:$0xf0] }
0x153d   :  { %2921 = vmatmul.bf16.vlgmr.msra.gmra.mxu1 %v5542_v40  ;;  %v4257_v13 = vld [vmem:[%s6060_s20 + $0x474] sm:$0xf]  ;;  %v4016_v15 = vld [vmem:[%s6060_s20 + $0x478] sm:$0xf0] }
0x153e   :  { %2957 = vmatpush.bf16.msrb.mxu2 %v3467_v7  ;;  %v3691_v7 = vor.u32 %v4175_v2, %v3688_v1  ;;  %v3902_v2 = vld [vmem:[%s6060_s20 + $0x390] sm:$0xf]  ;;  %v4230_v1 = vld [vmem:[%s6060_s20 + $0x394] sm:$0xf0] }
0x153f   :  { %v3903_v12 = vor.u32 %v4230_v1, %v3902_v2  ;;  %v4155_v2 = vld [vmem:[%s6060_s20 + $0x144] sm:$0xf]  ;;  %v3608_v1 = vld [vmem:[%s6060_s20 + $0x148] sm:$0xf0] }
0x1540   :  { %2942 = vmatpush.bf16.msra.mxu0 %v3991_v57  ;;  %2967 = vmatpush.bf16.msrb.mxu1 %v3555_v35  ;;  %v3699_v57 = vor.u32 %v4177_v51, %v3696_v52  ;;  %v3728_v35 = vld [vmem:[%s6060_s20 + $0x238] sm:$0xf0]  ;;  %v4232_v51 = vld [vmem:[%s6060_s20 + $0x3a4] sm:$0xf0]  ;;  %v3667_v52 = vor.u32 %v4169_v63, %v3664_v42  ;;  %v4201_v63 = vld [vmem:[%s6060_s20 + $0x2b4] sm:$0xf] }
0x1541   :  { %v3731_v14 = vor.u32 %v4185_v32, %v3728_v35  ;;  %v4241_v32 = vld [vmem:[%s6060_s20 + $0x3f4] sm:$0xf]  ;;  %v4255_v35 = vld [vmem:[%s6060_s20 + $0x464] sm:$0xf] }
0x1542   :  { %2958 = vmatpush.bf16.msrb.mxu2 %v3459_v19  ;;  %v3926_v19 = vld [vmem:[%s6060_s20 + $0x3c0] sm:$0xf] }
0x1544   :  { %2943 = vmatpush.bf16.msra.mxu0 %v3983_v6  ;;  %2968 = vmatpush.bf16.msrb.mxu1 %v3547_v48  ;;  %v4238_v6 = vld [vmem:[%s6060_s20 + $0x3d4] sm:$0xf0]  ;;  %v3910_v48 = vld [vmem:[%s6060_s20 + $0x3a0] sm:$0xf] }
0x1545   :  { %v3911_v62 = vor.u32 %v4232_v51, %v3910_v48  ;;  %v4157_v51 = vld [vmem:[%s6060_s20 + $0x154] sm:$0xf] }
0x1546   :  { %2959 = vmatpush.bf16.msrb.mxu2 %v3451_v49  ;;  %v3918_v49 = vld [vmem:[%s6060_s20 + $0x3b0] sm:$0xf] }
0x1548   :  { %2944 = vmatpush.bf16.msra.mxu0 %v3975_v18  ;;  %v3935_v18 = vor.u32 %v4238_v6, %v3934_v4  ;;  %2969 = vmatpush.bf16.msrb.mxu1 %v3539_v38  ;;  %v4179_v6 = vld [vmem:[%s6060_s20 + $0x204] sm:$0xf] }
0x1549   :  { %2960 = vmatmul.bf16.vlgmr.msrb.gmra.mxu2 %v5378_v22 }
0x154a   :  { %3004 = vmatpush.bf16.msra.mxu2 %v3763_v54  ;;  %v4131_v54 = vld [vmem:[%s6060_s20 + $0x84] sm:$0xf] }
0x154b   :  { %v3515_v22 = vor.u32 %v4131_v54, %v3512_v37  ;;  %v3803_v54 = vor.u32 %v4203_v28, %v3800_v30 }
0x154c   :  { %2945 = vmatpush.bf16.msra.mxu0 %v3967_v33  ;;  %v3927_v33 = vor.u32 %v4236_v20, %v3926_v19  ;;  %2970 = vmatpush.bf16.msrb.mxu1 %v3531_v9  ;;  %v3632_v20 = vld [vmem:[%s6060_s20 + $0x178] sm:$0xf0] }
0x154d   :  { %v2088_v9 = vld.sshfl [vmem:[#allocation1 + $0x38] sm:$0xff pattern:$0x73625140] }
0x154e   :  { %3005 = vmatpush.bf16.msra.mxu2 %v3755_v59  ;;  %v4207_v59 = vld [vmem:[%s6060_s20 + $0x2e4] sm:$0xf]  ;;  %v5781_v42 = vpack.c.bf16 %v2088_v9, %v2088_v9 }
0x154f   :  { %v3819_v38 = vor.u32 %v4207_v59, %v3816_v60  ;;  %v4251_v59 = vld [vmem:[%s6060_s20 + $0x444] sm:$0xf]  ;;  %v3992_v60 = vld [vmem:[%s6060_s20 + $0x448] sm:$0xf0] }
0x1550   :  { %2946 = vmatpush.bf16.msra.mxu0 %v3959_v44  ;;  %v4183_v44 = vld [vmem:[%s6060_s20 + $0x224] sm:$0xf]  ;;  %2971 = vmatpush.bf16.msrb.mxu1 %v3523_v34  ;;  %v3643_v34 = vor.u32 %v4163_v25, %v3640_v29  ;;  %v3592_v29 = vld [vmem:[%s6060_s20 + $0x128] sm:$0xf0] }
0x1551   :  { %v3723_v53 = vor.u32 %v4183_v44, %v3720_v45  ;;  %v3792_v45 = vld [vmem:[%s6060_s20 + $0x2b8] sm:$0xf0]  ;;  %v4247_v9 = vld [vmem:[%s6060_s20 + $0x424] sm:$0xf] }
0x1552   :  { %3006 = vmatpush.bf16.msra.mxu2 %v3747_v8  ;;  %v4205_v8 = vld [vmem:[%s6060_s20 + $0x2d4] sm:$0xf]  ;;  %v4151_v25 = vld [vmem:[%s6060_s20 + $0x124] sm:$0xf] }
0x1553   :  { %2947 = vmatmul.bf16.vlgmr.msra.gmra.mxu0 %v5627_v26 }
0x1554   :  { %2991 = vmatpush.bf16.msrb.mxu0 %v3699_v57  ;;  %v4181_v57 = vld [vmem:[%s6060_s20 + $0x214] sm:$0xf]  ;;  %2972 = vmatpush.bf16.msrb.mxu1 %v3515_v22 }
0x1555   :  { %v3715_v4 = vor.u32 %v4181_v57, %v3712_v58  ;;  %v4253_v22 = vld [vmem:[%s6060_s20 + $0x454] sm:$0xf]  ;;  %v3936_v58 = vld [vmem:[%s6060_s20 + $0x3d8] sm:$0xf0] }
0x1556   :  { %3007 = vmatpush.bf16.msra.mxu2 %v3739_v24  ;;  %v4019_v24 = vor.u32 %v4257_v13, %v4016_v15  ;;  %v4237_v57 = vld [vmem:[%s6060_s20 + $0x3d4] sm:$0xf]  ;;  %v3600_v13 = vld [vmem:[%s6060_s20 + $0x138] sm:$0xf0] }
0x1557   :  { %2973 = vmatmul.bf16.vlgmr.msrb.gmra.mxu1 %v5303_v41  ;;  %v4161_v41 = vld [vmem:[%s6060_s20 + $0x174] sm:$0xf] }
0x1558   :  { %2992 = vmatpush.bf16.msrb.mxu0 %v3691_v7  ;;  %v3704_v7 = vld [vmem:[%s6060_s20 + $0x208] sm:$0xf0] }
0x1559   :  { %v3707_v19 = vor.u32 %v4179_v6, %v3704_v7  ;;  %v3928_v6 = vld [vmem:[%s6060_s20 + $0x3c8] sm:$0xf0]  ;;  %v4249_v7 = vld [vmem:[%s6060_s20 + $0x434] sm:$0xf] }
0x155a   :  { %3008 = vmatpush.bf16.msra.mxu2 %v3731_v14  ;;  %v3624_v14 = vld [vmem:[%s6060_s20 + $0x168] sm:$0xf0] }
0x155c   :  { %2993 = vmatpush.bf16.msrb.mxu0 %v3683_v21  ;;  %v3811_v21 = vor.u32 %v4205_v8, %v3808_v11  ;;  %v3984_v8 = vld [vmem:[%s6060_s20 + $0x438] sm:$0xf0]  ;;  %v3611_v11 = vor.u32 %v4155_v2, %v3608_v1  ;;  %v4219_v2 = vld [vmem:[%s6060_s20 + $0x344] sm:$0xf] }
0x155e   :  { %3009 = vmatpush.bf16.msra.mxu2 %v3723_v53  ;;  %v3795_v53 = vor.u32 %v4201_v63, %v3792_v45  ;;  %v3904_v63 = vld [vmem:[%s6060_s20 + $0x398] sm:$0xf0]  ;;  %v3960_v45 = vld [vmem:[%s6060_s20 + $0x408] sm:$0xf0] }
0x1560   :  { %2994 = vmatpush.bf16.msrb.mxu0 %v3675_v50  ;;  %v4159_v50 = vld [vmem:[%s6060_s20 + $0x164] sm:$0xf] }
0x1561   :  { %v3627_v48 = vor.u32 %v4159_v50, %v3624_v14  ;;  %v3584_v50 = vld [vmem:[%s6060_s20 + $0x118] sm:$0xf0] }
0x1562   :  { %3010 = vmatpush.bf16.msra.mxu2 %v3715_v4  ;;  %v3939_v4 = vor.u32 %v4237_v57, %v3936_v58 }
0x1564   :  { %2995 = vmatpush.bf16.msrb.mxu0 %v3667_v52  ;;  %v3616_v52 = vld [vmem:[%s6060_s20 + $0x158] sm:$0xf0] }
0x1566   :  { %3011 = vmatpush.bf16.msra.mxu2 %v3707_v19  ;;  %v4233_v19 = vld [vmem:[%s6060_s20 + $0x3b4] sm:$0xf] }
0x1569   :  { %3012 = vmatmul.bf16.vlgmr.msra.gmra.mxu2 %v5529_v27 }
0x156a   :  { %3056 = vmatpush.bf16.msrb.mxu2 %v4019_v24 }
0x1594   :  { %v5949_v1 = vpop.f32.mrf.mxu2 }
0x1597   :  { %v1887_v46 = vpop.f32.mrf.mxu3 }
0x1598   :  { %v1894_v55 = vpack.c.bf16 %v1887_v46, %v1887_v46  ;;  %v4209_v46 = vld [vmem:[%s6060_s20 + $0x2f4] sm:$0xf] }
0x159a   :  { %3443 = vmatmul.msk.bf16.vlgmr.msrb.gmra.mxu3 %vm85_vm0, %v1894_v55  ;;  %v3827_v55 = vor.u32 %v4209_v46, %v3824_v61  ;;  %v4239_v46 = vld [vmem:[%s6060_s20 + $0x3e4] sm:$0xf]  ;;  %v4000_v61 = vld [vmem:[%s6060_s20 + $0x458] sm:$0xf0] }
0x159b   :  { %2926 = vmatpush.bf16.msrb.mxu3 %v3951_v47  ;;  %v3919_v47 = vor.u32 %v4234_v36, %v3918_v49  ;;  %v3635_v49 = vor.u32 %v4161_v41, %v3632_v20  ;;  %v4008_v36 = vld [vmem:[%s6060_s20 + $0x468] sm:$0xf0]  ;;  %v4003_v27 = vor.u32 %v4253_v22, %v4000_v61  ;;  %v3987_v41 = vor.u32 %v4249_v7, %v3984_v8  ;;  %v3920_v20 = vld [vmem:[%s6060_s20 + $0x3b8] sm:$0xf0] }
0x159c   :  { %3017 = vmatpush.bf16.msra.mxu1 %v3827_v55  ;;  %v4011_v44 = vor.u32 %v4255_v35, %v4008_v36  ;;  %v3923_v30 = vor.u32 %v4233_v19, %v3920_v20  ;;  %v3595_v35 = vor.u32 %v4151_v25, %v3592_v29  ;;  %v4149_v36 = vld [vmem:[%s6060_s20 + $0x114] sm:$0xf]  ;;  %v3576_v22 = vld [vmem:[%s6060_s20 + $0x108] sm:$0xf0]  ;;  %v3840_v7 = vld [vmem:[%s6060_s20 + $0x318] sm:$0xf0] }
0x159d   :  { %v4268_v19 = vld [vmem:[%s6066_s23 + $0x38] sm:$0xff]  ;;  %v4265_v25 = vld [vmem:[%s6066_s23 + $0x20] sm:$0xff] }
0x159e   :  { %3057 = vmatpush.bf16.msrb.mxu2 %v4011_v44  ;;  %v4243_v44 = vld [vmem:[%s6060_s20 + $0x404] sm:$0xf] }
0x159f   :  { %2927 = vmatpush.bf16.msrb.mxu3 %v3943_v0  ;;  %v3659_v0 = vor.u32 %v4167_v56, %v3656_v39  ;;  %v4199_v56 = vld [vmem:[%s6060_s20 + $0x2a4] sm:$0xf]  ;;  %v3784_v39 = vld [vmem:[%s6060_s20 + $0x2a8] sm:$0xf0] }
0x15a0   :  { %3018 = vmatpush.bf16.msra.mxu1 %v3819_v38  ;;  %v4197_v38 = vld [vmem:[%s6060_s20 + $0x294] sm:$0xf] }
0x15a1   :  { %2996 = vmatpush.bf16.msrb.mxu0 %v3659_v0  ;;  %v3787_v0 = vor.u32 %v4199_v56, %v3784_v39  ;;  %v3880_v39 = vld [vmem:[%s6060_s20 + $0x368] sm:$0xf0] }
0x15a2   :  { %3058 = vmatpush.bf16.msrb.mxu2 %v4003_v27  ;;  %v4223_v27 = vld [vmem:[%s6060_s20 + $0x364] sm:$0xf] }
0x15a3   :  { %2928 = vmatpush.bf16.msrb.mxu3 %v3935_v18  ;;  %v3651_v18 = vor.u32 %v4165_v5, %v3648_v23  ;;  %v3776_v5 = vld [vmem:[%s6060_s20 + $0x298] sm:$0xf0]  ;;  %v4235_v23 = vld [vmem:[%s6060_s20 + $0x3c4] sm:$0xf]  ;;  %v3883_v58 = vor.u32 %v4223_v27, %v3880_v39 }
0x15a4   :  { %3019 = vmatpush.bf16.msra.mxu1 %v3811_v21  ;;  %v3779_v15 = vor.u32 %v4197_v38, %v3776_v5  ;;  %v3931_v16 = vor.u32 %v4235_v23, %v3928_v6  ;;  %v3976_v21 = vld [vmem:[%s6060_s20 + $0x428] sm:$0xf0]  ;;  %v4215_v38 = vld [vmem:[%s6060_s20 + $0x324] sm:$0xf]  ;;  %v2859_v5 = vpop.f32.mrf.mxu2  ;;  %v4213_v6 = vld [vmem:[%s6060_s20 + $0x314] sm:$0xf] }
0x15a5   :  { %2997 = vmatpush.bf16.msrb.mxu0 %v3651_v18  ;;  %v3768_v18 = vld [vmem:[%s6060_s20 + $0x288] sm:$0xf0]  ;;  %v3843_v8 = vor.u32 %v4213_v6, %v3840_v7 }
0x15a6   :  { %v3771_v28 = vor.u32 %v4195_v17, %v3768_v18  ;;  %v4260_v17 = vld [vmem:[%s6065_s22 + $0x8] sm:$0xff]  ;;  %v4259_v18 = vld [vmem:[%s6065_s22] sm:$0xff] }
0x15a7   :  { %2929 = vmatpush.bf16.msrb.mxu3 %v3927_v33  ;;  %v3952_v33 = vld [vmem:[%s6060_s20 + $0x3f8] sm:$0xf0] }
0x15a8   :  { %v3955_v37 = vor.u32 %v4241_v32, %v3952_v33  ;;  %3020 = vmatpush.bf16.msra.mxu1 %v3803_v54  ;;  %v4231_v32 = vld [vmem:[%s6060_s20 + $0x3a4] sm:$0xf]  ;;  %v3912_v33 = vld [vmem:[%s6060_s20 + $0x3a8] sm:$0xf0] }
0x15a9   :  { %2998 = vmatpush.bf16.msrb.mxu0 %v3643_v34  ;;  %v3968_v34 = vld [vmem:[%s6060_s20 + $0x418] sm:$0xf0]  ;;  %v3915_v14 = vor.u32 %v4231_v32, %v3912_v33 }
0x15aa   :  { %2882 = vmatmul.bf16.vlgmr.msra.gmra.mxu3 %v5666_v43 }
0x15ab   :  { %2930 = vmatpush.bf16.msrb.mxu3 %v3919_v47  ;;  %v3944_v47 = vld [vmem:[%s6060_s20 + $0x3e8] sm:$0xf0] }
0x15ac   :  { %v3947_v55 = vor.u32 %v4239_v46, %v3944_v47  ;;  %2999 = vmatmul.bf16.vlgmr.msrb.gmra.mxu0 %v5666_v43  ;;  %3021 = vmatpush.bf16.msra.mxu1 %v3795_v53  ;;  %v3995_v43 = vor.u32 %v4251_v59, %v3992_v60  ;;  %v3587_v46 = vor.u32 %v4149_v36, %v3584_v50  ;;  %v4147_v47 = vld [vmem:[%s6060_s20 + $0x104] sm:$0xf]  ;;  %v3896_v53 = vld [vmem:[%s6060_s20 + $0x388] sm:$0xf0]  ;;  %v4221_v59 = vld [vmem:[%s6060_s20 + $0x354] sm:$0xf] }
0x15ad   :  { %3043 = vmatpush.bf16.msra.mxu0 %v3955_v37  ;;  %v4229_v37 = vld [vmem:[%s6060_s20 + $0x394] sm:$0xf]  ;;  %v3872_v60 = vld [vmem:[%s6060_s20 + $0x358] sm:$0xf0] }
0x15ae   :  { %3059 = vmatpush.bf16.msrb.mxu2 %v3995_v43  ;;  %v3907_v61 = vor.u32 %v4229_v37, %v3904_v63  ;;  %v3848_v43 = vld [vmem:[%s6060_s20 + $0x328] sm:$0xf0]  ;;  %v2909_v29 = vpop.f32.mrf.mxu2 }
0x15af   :  { %2931 = vmatpush.bf16.msrb.mxu3 %v3911_v62  ;;  %v3619_v62 = vor.u32 %v4157_v51, %v3616_v52  ;;  %v3888_v51 = vld [vmem:[%s6060_s20 + $0x378] sm:$0xf0]  ;;  %v4227_v52 = vld [vmem:[%s6060_s20 + $0x384] sm:$0xf]  ;;  %v3851_v23 = vor.u32 %v4215_v38, %v3848_v43 }
0x15b0   :  { %3022 = vmatpush.bf16.msra.mxu1 %v3787_v0  ;;  %v3899_v57 = vor.u32 %v4227_v52, %v3896_v53 }
0x15b1   :  { %3044 = vmatpush.bf16.msra.mxu0 %v3947_v55  ;;  %v3579_v55 = vor.u32 %v4147_v47, %v3576_v22 }
0x15b2   :  { %3060 = vmatpush.bf16.msrb.mxu2 %v3987_v41  ;;  %v2870_v41 = vpop.f32.mrf.mxu1 }
0x15b3   :  { %2932 = vmatpush.bf16.msrb.mxu3 %v3903_v12  ;;  %v4153_v12 = vld [vmem:[%s6060_s20 + $0x134] sm:$0xf] }
0x15b4   :  { %v3603_v24 = vor.u32 %v4153_v12, %v3600_v13  ;;  %3023 = vmatpush.bf16.msra.mxu1 %v3779_v15  ;;  %v3832_v12 = vld [vmem:[%s6060_s20 + $0x308] sm:$0xf0]  ;;  %v2844_v15 = vpop.f32.mrf.mxu0 }
0x15b5   :  { %3045 = vmatpush.bf16.msra.mxu0 %v3939_v4 }
0x15b6   :  { %v2911_v36 = vpop.f32.mrf.mxu2 }
0x15b7   :  { %2933 = vmatpush.bf16.msrb.mxu3 %v3895_v31  ;;  %v3979_v31 = vor.u32 %v4247_v9, %v3976_v21  ;;  %v4266_v21 = vld [vmem:[%s6066_s23 + $0x28] sm:$0xff] }
0x15b8   :  { %3024 = vmatpush.bf16.msra.mxu1 %v3771_v28  ;;  %v4264_v28 = vld [vmem:[%s6066_s23 + $0x18] sm:$0xff] }
0x15b9   :  { %3046 = vmatpush.bf16.msra.mxu0 %v3931_v16  ;;  %3061 = vmatpush.bf16.msrb.mxu2 %v3979_v31 }
0x15ba   :  { %2934 = vmatmul.bf16.vlgmr.msrb.gmra.mxu3 %v5781_v42  ;;  %v2872_v20 = vpop.f32.mrf.mxu1 }
0x15bb   :  { %2978 = vmatpush.bf16.msra.mxu3 %v3635_v49  ;;  %v4245_v49 = vld [vmem:[%s6060_s20 + $0x414] sm:$0xf]  ;;  %3025 = vmatmul.bf16.vlgmr.msra.gmra.mxu1 %v5527_v10  ;;  %v3963_v10 = vor.u32 %v4243_v44, %v3960_v45 }
0x15bc   :  { %v3971_v54 = vor.u32 %v4245_v49, %v3968_v34  ;;  %v2846_v16 = vpop.f32.mrf.mxu0  ;;  %3206 = vmatpush.bf16.msrb.mxu1 %v4268_v19  ;;  %v2109_v34 = vld [vmem:[%s6067_s21] sm:$0x3] }
0x15bd   :  { %3047 = vmatpush.bf16.msra.mxu0 %v3923_v30  ;;  %v4340_v30 = vld [vmem:[%s6064_s19] ss:$0 sm:$0xff]  ;;  %v2111_v50 = vperm.slane %v2109_v34, 0 }
0x15be   :  { %3062 = vmatpush.bf16.msrb.mxu2 %v3971_v54  ;;  %v4262_v54 = vld [vmem:[%s6066_s23 + $0x8] sm:$0xff] }
0x15bf   :  { %2979 = vmatpush.bf16.msra.mxu3 %v3627_v48  ;;  %v4225_v48 = vld [vmem:[%s6060_s20 + $0x374] sm:$0xf]  ;;  %v2845_v44 = vadd.f32 %v2844_v15, %v2111_v50 }
0x15c0   :  { %v3891_v56 = vor.u32 %v4225_v48, %v3888_v51 }
0x15c1   :  { %3048 = vmatpush.bf16.msra.mxu0 %v3915_v14  ;;  %v2858_v47 = vadd.f32 %v5949_v1, %v2845_v44 }
0x15c2   :  { %3063 = vmatpush.bf16.msrb.mxu2 %v3963_v10 }
0x15c3   :  { %2980 = vmatpush.bf16.msra.mxu3 %v3619_v62  ;;  %v3875_v62 = vor.u32 %v4221_v59, %v3872_v60  ;;  %v2871_v53 = vadd.f32 %v2870_v41, %v2858_v47 }
0x15c4   :  { %v2896_v9 = vpop.f32.mrf.mxu0 }
0x15c5   :  { %3049 = vmatpush.bf16.msra.mxu0 %v3907_v61  ;;  %3064 = vmatmul.bf16.vlgmr.msrb.gmra.mxu2 %v5627_v26  ;;  %v3864_v26 = vld [vmem:[%s6060_s20 + $0x348] sm:$0xf0]  ;;  %v2112_v61 = vperm.slane %v2109_v34, 1 }
0x15c6   :  { %v3867_v0 = vor.u32 %v4219_v2, %v3864_v26 }
0x15c7   :  { %2981 = vmatpush.bf16.msra.mxu3 %v3611_v11  ;;  %v4211_v11 = vld [vmem:[%s6060_s20 + $0x304] sm:$0xf] }
0x15c8   :  { %v3835_v13 = vor.u32 %v4211_v11, %v3832_v12 }
0x15c9   :  { %3050 = vmatpush.bf16.msra.mxu0 %v3899_v57 }
0x15cb   :  { %2982 = vmatpush.bf16.msra.mxu3 %v3603_v24  ;;  %v2922_v24 = vpop.f32.mrf.mxu1 }
0x15cc   :  { %3051 = vmatmul.bf16.vlgmr.msra.gmra.mxu0 %v5781_v42  ;;  %v3856_v42 = vld [vmem:[%s6060_s20 + $0x338] sm:$0xf0]  ;;  %v2898_v31 = vpop.f32.mrf.mxu0  ;;  %v2961_v48 = vpop.f32.mrf.mxu2 }
0x15cd   :  { %3253 = vmatpush.bf16.msrb.mxu0 %v4260_v17  ;;  %v2962_v52 = vadd.f32 %v2961_v48, %v2112_v61  ;;  %v4271_v17 = vld [vmem:[%s6066_s23 + $0x50] sm:$0xff] }
0x15cf   :  { %2983 = vmatpush.bf16.msra.mxu3 %v3595_v35  ;;  %v4263_v35 = vld [vmem:[%s6066_s23 + $0x10] sm:$0xff] }
0x15d1   :  { %3254 = vmatpush.bf16.msrb.mxu0 %v4259_v18  ;;  %v4270_v18 = vld [vmem:[%s6066_s23 + $0x48] sm:$0xff] }
0x15d3   :  { %2984 = vmatpush.bf16.msra.mxu3 %v3587_v46  ;;  %v2924_v33 = vpop.f32.mrf.mxu1  ;;  %v4261_v46 = vld [vmem:[%s6066_s23] sm:$0xff] }
0x15d4   :  { %v2948_v14 = vpop.f32.mrf.mxu0  ;;  %v2963_v27 = vpop.f32.mrf.mxu2 }
0x15d7   :  { %2985 = vmatpush.bf16.msra.mxu3 %v3579_v55 }
0x15da   :  { %2986 = vmatmul.bf16.vlgmr.msra.gmra.mxu3 %v5438_v3  ;;  %v4217_v3 = vld [vmem:[%s6060_s20 + $0x334] sm:$0xf] }
0x15db   :  { %3030 = vmatpush.bf16.msrb.mxu3 %v3891_v56  ;;  %v3859_v4 = vor.u32 %v4217_v3, %v3856_v42  ;;  %v2974_v51 = vpop.f32.mrf.mxu1  ;;  %v4276_v3 = vld [vmem:[%s6066_s23 + $0x78] sm:$0xff] }
0x15dc   :  { %v2950_v22 = vpop.f32.mrf.mxu0  ;;  %v2975_v55 = vadd.f32 %v2974_v51, %v2962_v52 }
0x15df   :  { %3031 = vmatpush.bf16.msrb.mxu3 %v3883_v58 }
0x15e3   :  { %3032 = vmatpush.bf16.msrb.mxu3 %v3875_v62  ;;  %v2976_v39 = vpop.f32.mrf.mxu1 }
0x15e7   :  { %3033 = vmatpush.bf16.msrb.mxu3 %v3867_v0 }
0x15eb   :  { %3034 = vmatpush.bf16.msrb.mxu3 %v3859_v4  ;;  %v4275_v4 = vld [vmem:[%s6066_s23 + $0x70] sm:$0xff] }
0x15ec   :  { %v3013_v26 = vpop.f32.mrf.mxu2 }
0x15ef   :  { %3035 = vmatpush.bf16.msrb.mxu3 %v3851_v23  ;;  %v4274_v23 = vld [vmem:[%s6066_s23 + $0x68] sm:$0xff] }
0x15f3   :  { %3036 = vmatpush.bf16.msrb.mxu3 %v3843_v8  ;;  %v4273_v8 = vld [vmem:[%s6066_s23 + $0x60] sm:$0xff] }
0x15f4   :  { %v3015_v43 = vpop.f32.mrf.mxu2 }
0x15f7   :  { %3037 = vmatpush.bf16.msrb.mxu3 %v3835_v13  ;;  %v4272_v13 = vld [vmem:[%s6066_s23 + $0x58] sm:$0xff] }
0x15fa   :  { %3038 = vmatmul.bf16.vlgmr.msrb.gmra.mxu3 %v5542_v40  ;;  %v4267_v40 = vld [vmem:[%s6066_s23 + $0x30] sm:$0xff] }
0x15fb   :  { %3207 = vmatpush.bf16.msrb.mxu1 %v4267_v40  ;;  %3219 = vmatpush.bf16.msra.mxu3 %v4276_v3  ;;  %v4269_v40 = vld [vmem:[%s6066_s23 + $0x40] sm:$0xff] }
0x15ff   :  { %3208 = vmatpush.bf16.msrb.mxu1 %v4266_v21  ;;  %3220 = vmatpush.bf16.msra.mxu3 %v4275_v4 }
0x1603   :  { %3209 = vmatpush.bf16.msrb.mxu1 %v4265_v25  ;;  %3221 = vmatpush.bf16.msra.mxu3 %v4274_v23 }
0x1607   :  { %3210 = vmatpush.bf16.msrb.mxu1 %v4264_v28  ;;  %3222 = vmatpush.bf16.msra.mxu3 %v4273_v8 }
0x160b   :  { %3211 = vmatpush.bf16.msrb.mxu1 %v4263_v35  ;;  %3223 = vmatpush.bf16.msra.mxu3 %v4272_v13 }
0x160f   :  { %3212 = vmatpush.bf16.msrb.mxu1 %v4262_v54  ;;  %3224 = vmatpush.bf16.msra.mxu3 %v4271_v17 }
0x1613   :  { %3213 = vmatpush.bf16.msrb.mxu1 %v4261_v46  ;;  %3225 = vmatpush.bf16.msra.mxu3 %v4270_v18 }
0x1617   :  { %3226 = vmatpush.bf16.msra.mxu3 %v4269_v40 }
0x161d   :  { %v1923_v32 = vpop.f32.mrf.mxu3 }
0x161e   :  { %v1924_v49 = vadd.f32 %v4340_v30, %v1923_v32 }
0x1620   :  { %4436 = vtanh.f32 %v1924_v49 }
0x1625   :  { %v1925_v37 = vpop.f32.mrf.mxu3 }
0x1626   :  { %v4437_v63 = vpop.eup %4436  ;;  %v4341_v37 = vld [vmem:[%s6068_s24] ss:$0 sm:$0xff] }
0x1627   :  { %v3075_v45 = vpack.c.bf16 %v4437_v63, %v4437_v63 }
0x1629   :  { %4092 = vmatmul.msk.bf16.vlgmr.msrb.gmra.mxu0 %vm85_vm0, %v3075_v45  ;;  %v3000_v60 = vpop.f32.mrf.mxu0 }
0x162d   :  { %v2883_v10 = vpop.f32.mrf.mxu3 }
0x162e   :  { %v2884_v56 = vadd.f32 %v2883_v10, %v2871_v53 }
0x1630   :  { %v2897_v57 = vadd.f32 %v2896_v9, %v2884_v56 }
0x1631   :  { %v3002_v42 = vpop.f32.mrf.mxu0 }
0x1632   :  { %v2910_v59 = vadd.f32 %v2909_v29, %v2897_v57 }
0x1634   :  { %v2923_v62 = vadd.f32 %v2922_v24, %v2910_v59 }
0x1635   :  { %v2885_v58 = vpop.f32.mrf.mxu3 }
0x1638   :  { %v3026_v7 = vpop.f32.mrf.mxu1 }
0x163d   :  { %v2935_v2 = vpop.f32.mrf.mxu3 }
0x163e   :  { %v2936_v0 = vadd.f32 %v2935_v2, %v2923_v62 }
0x1640   :  { %v2949_v1 = vadd.f32 %v2948_v14, %v2936_v0  ;;  %v3028_v11 = vpop.f32.mrf.mxu1 }
0x1642   :  { %4438 = vtanh.f32 %v2949_v1 }
0x1645   :  { %v2937_v38 = vpop.f32.mrf.mxu3 }
0x1648   :  { %v4439_v5 = vpop.eup %4438  ;;  %v3065_v15 = vpop.f32.mrf.mxu2 }
0x1649   :  { %v3108_v6 = vpack.c.bf16 %v4439_v5, %v4439_v5  ;;  %v3052_v12 = vpop.f32.mrf.mxu0 }
0x164b   :  { %3214 = vmatmul.bf16.vlgmr.msrb.gmra.mxu1 %v3108_v6 }
0x1650   :  { %v3067_v19 = vpop.f32.mrf.mxu2 }
0x1651   :  { %v3054_v41 = vpop.f32.mrf.mxu0 }
0x165d   :  { %v2987_v16 = vpop.f32.mrf.mxu3 }
0x165e   :  { %v2988_v9 = vadd.f32 %v2987_v16, %v2975_v55 }
0x1660   :  { %v3001_v21 = vadd.f32 %v3000_v60, %v2988_v9 }
0x1662   :  { %v3014_v24 = vadd.f32 %v3013_v26, %v3001_v21 }
0x1664   :  { %v3027_v25 = vadd.f32 %v3026_v7, %v3014_v24 }
0x1665   :  { %v2989_v20 = vpop.f32.mrf.mxu3 }
0x167d   :  { %v3039_v29 = vpop.f32.mrf.mxu3 }
0x167e   :  { %v3040_v28 = vadd.f32 %v3039_v29, %v3027_v25 }
0x1680   :  { %v3053_v30 = vadd.f32 %v3052_v12, %v3040_v28 }
0x1682   :  { %v3066_v31 = vadd.f32 %v3065_v15, %v3053_v30 }
0x1684   :  { %4440 = vtanh.f32 %v3066_v31 }
0x1685   :  { %v3041_v32 = vpop.f32.mrf.mxu3 }
0x168a   :  { %v4441_v33 = vpop.eup %4440 }
0x168b   :  { %v3109_v49 = vpack.c.bf16 %v4441_v33, %v4441_v33 }
0x168d   :  { %3227 = vmatmul.bf16.vlgmr.msra.gmra.mxu3 %v3109_v49 }
0x16a6   :  { %v3256_v34 = vpop.f32.mrf.mxu0 }
0x16ae   :  { %v3258_v35 = vpop.f32.mrf.mxu0 }
0x16c8   :  { %v3215_v36 = vpop.f32.mrf.mxu1 }
0x16d0   :  { %v3217_v50 = vpop.f32.mrf.mxu1 }
0x1710   :  { %v3228_v14 = vpop.f32.mrf.mxu3 }
0x1711   :  { %v3229_v54 = vadd.f32 %v3228_v14, %v3215_v36 }
0x1713   :  { %v3257_v63 = vadd.f32 %v3256_v34, %v3229_v54 }
0x1715   :  { %v3264_v44 = vadd.f32 %v4341_v37, %v3257_v63 }
0x1717   :  { %3265 = vst [vmem:[%s6139_s8] sm:$0x3] %v3264_v44 }
0x1718   :  { %v3230_v45 = vpop.f32.mrf.mxu3 }

</bundles_post_ra>
